<compile_context>
chip_gen: v7x
topology: tpu7x:2x2x1
jax: 0.10.0
libtpu: 0.0.40
codegen_flags: <defaults>
</compile_context>

<pallas_src>
import functools

import jax
import jax.numpy as jnp
from jax import lax
from jax.experimental import pallas as pl
from jax.experimental.pallas import tpu as pltpu

EPS = 1e-5
_VMEM_LIMIT = 64 * 1024 * 1024  # permission cap only; <= physical VMEM on v5e/v6e/v7x


def _pick_lane_tile(m):
    """Largest lane tile (multiple of 128, up to 32768) dividing m, else m."""
    for tm in (32768, 16384, 8192, 4096, 2048, 1024, 512, 256, 128):
        if m % tm == 0:
            return tm
    return m


# --------------------------------------------------------------------------- #
# in-kernel helpers
# --------------------------------------------------------------------------- #
def _lane_stats(x):
    """Per-channel (sum, sum-of-squares) over the lane axis -> (C, 2)."""
    s = jnp.sum(x, axis=1, keepdims=True)
    q = jnp.sum(x * x, axis=1, keepdims=True)
    return jnp.concatenate([s, q], axis=1)


def _shifted_operands(a, h, w):
    """a: (C, H*W) for ONE image.  Returns (next-row, next-col, next-row-col)
    operands for the sub-pixel deconv, zero where out of range.  pltpu.roll
    (XLU) + iota masks: wrap-around lanes are exactly the masked ones."""
    hw = h * w
    lane = lax.broadcasted_iota(jnp.int32, (1, hw), 1)
    mask_h = lane < (h - 1) * w          # valid row shift  (row < H-1)
    mask_w = (lane % w) < (w - 1)        # valid col shift  (col < W-1)
    zero = jnp.zeros_like(a)
    b = jnp.where(mask_h, pltpu.roll(a, hw - w, axis=1), zero) if h > 1 else zero
    c = jnp.where(mask_w, pltpu.roll(a, hw - 1, axis=1), zero) if w > 1 else zero
    if h > 1 and w > 1:
        d = jnp.where(jnp.logical_and(mask_h, mask_w),
                      pltpu.roll(a, hw - w - 1, axis=1), zero)
    else:
        d = zero
    return b, c, d


def _deconv_parities(wt_ref, a, b, c, d):
    """Sub-pixel decomposition of ConvTranspose2d(3, stride=2, pad=1, out_pad=1).

    wt_ref[ky, kx] is the (Cout, Cin) tap.  With a = x[m,n], b = x[m+1,n],
    c = x[m,n+1], d = x[m+1,n+1] (zero out of range):
      ee = out[2m  ,2n  ],  eo = out[2m  ,2n+1],
      oe = out[2m+1,2n  ],  oo = out[2m+1,2n+1].
    """
    dot = lambda t, x: jnp.dot(t, x, preferred_element_type=jnp.float32)
    ee = dot(wt_ref[1, 1, :, :], a)
    eo = dot(wt_ref[1, 2, :, :], a) + dot(wt_ref[1, 0, :, :], c)
    oe = dot(wt_ref[2, 1, :, :], a) + dot(wt_ref[0, 1, :, :], b)
    oo = (dot(wt_ref[2, 2, :, :], a) + dot(wt_ref[0, 2, :, :], b) +
          dot(wt_ref[2, 0, :, :], c) + dot(wt_ref[0, 0, :, :], d))
    return ee, eo, oe, oo


# --------------------------------------------------------------------------- #
# kernels
# --------------------------------------------------------------------------- #
def _bn1_stats_kernel(x_ref, w1t_ref, o_ref):
    """Partial BN1 statistics of conv1(x) for one (image, lane-tile)."""
    y = jnp.dot(w1t_ref[...], x_ref[...], preferred_element_type=jnp.float32)
    o_ref[...] = _lane_stats(y)


def _stage1_deconv_stats_kernel(x_ref, w1t_ref, sc1_ref, sh1_ref, wt_ref,
                                t1_ref, p2_ref, *, h, w):
    """t1 = relu(bn1(conv1 x)) for one image, plus partial BN2 stats of
    deconv2(t1) (pooled over the 4 sub-pixel parities)."""
    y = jnp.dot(w1t_ref[...], x_ref[...], preferred_element_type=jnp.float32)
    a = jnp.maximum(y * sc1_ref[...] + sh1_ref[...], 0.0)
    t1_ref[...] = a

    b, c, d = _shifted_operands(a, h, w)
    stats = jnp.zeros((a.shape[0], 2), jnp.float32)
    for o_p in _deconv_parities(wt_ref, a, b, c, d):
        stats = stats + _lane_stats(o_p)
    p2_ref[...] = stats


def _bn3_stats_kernel(t1_ref, wt_ref, sc2_ref, sh2_ref, w3t_ref, p3_ref, *, h, w):
    """Partial BN3 statistics of conv3(relu(bn2(deconv2 t1))) for one image."""
    a = t1_ref[...]
    b, c, d = _shifted_operands(a, h, w)
    c3 = w3t_ref.shape[0]
    stats = jnp.zeros((c3, 2), jnp.float32)
    for o_p in _deconv_parities(wt_ref, a, b, c, d):
        y_p = jnp.maximum(o_p * sc2_ref[...] + sh2_ref[...], 0.0)
        t_p = jnp.dot(w3t_ref[...], y_p, preferred_element_type=jnp.float32)
        stats = stats + _lane_stats(t_p)
    p3_ref[...] = stats


def _final_kernel(t1_ref, wt_ref, sc2_ref, sh2_ref, w3t_ref, sc3_ref, sh3_ref,
                  o_ref, *, h, w):
    """Recompute deconv2+BN2+ReLU+conv3, apply BN3+ReLU, write parity-major."""
    a = t1_ref[...]
    b, c, d = _shifted_operands(a, h, w)
    for p, o_p in enumerate(_deconv_parities(wt_ref, a, b, c, d)):
        y_p = jnp.maximum(o_p * sc2_ref[...] + sh2_ref[...], 0.0)
        t_p = jnp.dot(w3t_ref[...], y_p, preferred_element_type=jnp.float32)
        o_ref[p] = jnp.maximum(t_p * sc3_ref[...] + sh3_ref[...], 0.0)


# --------------------------------------------------------------------------- #
# wrapper
# --------------------------------------------------------------------------- #
def _bn_affine(stat_sum, count, gamma, beta):
    """(sum, sum-sq) -> per-channel BN scale/shift (biased var, as PyTorch)."""
    mean = stat_sum[:, 0] / count
    var = jnp.maximum(stat_sum[:, 1] / count - mean * mean, 0.0)
    scale = gamma * lax.rsqrt(var + EPS)
    shift = beta - mean * scale
    return scale.reshape(-1, 1), shift.reshape(-1, 1)


def decoder_block(x_nchw, params):
    n, cin, h, w = x_nchw.shape
    hw = h * w
    c4 = params["w1"].shape[1]
    c3 = params["w3"].shape[1]

    x = x_nchw.reshape(n, cin, hw)                    # free reshape, no copy
    w1t = params["w1"].T                              # (C4, Cin)
    wt = jnp.transpose(params["w2"], (0, 1, 3, 2))    # (3, 3, Cout, Cin) taps
    w3t = params["w3"].T                              # (C3, C4)

    par = functools.partial
    cp = lambda k: pltpu.CompilerParams(
        dimension_semantics=("parallel",) * k, vmem_limit_bytes=_VMEM_LIMIT)

    # ---- K1: BN1 partial stats of conv1(x), big lane tiles, fully parallel --
    t_hw = _pick_lane_tile(hw)
    n_t = hw // t_hw
    p1 = pl.pallas_call(
        _bn1_stats_kernel,
        out_shape=jax.ShapeDtypeStruct((n, n_t, c4, 2), jnp.float32),
        grid=(n, n_t),
        in_specs=[pl.BlockSpec((None, cin, t_hw), lambda b, t: (b, 0, t)),
                  pl.BlockSpec((c4, cin), lambda b, t: (0, 0))],
        out_specs=pl.BlockSpec((None, None, c4, 2), lambda b, t: (b, t, 0, 0)),
        compiler_params=cp(2),
    )(x, w1t)
    sc1, sh1 = _bn_affine(p1.sum(axis=(0, 1)), n * hw,
                          params["g1"], params["be1"])

    # ---- K2: t1 = relu(bn1(conv1 x)) + BN2 partial stats of deconv2(t1) -----
    t1, p2 = pl.pallas_call(
        par(_stage1_deconv_stats_kernel, h=h, w=w),
        out_shape=(jax.ShapeDtypeStruct((n, c4, hw), jnp.float32),
                   jax.ShapeDtypeStruct((n, c4, 2), jnp.float32)),
        grid=(n,),
        in_specs=[pl.BlockSpec((None, cin, hw), lambda b: (b, 0, 0)),
                  pl.BlockSpec((c4, cin), lambda b: (0, 0)),
                  pl.BlockSpec((c4, 1), lambda b: (0, 0)),
                  pl.BlockSpec((c4, 1), lambda b: (0, 0)),
                  pl.BlockSpec((3, 3, c4, c4), lambda b: (0, 0, 0, 0))],
        out_specs=(pl.BlockSpec((None, c4, hw), lambda b: (b, 0, 0)),
                   pl.BlockSpec((None, c4, 2), lambda b: (b, 0, 0))),
        compiler_params=cp(1),
    )(x, w1t, sc1, sh1, wt)
    sc2, sh2 = _bn_affine(p2.sum(axis=0), 4 * n * hw,
                          params["g2"], params["be2"])

    # ---- K3: BN3 partial stats of conv3(relu(bn2(deconv2 t1))) --------------
    p3 = pl.pallas_call(
        par(_bn3_stats_kernel, h=h, w=w),
        out_shape=jax.ShapeDtypeStruct((n, c3, 2), jnp.float32),
        grid=(n,),
        in_specs=[pl.BlockSpec((None, c4, hw), lambda b: (b, 0, 0)),
                  pl.BlockSpec((3, 3, c4, c4), lambda b: (0, 0, 0, 0)),
                  pl.BlockSpec((c4, 1), lambda b: (0, 0)),
                  pl.BlockSpec((c4, 1), lambda b: (0, 0)),
                  pl.BlockSpec((c3, c4), lambda b: (0, 0))],
        out_specs=pl.BlockSpec((None, c3, 2), lambda b: (b, 0, 0)),
        compiler_params=cp(1),
    )(t1, wt, sc2, sh2, w3t)
    sc3, sh3 = _bn_affine(p3.sum(axis=0), 4 * n * hw,
                          params["g3"], params["be3"])

    # ---- K4: apply everything, lane-dense parity-major output ---------------
    out_p = pl.pallas_call(
        par(_final_kernel, h=h, w=w),
        out_shape=jax.ShapeDtypeStruct((n, 4, c3, hw), jnp.float32),
        grid=(n,),
        in_specs=[pl.BlockSpec((None, c4, hw), lambda b: (b, 0, 0)),
                  pl.BlockSpec((3, 3, c4, c4), lambda b: (0, 0, 0, 0)),
                  pl.BlockSpec((c4, 1), lambda b: (0, 0)),
                  pl.BlockSpec((c4, 1), lambda b: (0, 0)),
                  pl.BlockSpec((c3, c4), lambda b: (0, 0)),
                  pl.BlockSpec((c3, 1), lambda b: (0, 0)),
                  pl.BlockSpec((c3, 1), lambda b: (0, 0))],
        out_specs=pl.BlockSpec((None, 4, c3, hw), lambda b: (b, 0, 0, 0)),
        compiler_params=cp(1),
    )(t1, wt, sc2, sh2, w3t, sc3, sh3)

    # parity-major (N, [ee,eo,oe,oo], C3, H*W) -> NCHW (N, C3, 2H, 2W).
    # TODO(synk): fold this interleave into the K4 store (in-kernel lane zip).
    out = (out_p.reshape(n, 2, 2, c3, h, w)
                .transpose(0, 3, 4, 1, 5, 2)
                .reshape(n, c3, 2 * h, 2 * w))
    return out


# --------------------------------------------------------------------------- #
# pure-JAX reference (PyTorch DecoderBlock, training-mode BN) for validation
# --------------------------------------------------------------------------- #
def _reference_decoder_block(x, params):
    def bn_relu(y, gamma, beta):
        mean = jnp.mean(y, axis=(0, 2, 3), keepdims=True)
        var = jnp.var(y, axis=(0, 2, 3), keepdims=True)          # biased
        yhat = (y - mean) * lax.rsqrt(var + EPS)
        return jax.nn.relu(yhat * gamma.reshape(1, -1, 1, 1)
                           + beta.reshape(1, -1, 1, 1))

    y = (jnp.einsum("nchw,cd->ndhw", x, params["w1"])
         + params["b1"].reshape(1, -1, 1, 1))
    y = bn_relu(y, params["g1"], params["be1"])

    # ConvTranspose2d(3, stride=2, padding=1, output_padding=1) as a dilated
    # convolution with the spatially flipped, channel-transposed kernel.
    k = jnp.transpose(params["w2"], (3, 2, 0, 1))[:, :, ::-1, ::-1]
    y = lax.conv_general_dilated(y, k, window_strides=(1, 1),
                                 padding=((1, 2), (1, 2)), lhs_dilation=(2, 2),
                                 dimension_numbers=("NCHW", "OIHW", "NCHW"))
    y = y + params["b2"].reshape(1, -1, 1, 1)
    y = bn_relu(y, params["g2"], params["be2"])

    y = (jnp.einsum("nchw,cd->ndhw", y, params["w3"])
         + params["b3"].reshape(1, -1, 1, 1))
    return bn_relu(y, params["g3"], params["be3"])


if __name__ == "__main__":
    N, Cin, H, W = 2, 16, 8, 8
    n_filters = 8
    C4 = Cin // 4

    ks = jax.random.split(jax.random.PRNGKey(0), 12)
    x_nchw = jax.random.normal(ks[0], (N, Cin, H, W), jnp.float32)

    params = dict(
        # conv1: PyTorch weight (C4, Cin, 1, 1) stored here as (Cin, C4)
        w1=0.1 * jax.random.normal(ks[1], (Cin, C4), jnp.float32),
        b1=0.1 * jax.random.normal(ks[2], (C4,), jnp.float32),
        g1=1.0 + 0.1 * jax.random.normal(ks[3], (C4,), jnp.float32),
        be1=0.1 * jax.random.normal(ks[4], (C4,), jnp.float32),
        # deconv2: PyTorch weight (C4_in, C4_out, 3, 3) stored as (3, 3, C4_in, C4_out)
        w2=0.1 * jax.random.normal(ks[5], (3, 3, C4, C4), jnp.float32),
        b2=0.1 * jax.random.normal(ks[6], (C4,), jnp.float32),
        g2=1.0 + 0.1 * jax.random.normal(ks[7], (C4,), jnp.float32),
        be2=0.1 * jax.random.normal(ks[8], (C4,), jnp.float32),
        # conv3: PyTorch weight (n_filters, C4, 1, 1) stored as (C4, n_filters)
        w3=0.1 * jax.random.normal(ks[9], (C4, n_filters), jnp.float32),
        b3=0.1 * jax.random.normal(ks[10], (n_filters,), jnp.float32),
        g3=jnp.ones((n_filters,), jnp.float32),
        be3=0.1 * jax.random.normal(ks[11], (n_filters,), jnp.float32),
    )

    out = jax.jit(decoder_block)(x_nchw, params)
    jax.block_until_ready(out)
    assert out.shape == (N, n_filters, 2 * H, 2 * W), out.shape

    ref = _reference_decoder_block(x_nchw, params)
    err = float(jnp.max(jnp.abs(out - ref)))
    assert err < 2e-4, f"max abs err vs reference: {err}"
    print("KERNEL_OK")
</pallas_src>

<mosaic_0001>
module attributes {stable_mosaic.version = 11 : i64} {
  func.func @_bn1_stats_kernel(%arg0: i32, %arg1: i32, %arg2: memref<1x16x64xf32, #tpu.memory_space<vmem>>, %arg3: memref<4x16xf32, #tpu.memory_space<vmem>>, %arg4: memref<1x1x4x2xf32, #tpu.memory_space<vmem>>) attributes {dimension_semantics = [#tpu.dimension_semantics<parallel>, #tpu.dimension_semantics<parallel>], iteration_bounds = array<i64: 2, 1>, scalar_prefetch = 0 : i64, scratch_operands = 0 : i64, tpu.core_type = #tpu.core_type<tc>, window_params = [{transform_indices = @transform_0, window_bounds = array<i64: 1, 16, 64>}, {pipeline_mode = #tpu.pipeline_mode<synchronous>, transform_indices = @transform_1, window_bounds = array<i64: 4, 16>}, {transform_indices = @transform_2, window_bounds = array<i64: 1, 1, 4, 2>}]} {
    %c0 = arith.constant 0 : index
    %c0_0 = arith.constant 0 : index
    %0 = vector.load %arg3[%c0, %c0_0] : memref<4x16xf32, #tpu.memory_space<vmem>>, vector<4x16xf32>
    %c0_1 = arith.constant 0 : index
    %c0_2 = arith.constant 0 : index
    %c0_3 = arith.constant 0 : index
    %1 = vector.load %arg2[%c0_1, %c0_2, %c0_3] : memref<1x16x64xf32, #tpu.memory_space<vmem>>, vector<1x16x64xf32>
    %2 = vector.shape_cast %1 : vector<1x16x64xf32> to vector<16x64xf32>
    %cst = arith.constant dense<0.000000e+00> : vector<4x64xf32>
    %3 = tpu.matmul %0, %2, %cst {dimension_numbers = #tpu.dot_dimension_numbers<[1], [0], [0], [1], [0, 0, 1, 1], [], []>} : vector<4x16xf32>, vector<16x64xf32>, vector<4x64xf32> -> vector<4x64xf32>
    %cst_4 = arith.constant dense<0.000000e+00> : vector<4xf32>
    %4 = vector.multi_reduction <add>, %3, %cst_4 [1] : vector<4x64xf32> to vector<4xf32>
    %5 = vector.shape_cast %4 : vector<4xf32> to vector<4x1xf32>
    %6 = arith.mulf %3, %3 : vector<4x64xf32>
    %cst_5 = arith.constant dense<0.000000e+00> : vector<4xf32>
    %7 = vector.multi_reduction <add>, %6, %cst_5 [1] : vector<4x64xf32> to vector<4xf32>
    %8 = vector.shape_cast %7 : vector<4xf32> to vector<4x1xf32>
    %9 = tpu.concatenate %5, %8 in 1 : vector<4x1xf32>, vector<4x1xf32> -> vector<4x2xf32>
    %c0_6 = arith.constant 0 : index
    %c0_7 = arith.constant 0 : index
    %c0_8 = arith.constant 0 : index
    %c0_9 = arith.constant 0 : index
    %10 = vector.load %arg4[%c0_6, %c0_7, %c0_8, %c0_9] : memref<1x1x4x2xf32, #tpu.memory_space<vmem>>, vector<1x1x4x2xf32>
    %11 = vector.shape_cast %10 : vector<1x1x4x2xf32> to vector<4x2xf32>
    %12 = vector.shape_cast %9 : vector<4x2xf32> to vector<1x1x4x2xf32>
    tpu.vector_store %arg4[%c0_6, %c0_7, %c0_8, %c0_9], %12 {strides = array<i32>} : memref<1x1x4x2xf32, #tpu.memory_space<vmem>>, vector<1x1x4x2xf32>,
    return
  }
  func.func @transform_0(%arg0: i32, %arg1: i32) -> (i32, i32, i32) {
    %c0_i32 = arith.constant 0 : i32
    %c0_i32_0 = arith.constant 0 : i32
    return %arg0, %c0_i32, %arg1 : i32, i32, i32
  }
  func.func @transform_1(%arg0: i32, %arg1: i32) -> (i32, i32) {
    %c0_i32 = arith.constant 0 : i32
    %c0_i32_0 = arith.constant 0 : i32
    %c0_i32_1 = arith.constant 0 : i32
    return %c0_i32, %c0_i32_0 : i32, i32
  }
  func.func @transform_2(%arg0: i32, %arg1: i32) -> (i32, i32, i32, i32) {
    %c0_i32 = arith.constant 0 : i32
    %c0_i32_0 = arith.constant 0 : i32
    %c0_i32_1 = arith.constant 0 : i32
    return %arg0, %arg1, %c0_i32, %c0_i32_0 : i32, i32, i32, i32
  }
}

module attributes {stable_mosaic.version = 11 : i64} {
  func.func @_stage1_deconv_stats_kernel(%arg0: i32, %arg1: memref<1x16x64xf32, #tpu.memory_space<vmem>>, %arg2: memref<4x16xf32, #tpu.memory_space<vmem>>, %arg3: memref<4x1xf32, #tpu.memory_space<vmem>>, %arg4: memref<4x1xf32, #tpu.memory_space<vmem>>, %arg5: memref<3x3x4x4xf32, #tpu.memory_space<vmem>>, %arg6: memref<1x4x64xf32, #tpu.memory_space<vmem>>, %arg7: memref<1x4x2xf32, #tpu.memory_space<vmem>>) attributes {dimension_semantics = [#tpu.dimension_semantics<parallel>], iteration_bounds = array<i64: 2>, scalar_prefetch = 0 : i64, scratch_operands = 0 : i64, tpu.core_type = #tpu.core_type<tc>, window_params = [{transform_indices = @transform_0, window_bounds = array<i64: 1, 16, 64>}, {pipeline_mode = #tpu.pipeline_mode<synchronous>, transform_indices = @transform_1, window_bounds = array<i64: 4, 16>}, {pipeline_mode = #tpu.pipeline_mode<synchronous>, transform_indices = @transform_2, window_bounds = array<i64: 4, 1>}, {pipeline_mode = #tpu.pipeline_mode<synchronous>, transform_indices = @transform_3, window_bounds = array<i64: 4, 1>}, {pipeline_mode = #tpu.pipeline_mode<synchronous>, transform_indices = @transform_4, window_bounds = array<i64: 3, 3, 4, 4>}, {transform_indices = @transform_5, window_bounds = array<i64: 1, 4, 64>}, {transform_indices = @transform_6, window_bounds = array<i64: 1, 4, 2>}]} {
    %c0 = arith.constant 0 : index
    %c0_0 = arith.constant 0 : index
    %0 = vector.load %arg2[%c0, %c0_0] : memref<4x16xf32, #tpu.memory_space<vmem>>, vector<4x16xf32>
    %c0_1 = arith.constant 0 : index
    %c0_2 = arith.constant 0 : index
    %c0_3 = arith.constant 0 : index
    %1 = vector.load %arg1[%c0_1, %c0_2, %c0_3] : memref<1x16x64xf32, #tpu.memory_space<vmem>>, vector<1x16x64xf32>
    %2 = vector.shape_cast %1 : vector<1x16x64xf32> to vector<16x64xf32>
    %cst = arith.constant dense<0.000000e+00> : vector<4x64xf32>
    %3 = tpu.matmul %0, %2, %cst {dimension_numbers = #tpu.dot_dimension_numbers<[1], [0], [0], [1], [0, 0, 1, 1], [], []>} : vector<4x16xf32>, vector<16x64xf32>, vector<4x64xf32> -> vector<4x64xf32>
    %c0_4 = arith.constant 0 : index
    %c0_5 = arith.constant 0 : index
    %4 = vector.load %arg3[%c0_4, %c0_5] : memref<4x1xf32, #tpu.memory_space<vmem>>, vector<4x1xf32>
    %5 = vector.broadcast %4 : vector<4x1xf32> to vector<4x64xf32>
    %6 = arith.mulf %3, %5 : vector<4x64xf32>
    %c0_6 = arith.constant 0 : index
    %c0_7 = arith.constant 0 : index
    %7 = vector.load %arg4[%c0_6, %c0_7] : memref<4x1xf32, #tpu.memory_space<vmem>>, vector<4x1xf32>
    %8 = vector.broadcast %7 : vector<4x1xf32> to vector<4x64xf32>
    %9 = arith.addf %6, %8 : vector<4x64xf32>
    %cst_8 = arith.constant 0.000000e+00 : f32
    %10 = vector.broadcast %cst_8 : f32 to vector<4x64xf32>
    %11 = arith.maximumf %9, %10 : vector<4x64xf32>
    %c0_9 = arith.constant 0 : index
    %c0_10 = arith.constant 0 : index
    %c0_11 = arith.constant 0 : index
    %12 = vector.load %arg6[%c0_9, %c0_10, %c0_11] : memref<1x4x64xf32, #tpu.memory_space<vmem>>, vector<1x4x64xf32>
    %13 = vector.shape_cast %12 : vector<1x4x64xf32> to vector<4x64xf32>
    %14 = vector.shape_cast %11 : vector<4x64xf32> to vector<1x4x64xf32>
    tpu.vector_store %arg6[%c0_9, %c0_10, %c0_11], %14 {strides = array<i32>} : memref<1x4x64xf32, #tpu.memory_space<vmem>>, vector<1x4x64xf32>,
    %15 = tpu.iota {dimensions = array<i32: 1>} : vector<1x64xi32>
    %c56_i32 = arith.constant 56 : i32
    %16 = vector.broadcast %c56_i32 : i32 to vector<1x64xi32>
    %17 = arith.cmpi slt, %15, %16 : vector<1x64xi32>
    %c8_i32 = arith.constant 8 : i32
    %c0_i32 = arith.constant 0 : i32
    %18 = arith.cmpi eq, %c8_i32, %c0_i32 : i32
    %c1_i32 = arith.constant 1 : i32
    %19 = arith.select %18, %c1_i32, %c8_i32 : i32
    %20 = vector.broadcast %19 : i32 to vector<1x64xi32>
    %21 = arith.remsi %15, %20 : vector<1x64xi32>
    %c0_i32_12 = arith.constant 0 : i32
    %22 = vector.broadcast %c0_i32_12 : i32 to vector<1x64xi32>
    %23 = arith.cmpi ne, %21, %22 : vector<1x64xi32>
    %c0_i32_13 = arith.constant 0 : i32
    %24 = vector.broadcast %c0_i32_13 : i32 to vector<1x64xi32>
    %25 = arith.cmpi slt, %21, %24 : vector<1x64xi32>
    %c0_i32_14 = arith.constant 0 : i32
    %26 = arith.cmpi slt, %19, %c0_i32_14 : i32
    %27 = vector.broadcast %26 : i1 to vector<1x64xi1>
    %28 = vector.broadcast %27 : vector<1x64xi1> to vector<1x64xi1>
    %29 = arith.xori %25, %28 : vector<1x64xi1>
    %30 = arith.andi %29, %23 : vector<1x64xi1>
    %31 = vector.broadcast %19 : i32 to vector<1x64xi32>
    %32 = arith.addi %21, %31 : vector<1x64xi32>
    %33 = arith.select %30, %32, %21 : vector<1x64xi1>, vector<1x64xi32>
    %c7_i32 = arith.constant 7 : i32
    %34 = vector.broadcast %c7_i32 : i32 to vector<1x64xi32>
    %35 = arith.cmpi slt, %33, %34 : vector<1x64xi32>
    %cst_15 = arith.constant 0.000000e+00 : f32
    %36 = vector.broadcast %cst_15 : f32 to vector<4x64xf32>
    %c56_i32_16 = arith.constant 56 : i32
    %37 = tpu.dynamic_rotate %11 by %c56_i32_16 dim 1 : vector<4x64xf32>, i32 -> vector<4x64xf32>
    %38 = vector.shape_cast %17 : vector<1x64xi1> to vector<1x64xi1>
    %39 = vector.broadcast %38 : vector<1x64xi1> to vector<4x64xi1>
    %40 = arith.select %39, %37, %36 : vector<4x64xi1>, vector<4x64xf32>
    %c63_i32 = arith.constant 63 : i32
    %41 = tpu.dynamic_rotate %11 by %c63_i32 dim 1 : vector<4x64xf32>, i32 -> vector<4x64xf32>
    %42 = vector.shape_cast %35 : vector<1x64xi1> to vector<1x64xi1>
    %43 = vector.broadcast %42 : vector<1x64xi1> to vector<4x64xi1>
    %44 = arith.select %43, %41, %36 : vector<4x64xi1>, vector<4x64xf32>
    %45 = arith.andi %17, %35 : vector<1x64xi1>
    %c55_i32 = arith.constant 55 : i32
    %46 = tpu.dynamic_rotate %11 by %c55_i32 dim 1 : vector<4x64xf32>, i32 -> vector<4x64xf32>
    %47 = vector.shape_cast %45 : vector<1x64xi1> to vector<1x64xi1>
    %48 = vector.broadcast %47 : vector<1x64xi1> to vector<4x64xi1>
    %49 = arith.select %48, %46, %36 : vector<4x64xi1>, vector<4x64xf32>
    %cst_17 = arith.constant 0.000000e+00 : f32
    %50 = vector.broadcast %cst_17 : f32 to vector<4x2xf32>
    %c1 = arith.constant 1 : index
    %c1_18 = arith.constant 1 : index
    %c0_19 = arith.constant 0 : index
    %c0_20 = arith.constant 0 : index
    %51 = vector.load %arg5[%c1, %c1_18, %c0_19, %c0_20] : memref<3x3x4x4xf32, #tpu.memory_space<vmem>>, vector<1x1x4x4xf32>
    %52 = vector.shape_cast %51 : vector<1x1x4x4xf32> to vector<4x4xf32>
    %cst_21 = arith.constant dense<0.000000e+00> : vector<4x64xf32>
    %53 = tpu.matmul %52, %11, %cst_21 {dimension_numbers = #tpu.dot_dimension_numbers<[1], [0], [0], [1], [0, 0, 1, 1], [], []>} : vector<4x4xf32>, vector<4x64xf32>, vector<4x64xf32> -> vector<4x64xf32>
    %c1_22 = arith.constant 1 : index
    %c2 = arith.constant 2 : index
    %c0_23 = arith.constant 0 : index
    %c0_24 = arith.constant 0 : index
    %54 = vector.load %arg5[%c1_22, %c2, %c0_23, %c0_24] : memref<3x3x4x4xf32, #tpu.memory_space<vmem>>, vector<1x1x4x4xf32>
    %55 = vector.shape_cast %54 : vector<1x1x4x4xf32> to vector<4x4xf32>
    %cst_25 = arith.constant dense<0.000000e+00> : vector<4x64xf32>
    %56 = tpu.matmul %55, %11, %cst_25 {dimension_numbers = #tpu.dot_dimension_numbers<[1], [0], [0], [1], [0, 0, 1, 1], [], []>} : vector<4x4xf32>, vector<4x64xf32>, vector<4x64xf32> -> vector<4x64xf32>
    %c1_26 = arith.constant 1 : index
    %c0_27 = arith.constant 0 : index
    %c0_28 = arith.constant 0 : index
    %c0_29 = arith.constant 0 : index
    %57 = vector.load %arg5[%c1_26, %c0_27, %c0_28, %c0_29] : memref<3x3x4x4xf32, #tpu.memory_space<vmem>>, vector<1x1x4x4xf32>
    %58 = vector.shape_cast %57 : vector<1x1x4x4xf32> to vector<4x4xf32>
    %cst_30 = arith.constant dense<0.000000e+00> : vector<4x64xf32>
    %59 = tpu.matmul %58, %44, %cst_30 {dimension_numbers = #tpu.dot_dimension_numbers<[1], [0], [0], [1], [0, 0, 1, 1], [], []>} : vector<4x4xf32>, vector<4x64xf32>, vector<4x64xf32> -> vector<4x64xf32>
    %60 = arith.addf %56, %59 : vector<4x64xf32>
    %c2_31 = arith.constant 2 : index
    %c1_32 = arith.constant 1 : index
    %c0_33 = arith.constant 0 : index
    %c0_34 = arith.constant 0 : index
    %61 = vector.load %arg5[%c2_31, %c1_32, %c0_33, %c0_34] : memref<3x3x4x4xf32, #tpu.memory_space<vmem>>, vector<1x1x4x4xf32>
    %62 = vector.shape_cast %61 : vector<1x1x4x4xf32> to vector<4x4xf32>
    %cst_35 = arith.constant dense<0.000000e+00> : vector<4x64xf32>
    %63 = tpu.matmul %62, %11, %cst_35 {dimension_numbers = #tpu.dot_dimension_numbers<[1], [0], [0], [1], [0, 0, 1, 1], [], []>} : vector<4x4xf32>, vector<4x64xf32>, vector<4x64xf32> -> vector<4x64xf32>
    %c0_36 = arith.constant 0 : index
    %c1_37 = arith.constant 1 : index
    %c0_38 = arith.constant 0 : index
    %c0_39 = arith.constant 0 : index
    %64 = vector.load %arg5[%c0_36, %c1_37, %c0_38, %c0_39] : memref<3x3x4x4xf32, #tpu.memory_space<vmem>>, vector<1x1x4x4xf32>
    %65 = vector.shape_cast %64 : vector<1x1x4x4xf32> to vector<4x4xf32>
    %cst_40 = arith.constant dense<0.000000e+00> : vector<4x64xf32>
    %66 = tpu.matmul %65, %40, %cst_40 {dimension_numbers = #tpu.dot_dimension_numbers<[1], [0], [0], [1], [0, 0, 1, 1], [], []>} : vector<4x4xf32>, vector<4x64xf32>, vector<4x64xf32> -> vector<4x64xf32>
    %67 = arith.addf %63, %66 : vector<4x64xf32>
    %c2_41 = arith.constant 2 : index
    %c2_42 = arith.constant 2 : index
    %c0_43 = arith.constant 0 : index
    %c0_44 = arith.constant 0 : index
    %68 = vector.load %arg5[%c2_41, %c2_42, %c0_43, %c0_44] : memref<3x3x4x4xf32, #tpu.memory_space<vmem>>, vector<1x1x4x4xf32>
    %69 = vector.shape_cast %68 : vector<1x1x4x4xf32> to vector<4x4xf32>
    %cst_45 = arith.constant dense<0.000000e+00> : vector<4x64xf32>
    %70 = tpu.matmul %69, %11, %cst_45 {dimension_numbers = #tpu.dot_dimension_numbers<[1], [0], [0], [1], [0, 0, 1, 1], [], []>} : vector<4x4xf32>, vector<4x64xf32>, vector<4x64xf32> -> vector<4x64xf32>
    %c0_46 = arith.constant 0 : index
    %c2_47 = arith.constant 2 : index
    %c0_48 = arith.constant 0 : index
    %c0_49 = arith.constant 0 : index
    %71 = vector.load %arg5[%c0_46, %c2_47, %c0_48, %c0_49] : memref<3x3x4x4xf32, #tpu.memory_space<vmem>>, vector<1x1x4x4xf32>
    %72 = vector.shape_cast %71 : vector<1x1x4x4xf32> to vector<4x4xf32>
    %cst_50 = arith.constant dense<0.000000e+00> : vector<4x64xf32>
    %73 = tpu.matmul %72, %40, %cst_50 {dimension_numbers = #tpu.dot_dimension_numbers<[1], [0], [0], [1], [0, 0, 1, 1], [], []>} : vector<4x4xf32>, vector<4x64xf32>, vector<4x64xf32> -> vector<4x64xf32>
    %74 = arith.addf %70, %73 : vector<4x64xf32>
    %c2_51 = arith.constant 2 : index
    %c0_52 = arith.constant 0 : index
    %c0_53 = arith.constant 0 : index
    %c0_54 = arith.constant 0 : index
    %75 = vector.load %arg5[%c2_51, %c0_52, %c0_53, %c0_54] : memref<3x3x4x4xf32, #tpu.memory_space<vmem>>, vector<1x1x4x4xf32>
    %76 = vector.shape_cast %75 : vector<1x1x4x4xf32> to vector<4x4xf32>
    %cst_55 = arith.constant dense<0.000000e+00> : vector<4x64xf32>
    %77 = tpu.matmul %76, %44, %cst_55 {dimension_numbers = #tpu.dot_dimension_numbers<[1], [0], [0], [1], [0, 0, 1, 1], [], []>} : vector<4x4xf32>, vector<4x64xf32>, vector<4x64xf32> -> vector<4x64xf32>
    %78 = arith.addf %74, %77 : vector<4x64xf32>
    %c0_56 = arith.constant 0 : index
    %c0_57 = arith.constant 0 : index
    %c0_58 = arith.constant 0 : index
    %c0_59 = arith.constant 0 : index
    %79 = vector.load %arg5[%c0_56, %c0_57, %c0_58, %c0_59] : memref<3x3x4x4xf32, #tpu.memory_space<vmem>>, vector<1x1x4x4xf32>
    %80 = vector.shape_cast %79 : vector<1x1x4x4xf32> to vector<4x4xf32>
    %cst_60 = arith.constant dense<0.000000e+00> : vector<4x64xf32>
    %81 = tpu.matmul %80, %49, %cst_60 {dimension_numbers = #tpu.dot_dimension_numbers<[1], [0], [0], [1], [0, 0, 1, 1], [], []>} : vector<4x4xf32>, vector<4x64xf32>, vector<4x64xf32> -> vector<4x64xf32>
    %82 = arith.addf %78, %81 : vector<4x64xf32>
    %cst_61 = arith.constant dense<0.000000e+00> : vector<4xf32>
    %83 = vector.multi_reduction <add>, %53, %cst_61 [1] : vector<4x64xf32> to vector<4xf32>
    %84 = vector.shape_cast %83 : vector<4xf32> to vector<4x1xf32>
    %85 = arith.mulf %53, %53 : vector<4x64xf32>
    %cst_62 = arith.constant dense<0.000000e+00> : vector<4xf32>
    %86 = vector.multi_reduction <add>, %85, %cst_62 [1] : vector<4x64xf32> to vector<4xf32>
    %87 = vector.shape_cast %86 : vector<4xf32> to vector<4x1xf32>
    %88 = tpu.concatenate %84, %87 in 1 : vector<4x1xf32>, vector<4x1xf32> -> vector<4x2xf32>
    %89 = arith.addf %50, %88 : vector<4x2xf32>
    %cst_63 = arith.constant dense<0.000000e+00> : vector<4xf32>
    %90 = vector.multi_reduction <add>, %60, %cst_63 [1] : vector<4x64xf32> to vector<4xf32>
    %91 = vector.shape_cast %90 : vector<4xf32> to vector<4x1xf32>
    %92 = arith.mulf %60, %60 : vector<4x64xf32>
    %cst_64 = arith.constant dense<0.000000e+00> : vector<4xf32>
    %93 = vector.multi_reduction <add>, %92, %cst_64 [1] : vector<4x64xf32> to vector<4xf32>
    %94 = vector.shape_cast %93 : vector<4xf32> to vector<4x1xf32>
    %95 = tpu.concatenate %91, %94 in 1 : vector<4x1xf32>, vector<4x1xf32> -> vector<4x2xf32>
    %96 = arith.addf %89, %95 : vector<4x2xf32>
    %cst_65 = arith.constant dense<0.000000e+00> : vector<4xf32>
    %97 = vector.multi_reduction <add>, %67, %cst_65 [1] : vector<4x64xf32> to vector<4xf32>
    %98 = vector.shape_cast %97 : vector<4xf32> to vector<4x1xf32>
    %99 = arith.mulf %67, %67 : vector<4x64xf32>
    %cst_66 = arith.constant dense<0.000000e+00> : vector<4xf32>
    %100 = vector.multi_reduction <add>, %99, %cst_66 [1] : vector<4x64xf32> to vector<4xf32>
    %101 = vector.shape_cast %100 : vector<4xf32> to vector<4x1xf32>
    %102 = tpu.concatenate %98, %101 in 1 : vector<4x1xf32>, vector<4x1xf32> -> vector<4x2xf32>
    %103 = arith.addf %96, %102 : vector<4x2xf32>
    %cst_67 = arith.constant dense<0.000000e+00> : vector<4xf32>
    %104 = vector.multi_reduction <add>, %82, %cst_67 [1] : vector<4x64xf32> to vector<4xf32>
    %105 = vector.shape_cast %104 : vector<4xf32> to vector<4x1xf32>
    %106 = arith.mulf %82, %82 : vector<4x64xf32>
    %cst_68 = arith.constant dense<0.000000e+00> : vector<4xf32>
    %107 = vector.multi_reduction <add>, %106, %cst_68 [1] : vector<4x64xf32> to vector<4xf32>
    %108 = vector.shape_cast %107 : vector<4xf32> to vector<4x1xf32>
    %109 = tpu.concatenate %105, %108 in 1 : vector<4x1xf32>, vector<4x1xf32> -> vector<4x2xf32>
    %110 = arith.addf %103, %109 : vector<4x2xf32>
    %c0_69 = arith.constant 0 : index
    %c0_70 = arith.constant 0 : index
    %c0_71 = arith.constant 0 : index
    %111 = vector.load %arg7[%c0_69, %c0_70, %c0_71] : memref<1x4x2xf32, #tpu.memory_space<vmem>>, vector<1x4x2xf32>
    %112 = vector.shape_cast %111 : vector<1x4x2xf32> to vector<4x2xf32>
    %113 = vector.shape_cast %110 : vector<4x2xf32> to vector<1x4x2xf32>
    tpu.vector_store %arg7[%c0_69, %c0_70, %c0_71], %113 {strides = array<i32>} : memref<1x4x2xf32, #tpu.memory_space<vmem>>, vector<1x4x2xf32>,
    return
  }
  func.func @transform_0(%arg0: i32) -> (i32, i32, i32) {
    %c0_i32 = arith.constant 0 : i32
    %c0_i32_0 = arith.constant 0 : i32
    %c0_i32_1 = arith.constant 0 : i32
    return %arg0, %c0_i32, %c0_i32_0 : i32, i32, i32
  }
  func.func @transform_1(%arg0: i32) -> (i32, i32) {
    %c0_i32 = arith.constant 0 : i32
    %c0_i32_0 = arith.constant 0 : i32
    %c0_i32_1 = arith.constant 0 : i32
    return %c0_i32, %c0_i32_0 : i32, i32
  }
  func.func @transform_2(%arg0: i32) -> (i32, i32) {
    %c0_i32 = arith.constant 0 : i32
    %c0_i32_0 = arith.constant 0 : i32
    %c0_i32_1 = arith.constant 0 : i32
    return %c0_i32, %c0_i32_0 : i32, i32
  }
  func.func @transform_3(%arg0: i32) -> (i32, i32) {
    %c0_i32 = arith.constant 0 : i32
    %c0_i32_0 = arith.constant 0 : i32
    %c0_i32_1 = arith.constant 0 : i32
    return %c0_i32, %c0_i32_0 : i32, i32
  }
  func.func @transform_4(%arg0: i32) -> (i32, i32, i32, i32) {
    %c0_i32 = arith.constant 0 : i32
    %c0_i32_0 = arith.constant 0 : i32
    %c0_i32_1 = arith.constant 0 : i32
    %c0_i32_2 = arith.constant 0 : i32
    %c0_i32_3 = arith.constant 0 : i32
    return %c0_i32, %c0_i32_0, %c0_i32_1, %c0_i32_2 : i32, i32, i32, i32
  }
  func.func @transform_5(%arg0: i32) -> (i32, i32, i32) {
    %c0_i32 = arith.constant 0 : i32
    %c0_i32_0 = arith.constant 0 : i32
    %c0_i32_1 = arith.constant 0 : i32
    return %arg0, %c0_i32, %c0_i32_0 : i32, i32, i32
  }
  func.func @transform_6(%arg0: i32) -> (i32, i32, i32) {
    %c0_i32 = arith.constant 0 : i32
    %c0_i32_0 = arith.constant 0 : i32
    %c0_i32_1 = arith.constant 0 : i32
    return %arg0, %c0_i32, %c0_i32_0 : i32, i32, i32
  }
}

module attributes {stable_mosaic.version = 11 : i64} {
  func.func @_bn3_stats_kernel(%arg0: i32, %arg1: memref<1x4x64xf32, #tpu.memory_space<vmem>>, %arg2: memref<3x3x4x4xf32, #tpu.memory_space<vmem>>, %arg3: memref<4x1xf32, #tpu.memory_space<vmem>>, %arg4: memref<4x1xf32, #tpu.memory_space<vmem>>, %arg5: memref<8x4xf32, #tpu.memory_space<vmem>>, %arg6: memref<1x8x2xf32, #tpu.memory_space<vmem>>) attributes {dimension_semantics = [#tpu.dimension_semantics<parallel>], iteration_bounds = array<i64: 2>, scalar_prefetch = 0 : i64, scratch_operands = 0 : i64, tpu.core_type = #tpu.core_type<tc>, window_params = [{transform_indices = @transform_0, window_bounds = array<i64: 1, 4, 64>}, {pipeline_mode = #tpu.pipeline_mode<synchronous>, transform_indices = @transform_1, window_bounds = array<i64: 3, 3, 4, 4>}, {pipeline_mode = #tpu.pipeline_mode<synchronous>, transform_indices = @transform_2, window_bounds = array<i64: 4, 1>}, {pipeline_mode = #tpu.pipeline_mode<synchronous>, transform_indices = @transform_3, window_bounds = array<i64: 4, 1>}, {pipeline_mode = #tpu.pipeline_mode<synchronous>, transform_indices = @transform_4, window_bounds = array<i64: 8, 4>}, {transform_indices = @transform_5, window_bounds = array<i64: 1, 8, 2>}]} {
    %c0 = arith.constant 0 : index
    %c0_0 = arith.constant 0 : index
    %c0_1 = arith.constant 0 : index
    %0 = vector.load %arg1[%c0, %c0_0, %c0_1] : memref<1x4x64xf32, #tpu.memory_space<vmem>>, vector<1x4x64xf32>
    %1 = vector.shape_cast %0 : vector<1x4x64xf32> to vector<4x64xf32>
    %2 = tpu.iota {dimensions = array<i32: 1>} : vector<1x64xi32>
    %c56_i32 = arith.constant 56 : i32
    %3 = vector.broadcast %c56_i32 : i32 to vector<1x64xi32>
    %4 = arith.cmpi slt, %2, %3 : vector<1x64xi32>
    %c8_i32 = arith.constant 8 : i32
    %c0_i32 = arith.constant 0 : i32
    %5 = arith.cmpi eq, %c8_i32, %c0_i32 : i32
    %c1_i32 = arith.constant 1 : i32
    %6 = arith.select %5, %c1_i32, %c8_i32 : i32
    %7 = vector.broadcast %6 : i32 to vector<1x64xi32>
    %8 = arith.remsi %2, %7 : vector<1x64xi32>
    %c0_i32_2 = arith.constant 0 : i32
    %9 = vector.broadcast %c0_i32_2 : i32 to vector<1x64xi32>
    %10 = arith.cmpi ne, %8, %9 : vector<1x64xi32>
    %c0_i32_3 = arith.constant 0 : i32
    %11 = vector.broadcast %c0_i32_3 : i32 to vector<1x64xi32>
    %12 = arith.cmpi slt, %8, %11 : vector<1x64xi32>
    %c0_i32_4 = arith.constant 0 : i32
    %13 = arith.cmpi slt, %6, %c0_i32_4 : i32
    %14 = vector.broadcast %13 : i1 to vector<1x64xi1>
    %15 = vector.broadcast %14 : vector<1x64xi1> to vector<1x64xi1>
    %16 = arith.xori %12, %15 : vector<1x64xi1>
    %17 = arith.andi %16, %10 : vector<1x64xi1>
    %18 = vector.broadcast %6 : i32 to vector<1x64xi32>
    %19 = arith.addi %8, %18 : vector<1x64xi32>
    %20 = arith.select %17, %19, %8 : vector<1x64xi1>, vector<1x64xi32>
    %c7_i32 = arith.constant 7 : i32
    %21 = vector.broadcast %c7_i32 : i32 to vector<1x64xi32>
    %22 = arith.cmpi slt, %20, %21 : vector<1x64xi32>
    %cst = arith.constant 0.000000e+00 : f32
    %23 = vector.broadcast %cst : f32 to vector<4x64xf32>
    %c56_i32_5 = arith.constant 56 : i32
    %24 = tpu.dynamic_rotate %1 by %c56_i32_5 dim 1 : vector<4x64xf32>, i32 -> vector<4x64xf32>
    %25 = vector.shape_cast %4 : vector<1x64xi1> to vector<1x64xi1>
    %26 = vector.broadcast %25 : vector<1x64xi1> to vector<4x64xi1>
    %27 = arith.select %26, %24, %23 : vector<4x64xi1>, vector<4x64xf32>
    %c63_i32 = arith.constant 63 : i32
    %28 = tpu.dynamic_rotate %1 by %c63_i32 dim 1 : vector<4x64xf32>, i32 -> vector<4x64xf32>
    %29 = vector.shape_cast %22 : vector<1x64xi1> to vector<1x64xi1>
    %30 = vector.broadcast %29 : vector<1x64xi1> to vector<4x64xi1>
    %31 = arith.select %30, %28, %23 : vector<4x64xi1>, vector<4x64xf32>
    %32 = arith.andi %4, %22 : vector<1x64xi1>
    %c55_i32 = arith.constant 55 : i32
    %33 = tpu.dynamic_rotate %1 by %c55_i32 dim 1 : vector<4x64xf32>, i32 -> vector<4x64xf32>
    %34 = vector.shape_cast %32 : vector<1x64xi1> to vector<1x64xi1>
    %35 = vector.broadcast %34 : vector<1x64xi1> to vector<4x64xi1>
    %36 = arith.select %35, %33, %23 : vector<4x64xi1>, vector<4x64xf32>
    %cst_6 = arith.constant 0.000000e+00 : f32
    %37 = vector.broadcast %cst_6 : f32 to vector<8x2xf32>
    %c1 = arith.constant 1 : index
    %c1_7 = arith.constant 1 : index
    %c0_8 = arith.constant 0 : index
    %c0_9 = arith.constant 0 : index
    %38 = vector.load %arg2[%c1, %c1_7, %c0_8, %c0_9] : memref<3x3x4x4xf32, #tpu.memory_space<vmem>>, vector<1x1x4x4xf32>
    %39 = vector.shape_cast %38 : vector<1x1x4x4xf32> to vector<4x4xf32>
    %cst_10 = arith.constant dense<0.000000e+00> : vector<4x64xf32>
    %40 = tpu.matmul %39, %1, %cst_10 {dimension_numbers = #tpu.dot_dimension_numbers<[1], [0], [0], [1], [0, 0, 1, 1], [], []>} : vector<4x4xf32>, vector<4x64xf32>, vector<4x64xf32> -> vector<4x64xf32>
    %c1_11 = arith.constant 1 : index
    %c2 = arith.constant 2 : index
    %c0_12 = arith.constant 0 : index
    %c0_13 = arith.constant 0 : index
    %41 = vector.load %arg2[%c1_11, %c2, %c0_12, %c0_13] : memref<3x3x4x4xf32, #tpu.memory_space<vmem>>, vector<1x1x4x4xf32>
    %42 = vector.shape_cast %41 : vector<1x1x4x4xf32> to vector<4x4xf32>
    %cst_14 = arith.constant dense<0.000000e+00> : vector<4x64xf32>
    %43 = tpu.matmul %42, %1, %cst_14 {dimension_numbers = #tpu.dot_dimension_numbers<[1], [0], [0], [1], [0, 0, 1, 1], [], []>} : vector<4x4xf32>, vector<4x64xf32>, vector<4x64xf32> -> vector<4x64xf32>
    %c1_15 = arith.constant 1 : index
    %c0_16 = arith.constant 0 : index
    %c0_17 = arith.constant 0 : index
    %c0_18 = arith.constant 0 : index
    %44 = vector.load %arg2[%c1_15, %c0_16, %c0_17, %c0_18] : memref<3x3x4x4xf32, #tpu.memory_space<vmem>>, vector<1x1x4x4xf32>
    %45 = vector.shape_cast %44 : vector<1x1x4x4xf32> to vector<4x4xf32>
    %cst_19 = arith.constant dense<0.000000e+00> : vector<4x64xf32>
    %46 = tpu.matmul %45, %31, %cst_19 {dimension_numbers = #tpu.dot_dimension_numbers<[1], [0], [0], [1], [0, 0, 1, 1], [], []>} : vector<4x4xf32>, vector<4x64xf32>, vector<4x64xf32> -> vector<4x64xf32>
    %47 = arith.addf %43, %46 : vector<4x64xf32>
    %c2_20 = arith.constant 2 : index
    %c1_21 = arith.constant 1 : index
    %c0_22 = arith.constant 0 : index
    %c0_23 = arith.constant 0 : index
    %48 = vector.load %arg2[%c2_20, %c1_21, %c0_22, %c0_23] : memref<3x3x4x4xf32, #tpu.memory_space<vmem>>, vector<1x1x4x4xf32>
    %49 = vector.shape_cast %48 : vector<1x1x4x4xf32> to vector<4x4xf32>
    %cst_24 = arith.constant dense<0.000000e+00> : vector<4x64xf32>
    %50 = tpu.matmul %49, %1, %cst_24 {dimension_numbers = #tpu.dot_dimension_numbers<[1], [0], [0], [1], [0, 0, 1, 1], [], []>} : vector<4x4xf32>, vector<4x64xf32>, vector<4x64xf32> -> vector<4x64xf32>
    %c0_25 = arith.constant 0 : index
    %c1_26 = arith.constant 1 : index
    %c0_27 = arith.constant 0 : index
    %c0_28 = arith.constant 0 : index
    %51 = vector.load %arg2[%c0_25, %c1_26, %c0_27, %c0_28] : memref<3x3x4x4xf32, #tpu.memory_space<vmem>>, vector<1x1x4x4xf32>
    %52 = vector.shape_cast %51 : vector<1x1x4x4xf32> to vector<4x4xf32>
    %cst_29 = arith.constant dense<0.000000e+00> : vector<4x64xf32>
    %53 = tpu.matmul %52, %27, %cst_29 {dimension_numbers = #tpu.dot_dimension_numbers<[1], [0], [0], [1], [0, 0, 1, 1], [], []>} : vector<4x4xf32>, vector<4x64xf32>, vector<4x64xf32> -> vector<4x64xf32>
    %54 = arith.addf %50, %53 : vector<4x64xf32>
    %c2_30 = arith.constant 2 : index
    %c2_31 = arith.constant 2 : index
    %c0_32 = arith.constant 0 : index
    %c0_33 = arith.constant 0 : index
    %55 = vector.load %arg2[%c2_30, %c2_31, %c0_32, %c0_33] : memref<3x3x4x4xf32, #tpu.memory_space<vmem>>, vector<1x1x4x4xf32>
    %56 = vector.shape_cast %55 : vector<1x1x4x4xf32> to vector<4x4xf32>
    %cst_34 = arith.constant dense<0.000000e+00> : vector<4x64xf32>
    %57 = tpu.matmul %56, %1, %cst_34 {dimension_numbers = #tpu.dot_dimension_numbers<[1], [0], [0], [1], [0, 0, 1, 1], [], []>} : vector<4x4xf32>, vector<4x64xf32>, vector<4x64xf32> -> vector<4x64xf32>
    %c0_35 = arith.constant 0 : index
    %c2_36 = arith.constant 2 : index
    %c0_37 = arith.constant 0 : index
    %c0_38 = arith.constant 0 : index
    %58 = vector.load %arg2[%c0_35, %c2_36, %c0_37, %c0_38] : memref<3x3x4x4xf32, #tpu.memory_space<vmem>>, vector<1x1x4x4xf32>
    %59 = vector.shape_cast %58 : vector<1x1x4x4xf32> to vector<4x4xf32>
    %cst_39 = arith.constant dense<0.000000e+00> : vector<4x64xf32>
    %60 = tpu.matmul %59, %27, %cst_39 {dimension_numbers = #tpu.dot_dimension_numbers<[1], [0], [0], [1], [0, 0, 1, 1], [], []>} : vector<4x4xf32>, vector<4x64xf32>, vector<4x64xf32> -> vector<4x64xf32>
    %61 = arith.addf %57, %60 : vector<4x64xf32>
    %c2_40 = arith.constant 2 : index
    %c0_41 = arith.constant 0 : index
    %c0_42 = arith.constant 0 : index
    %c0_43 = arith.constant 0 : index
    %62 = vector.load %arg2[%c2_40, %c0_41, %c0_42, %c0_43] : memref<3x3x4x4xf32, #tpu.memory_space<vmem>>, vector<1x1x4x4xf32>
    %63 = vector.shape_cast %62 : vector<1x1x4x4xf32> to vector<4x4xf32>
    %cst_44 = arith.constant dense<0.000000e+00> : vector<4x64xf32>
    %64 = tpu.matmul %63, %31, %cst_44 {dimension_numbers = #tpu.dot_dimension_numbers<[1], [0], [0], [1], [0, 0, 1, 1], [], []>} : vector<4x4xf32>, vector<4x64xf32>, vector<4x64xf32> -> vector<4x64xf32>
    %65 = arith.addf %61, %64 : vector<4x64xf32>
    %c0_45 = arith.constant 0 : index
    %c0_46 = arith.constant 0 : index
    %c0_47 = arith.constant 0 : index
    %c0_48 = arith.constant 0 : index
    %66 = vector.load %arg2[%c0_45, %c0_46, %c0_47, %c0_48] : memref<3x3x4x4xf32, #tpu.memory_space<vmem>>, vector<1x1x4x4xf32>
    %67 = vector.shape_cast %66 : vector<1x1x4x4xf32> to vector<4x4xf32>
    %cst_49 = arith.constant dense<0.000000e+00> : vector<4x64xf32>
    %68 = tpu.matmul %67, %36, %cst_49 {dimension_numbers = #tpu.dot_dimension_numbers<[1], [0], [0], [1], [0, 0, 1, 1], [], []>} : vector<4x4xf32>, vector<4x64xf32>, vector<4x64xf32> -> vector<4x64xf32>
    %69 = arith.addf %65, %68 : vector<4x64xf32>
    %c0_50 = arith.constant 0 : index
    %c0_51 = arith.constant 0 : index
    %70 = vector.load %arg3[%c0_50, %c0_51] : memref<4x1xf32, #tpu.memory_space<vmem>>, vector<4x1xf32>
    %71 = vector.broadcast %70 : vector<4x1xf32> to vector<4x64xf32>
    %72 = arith.mulf %40, %71 : vector<4x64xf32>
    %c0_52 = arith.constant 0 : index
    %c0_53 = arith.constant 0 : index
    %73 = vector.load %arg4[%c0_52, %c0_53] : memref<4x1xf32, #tpu.memory_space<vmem>>, vector<4x1xf32>
    %74 = vector.broadcast %73 : vector<4x1xf32> to vector<4x64xf32>
    %75 = arith.addf %72, %74 : vector<4x64xf32>
    %cst_54 = arith.constant 0.000000e+00 : f32
    %76 = vector.broadcast %cst_54 : f32 to vector<4x64xf32>
    %77 = arith.maximumf %75, %76 : vector<4x64xf32>
    %c0_55 = arith.constant 0 : index
    %c0_56 = arith.constant 0 : index
    %78 = vector.load %arg5[%c0_55, %c0_56] : memref<8x4xf32, #tpu.memory_space<vmem>>, vector<8x4xf32>
    %cst_57 = arith.constant dense<0.000000e+00> : vector<8x64xf32>
    %79 = tpu.matmul %78, %77, %cst_57 {dimension_numbers = #tpu.dot_dimension_numbers<[1], [0], [0], [1], [0, 0, 1, 1], [], []>} : vector<8x4xf32>, vector<4x64xf32>, vector<8x64xf32> -> vector<8x64xf32>
    %cst_58 = arith.constant dense<0.000000e+00> : vector<8xf32>
    %80 = vector.multi_reduction <add>, %79, %cst_58 [1] : vector<8x64xf32> to vector<8xf32>
    %81 = vector.shape_cast %80 : vector<8xf32> to vector<8x1xf32>
    %82 = arith.mulf %79, %79 : vector<8x64xf32>
    %cst_59 = arith.constant dense<0.000000e+00> : vector<8xf32>
    %83 = vector.multi_reduction <add>, %82, %cst_59 [1] : vector<8x64xf32> to vector<8xf32>
    %84 = vector.shape_cast %83 : vector<8xf32> to vector<8x1xf32>
    %85 = tpu.concatenate %81, %84 in 1 : vector<8x1xf32>, vector<8x1xf32> -> vector<8x2xf32>
    %86 = arith.addf %37, %85 : vector<8x2xf32>
    %c0_60 = arith.constant 0 : index
    %c0_61 = arith.constant 0 : index
    %87 = vector.load %arg3[%c0_60, %c0_61] : memref<4x1xf32, #tpu.memory_space<vmem>>, vector<4x1xf32>
    %88 = vector.broadcast %87 : vector<4x1xf32> to vector<4x64xf32>
    %89 = arith.mulf %47, %88 : vector<4x64xf32>
    %c0_62 = arith.constant 0 : index
    %c0_63 = arith.constant 0 : index
    %90 = vector.load %arg4[%c0_62, %c0_63] : memref<4x1xf32, #tpu.memory_space<vmem>>, vector<4x1xf32>
    %91 = vector.broadcast %90 : vector<4x1xf32> to vector<4x64xf32>
    %92 = arith.addf %89, %91 : vector<4x64xf32>
    %cst_64 = arith.constant 0.000000e+00 : f32
    %93 = vector.broadcast %cst_64 : f32 to vector<4x64xf32>
    %94 = arith.maximumf %92, %93 : vector<4x64xf32>
    %c0_65 = arith.constant 0 : index
    %c0_66 = arith.constant 0 : index
    %95 = vector.load %arg5[%c0_65, %c0_66] : memref<8x4xf32, #tpu.memory_space<vmem>>, vector<8x4xf32>
    %cst_67 = arith.constant dense<0.000000e+00> : vector<8x64xf32>
    %96 = tpu.matmul %95, %94, %cst_67 {dimension_numbers = #tpu.dot_dimension_numbers<[1], [0], [0], [1], [0, 0, 1, 1], [], []>} : vector<8x4xf32>, vector<4x64xf32>, vector<8x64xf32> -> vector<8x64xf32>
    %cst_68 = arith.constant dense<0.000000e+00> : vector<8xf32>
    %97 = vector.multi_reduction <add>, %96, %cst_68 [1] : vector<8x64xf32> to vector<8xf32>
    %98 = vector.shape_cast %97 : vector<8xf32> to vector<8x1xf32>
    %99 = arith.mulf %96, %96 : vector<8x64xf32>
    %cst_69 = arith.constant dense<0.000000e+00> : vector<8xf32>
    %100 = vector.multi_reduction <add>, %99, %cst_69 [1] : vector<8x64xf32> to vector<8xf32>
    %101 = vector.shape_cast %100 : vector<8xf32> to vector<8x1xf32>
    %102 = tpu.concatenate %98, %101 in 1 : vector<8x1xf32>, vector<8x1xf32> -> vector<8x2xf32>
    %103 = arith.addf %86, %102 : vector<8x2xf32>
    %c0_70 = arith.constant 0 : index
    %c0_71 = arith.constant 0 : index
    %104 = vector.load %arg3[%c0_70, %c0_71] : memref<4x1xf32, #tpu.memory_space<vmem>>, vector<4x1xf32>
    %105 = vector.broadcast %104 : vector<4x1xf32> to vector<4x64xf32>
    %106 = arith.mulf %54, %105 : vector<4x64xf32>
    %c0_72 = arith.constant 0 : index
    %c0_73 = arith.constant 0 : index
    %107 = vector.load %arg4[%c0_72, %c0_73] : memref<4x1xf32, #tpu.memory_space<vmem>>, vector<4x1xf32>
    %108 = vector.broadcast %107 : vector<4x1xf32> to vector<4x64xf32>
    %109 = arith.addf %106, %108 : vector<4x64xf32>
    %cst_74 = arith.constant 0.000000e+00 : f32
    %110 = vector.broadcast %cst_74 : f32 to vector<4x64xf32>
    %111 = arith.maximumf %109, %110 : vector<4x64xf32>
    %c0_75 = arith.constant 0 : index
    %c0_76 = arith.constant 0 : index
    %112 = vector.load %arg5[%c0_75, %c0_76] : memref<8x4xf32, #tpu.memory_space<vmem>>, vector<8x4xf32>
    %cst_77 = arith.constant dense<0.000000e+00> : vector<8x64xf32>
    %113 = tpu.matmul %112, %111, %cst_77 {dimension_numbers = #tpu.dot_dimension_numbers<[1], [0], [0], [1], [0, 0, 1, 1], [], []>} : vector<8x4xf32>, vector<4x64xf32>, vector<8x64xf32> -> vector<8x64xf32>
    %cst_78 = arith.constant dense<0.000000e+00> : vector<8xf32>
    %114 = vector.multi_reduction <add>, %113, %cst_78 [1] : vector<8x64xf32> to vector<8xf32>
    %115 = vector.shape_cast %114 : vector<8xf32> to vector<8x1xf32>
    %116 = arith.mulf %113, %113 : vector<8x64xf32>
    %cst_79 = arith.constant dense<0.000000e+00> : vector<8xf32>
    %117 = vector.multi_reduction <add>, %116, %cst_79 [1] : vector<8x64xf32> to vector<8xf32>
    %118 = vector.shape_cast %117 : vector<8xf32> to vector<8x1xf32>
    %119 = tpu.concatenate %115, %118 in 1 : vector<8x1xf32>, vector<8x1xf32> -> vector<8x2xf32>
    %120 = arith.addf %103, %119 : vector<8x2xf32>
    %c0_80 = arith.constant 0 : index
    %c0_81 = arith.constant 0 : index
    %121 = vector.load %arg3[%c0_80, %c0_81] : memref<4x1xf32, #tpu.memory_space<vmem>>, vector<4x1xf32>
    %122 = vector.broadcast %121 : vector<4x1xf32> to vector<4x64xf32>
    %123 = arith.mulf %69, %122 : vector<4x64xf32>
    %c0_82 = arith.constant 0 : index
    %c0_83 = arith.constant 0 : index
    %124 = vector.load %arg4[%c0_82, %c0_83] : memref<4x1xf32, #tpu.memory_space<vmem>>, vector<4x1xf32>
    %125 = vector.broadcast %124 : vector<4x1xf32> to vector<4x64xf32>
    %126 = arith.addf %123, %125 : vector<4x64xf32>
    %cst_84 = arith.constant 0.000000e+00 : f32
    %127 = vector.broadcast %cst_84 : f32 to vector<4x64xf32>
    %128 = arith.maximumf %126, %127 : vector<4x64xf32>
    %c0_85 = arith.constant 0 : index
    %c0_86 = arith.constant 0 : index
    %129 = vector.load %arg5[%c0_85, %c0_86] : memref<8x4xf32, #tpu.memory_space<vmem>>, vector<8x4xf32>
    %cst_87 = arith.constant dense<0.000000e+00> : vector<8x64xf32>
    %130 = tpu.matmul %129, %128, %cst_87 {dimension_numbers = #tpu.dot_dimension_numbers<[1], [0], [0], [1], [0, 0, 1, 1], [], []>} : vector<8x4xf32>, vector<4x64xf32>, vector<8x64xf32> -> vector<8x64xf32>
    %cst_88 = arith.constant dense<0.000000e+00> : vector<8xf32>
    %131 = vector.multi_reduction <add>, %130, %cst_88 [1] : vector<8x64xf32> to vector<8xf32>
    %132 = vector.shape_cast %131 : vector<8xf32> to vector<8x1xf32>
    %133 = arith.mulf %130, %130 : vector<8x64xf32>
    %cst_89 = arith.constant dense<0.000000e+00> : vector<8xf32>
    %134 = vector.multi_reduction <add>, %133, %cst_89 [1] : vector<8x64xf32> to vector<8xf32>
    %135 = vector.shape_cast %134 : vector<8xf32> to vector<8x1xf32>
    %136 = tpu.concatenate %132, %135 in 1 : vector<8x1xf32>, vector<8x1xf32> -> vector<8x2xf32>
    %137 = arith.addf %120, %136 : vector<8x2xf32>
    %c0_90 = arith.constant 0 : index
    %c0_91 = arith.constant 0 : index
    %c0_92 = arith.constant 0 : index
    %138 = vector.load %arg6[%c0_90, %c0_91, %c0_92] : memref<1x8x2xf32, #tpu.memory_space<vmem>>, vector<1x8x2xf32>
    %139 = vector.shape_cast %138 : vector<1x8x2xf32> to vector<8x2xf32>
    %140 = vector.shape_cast %137 : vector<8x2xf32> to vector<1x8x2xf32>
    tpu.vector_store %arg6[%c0_90, %c0_91, %c0_92], %140 {strides = array<i32>} : memref<1x8x2xf32, #tpu.memory_space<vmem>>, vector<1x8x2xf32>,
    return
  }
  func.func @transform_0(%arg0: i32) -> (i32, i32, i32) {
    %c0_i32 = arith.constant 0 : i32
    %c0_i32_0 = arith.constant 0 : i32
    %c0_i32_1 = arith.constant 0 : i32
    return %arg0, %c0_i32, %c0_i32_0 : i32, i32, i32
  }
  func.func @transform_1(%arg0: i32) -> (i32, i32, i32, i32) {
    %c0_i32 = arith.constant 0 : i32
    %c0_i32_0 = arith.constant 0 : i32
    %c0_i32_1 = arith.constant 0 : i32
    %c0_i32_2 = arith.constant 0 : i32
    %c0_i32_3 = arith.constant 0 : i32
    return %c0_i32, %c0_i32_0, %c0_i32_1, %c0_i32_2 : i32, i32, i32, i32
  }
  func.func @transform_2(%arg0: i32) -> (i32, i32) {
    %c0_i32 = arith.constant 0 : i32
    %c0_i32_0 = arith.constant 0 : i32
    %c0_i32_1 = arith.constant 0 : i32
    return %c0_i32, %c0_i32_0 : i32, i32
  }
  func.func @transform_3(%arg0: i32) -> (i32, i32) {
    %c0_i32 = arith.constant 0 : i32
    %c0_i32_0 = arith.constant 0 : i32
    %c0_i32_1 = arith.constant 0 : i32
    return %c0_i32, %c0_i32_0 : i32, i32
  }
  func.func @transform_4(%arg0: i32) -> (i32, i32) {
    %c0_i32 = arith.constant 0 : i32
    %c0_i32_0 = arith.constant 0 : i32
    %c0_i32_1 = arith.constant 0 : i32
    return %c0_i32, %c0_i32_0 : i32, i32
  }
  func.func @transform_5(%arg0: i32) -> (i32, i32, i32) {
    %c0_i32 = arith.constant 0 : i32
    %c0_i32_0 = arith.constant 0 : i32
    %c0_i32_1 = arith.constant 0 : i32
    return %arg0, %c0_i32, %c0_i32_0 : i32, i32, i32
  }
}

module attributes {stable_mosaic.version = 11 : i64} {
  func.func @_final_kernel(%arg0: i32, %arg1: memref<1x4x64xf32, #tpu.memory_space<vmem>>, %arg2: memref<3x3x4x4xf32, #tpu.memory_space<vmem>>, %arg3: memref<4x1xf32, #tpu.memory_space<vmem>>, %arg4: memref<4x1xf32, #tpu.memory_space<vmem>>, %arg5: memref<8x4xf32, #tpu.memory_space<vmem>>, %arg6: memref<8x1xf32, #tpu.memory_space<vmem>>, %arg7: memref<8x1xf32, #tpu.memory_space<vmem>>, %arg8: memref<1x4x8x64xf32, #tpu.memory_space<vmem>>) attributes {dimension_semantics = [#tpu.dimension_semantics<parallel>], iteration_bounds = array<i64: 2>, scalar_prefetch = 0 : i64, scratch_operands = 0 : i64, tpu.core_type = #tpu.core_type<tc>, window_params = [{transform_indices = @transform_0, window_bounds = array<i64: 1, 4, 64>}, {pipeline_mode = #tpu.pipeline_mode<synchronous>, transform_indices = @transform_1, window_bounds = array<i64: 3, 3, 4, 4>}, {pipeline_mode = #tpu.pipeline_mode<synchronous>, transform_indices = @transform_2, window_bounds = array<i64: 4, 1>}, {pipeline_mode = #tpu.pipeline_mode<synchronous>, transform_indices = @transform_3, window_bounds = array<i64: 4, 1>}, {pipeline_mode = #tpu.pipeline_mode<synchronous>, transform_indices = @transform_4, window_bounds = array<i64: 8, 4>}, {pipeline_mode = #tpu.pipeline_mode<synchronous>, transform_indices = @transform_5, window_bounds = array<i64: 8, 1>}, {pipeline_mode = #tpu.pipeline_mode<synchronous>, transform_indices = @transform_6, window_bounds = array<i64: 8, 1>}, {transform_indices = @transform_7, window_bounds = array<i64: 1, 4, 8, 64>}]} {
    %c0 = arith.constant 0 : index
    %c0_0 = arith.constant 0 : index
    %c0_1 = arith.constant 0 : index
    %0 = vector.load %arg1[%c0, %c0_0, %c0_1] : memref<1x4x64xf32, #tpu.memory_space<vmem>>, vector<1x4x64xf32>
    %1 = vector.shape_cast %0 : vector<1x4x64xf32> to vector<4x64xf32>
    %2 = tpu.iota {dimensions = array<i32: 1>} : vector<1x64xi32>
    %c56_i32 = arith.constant 56 : i32
    %3 = vector.broadcast %c56_i32 : i32 to vector<1x64xi32>
    %4 = arith.cmpi slt, %2, %3 : vector<1x64xi32>
    %c8_i32 = arith.constant 8 : i32
    %c0_i32 = arith.constant 0 : i32
    %5 = arith.cmpi eq, %c8_i32, %c0_i32 : i32
    %c1_i32 = arith.constant 1 : i32
    %6 = arith.select %5, %c1_i32, %c8_i32 : i32
    %7 = vector.broadcast %6 : i32 to vector<1x64xi32>
    %8 = arith.remsi %2, %7 : vector<1x64xi32>
    %c0_i32_2 = arith.constant 0 : i32
    %9 = vector.broadcast %c0_i32_2 : i32 to vector<1x64xi32>
    %10 = arith.cmpi ne, %8, %9 : vector<1x64xi32>
    %c0_i32_3 = arith.constant 0 : i32
    %11 = vector.broadcast %c0_i32_3 : i32 to vector<1x64xi32>
    %12 = arith.cmpi slt, %8, %11 : vector<1x64xi32>
    %c0_i32_4 = arith.constant 0 : i32
    %13 = arith.cmpi slt, %6, %c0_i32_4 : i32
    %14 = vector.broadcast %13 : i1 to vector<1x64xi1>
    %15 = vector.broadcast %14 : vector<1x64xi1> to vector<1x64xi1>
    %16 = arith.xori %12, %15 : vector<1x64xi1>
    %17 = arith.andi %16, %10 : vector<1x64xi1>
    %18 = vector.broadcast %6 : i32 to vector<1x64xi32>
    %19 = arith.addi %8, %18 : vector<1x64xi32>
    %20 = arith.select %17, %19, %8 : vector<1x64xi1>, vector<1x64xi32>
    %c7_i32 = arith.constant 7 : i32
    %21 = vector.broadcast %c7_i32 : i32 to vector<1x64xi32>
    %22 = arith.cmpi slt, %20, %21 : vector<1x64xi32>
    %cst = arith.constant 0.000000e+00 : f32
    %23 = vector.broadcast %cst : f32 to vector<4x64xf32>
    %c56_i32_5 = arith.constant 56 : i32
    %24 = tpu.dynamic_rotate %1 by %c56_i32_5 dim 1 : vector<4x64xf32>, i32 -> vector<4x64xf32>
    %25 = vector.shape_cast %4 : vector<1x64xi1> to vector<1x64xi1>
    %26 = vector.broadcast %25 : vector<1x64xi1> to vector<4x64xi1>
    %27 = arith.select %26, %24, %23 : vector<4x64xi1>, vector<4x64xf32>
    %c63_i32 = arith.constant 63 : i32
    %28 = tpu.dynamic_rotate %1 by %c63_i32 dim 1 : vector<4x64xf32>, i32 -> vector<4x64xf32>
    %29 = vector.shape_cast %22 : vector<1x64xi1> to vector<1x64xi1>
    %30 = vector.broadcast %29 : vector<1x64xi1> to vector<4x64xi1>
    %31 = arith.select %30, %28, %23 : vector<4x64xi1>, vector<4x64xf32>
    %32 = arith.andi %4, %22 : vector<1x64xi1>
    %c55_i32 = arith.constant 55 : i32
    %33 = tpu.dynamic_rotate %1 by %c55_i32 dim 1 : vector<4x64xf32>, i32 -> vector<4x64xf32>
    %34 = vector.shape_cast %32 : vector<1x64xi1> to vector<1x64xi1>
    %35 = vector.broadcast %34 : vector<1x64xi1> to vector<4x64xi1>
    %36 = arith.select %35, %33, %23 : vector<4x64xi1>, vector<4x64xf32>
    %c1 = arith.constant 1 : index
    %c1_6 = arith.constant 1 : index
    %c0_7 = arith.constant 0 : index
    %c0_8 = arith.constant 0 : index
    %37 = vector.load %arg2[%c1, %c1_6, %c0_7, %c0_8] : memref<3x3x4x4xf32, #tpu.memory_space<vmem>>, vector<1x1x4x4xf32>
    %38 = vector.shape_cast %37 : vector<1x1x4x4xf32> to vector<4x4xf32>
    %cst_9 = arith.constant dense<0.000000e+00> : vector<4x64xf32>
    %39 = tpu.matmul %38, %1, %cst_9 {dimension_numbers = #tpu.dot_dimension_numbers<[1], [0], [0], [1], [0, 0, 1, 1], [], []>} : vector<4x4xf32>, vector<4x64xf32>, vector<4x64xf32> -> vector<4x64xf32>
    %c1_10 = arith.constant 1 : index
    %c2 = arith.constant 2 : index
    %c0_11 = arith.constant 0 : index
    %c0_12 = arith.constant 0 : index
    %40 = vector.load %arg2[%c1_10, %c2, %c0_11, %c0_12] : memref<3x3x4x4xf32, #tpu.memory_space<vmem>>, vector<1x1x4x4xf32>
    %41 = vector.shape_cast %40 : vector<1x1x4x4xf32> to vector<4x4xf32>
    %cst_13 = arith.constant dense<0.000000e+00> : vector<4x64xf32>
    %42 = tpu.matmul %41, %1, %cst_13 {dimension_numbers = #tpu.dot_dimension_numbers<[1], [0], [0], [1], [0, 0, 1, 1], [], []>} : vector<4x4xf32>, vector<4x64xf32>, vector<4x64xf32> -> vector<4x64xf32>
    %c1_14 = arith.constant 1 : index
    %c0_15 = arith.constant 0 : index
    %c0_16 = arith.constant 0 : index
    %c0_17 = arith.constant 0 : index
    %43 = vector.load %arg2[%c1_14, %c0_15, %c0_16, %c0_17] : memref<3x3x4x4xf32, #tpu.memory_space<vmem>>, vector<1x1x4x4xf32>
    %44 = vector.shape_cast %43 : vector<1x1x4x4xf32> to vector<4x4xf32>
    %cst_18 = arith.constant dense<0.000000e+00> : vector<4x64xf32>
    %45 = tpu.matmul %44, %31, %cst_18 {dimension_numbers = #tpu.dot_dimension_numbers<[1], [0], [0], [1], [0, 0, 1, 1], [], []>} : vector<4x4xf32>, vector<4x64xf32>, vector<4x64xf32> -> vector<4x64xf32>
    %46 = arith.addf %42, %45 : vector<4x64xf32>
    %c2_19 = arith.constant 2 : index
    %c1_20 = arith.constant 1 : index
    %c0_21 = arith.constant 0 : index
    %c0_22 = arith.constant 0 : index
    %47 = vector.load %arg2[%c2_19, %c1_20, %c0_21, %c0_22] : memref<3x3x4x4xf32, #tpu.memory_space<vmem>>, vector<1x1x4x4xf32>
    %48 = vector.shape_cast %47 : vector<1x1x4x4xf32> to vector<4x4xf32>
    %cst_23 = arith.constant dense<0.000000e+00> : vector<4x64xf32>
    %49 = tpu.matmul %48, %1, %cst_23 {dimension_numbers = #tpu.dot_dimension_numbers<[1], [0], [0], [1], [0, 0, 1, 1], [], []>} : vector<4x4xf32>, vector<4x64xf32>, vector<4x64xf32> -> vector<4x64xf32>
    %c0_24 = arith.constant 0 : index
    %c1_25 = arith.constant 1 : index
    %c0_26 = arith.constant 0 : index
    %c0_27 = arith.constant 0 : index
    %50 = vector.load %arg2[%c0_24, %c1_25, %c0_26, %c0_27] : memref<3x3x4x4xf32, #tpu.memory_space<vmem>>, vector<1x1x4x4xf32>
    %51 = vector.shape_cast %50 : vector<1x1x4x4xf32> to vector<4x4xf32>
    %cst_28 = arith.constant dense<0.000000e+00> : vector<4x64xf32>
    %52 = tpu.matmul %51, %27, %cst_28 {dimension_numbers = #tpu.dot_dimension_numbers<[1], [0], [0], [1], [0, 0, 1, 1], [], []>} : vector<4x4xf32>, vector<4x64xf32>, vector<4x64xf32> -> vector<4x64xf32>
    %53 = arith.addf %49, %52 : vector<4x64xf32>
    %c2_29 = arith.constant 2 : index
    %c2_30 = arith.constant 2 : index
    %c0_31 = arith.constant 0 : index
    %c0_32 = arith.constant 0 : index
    %54 = vector.load %arg2[%c2_29, %c2_30, %c0_31, %c0_32] : memref<3x3x4x4xf32, #tpu.memory_space<vmem>>, vector<1x1x4x4xf32>
    %55 = vector.shape_cast %54 : vector<1x1x4x4xf32> to vector<4x4xf32>
    %cst_33 = arith.constant dense<0.000000e+00> : vector<4x64xf32>
    %56 = tpu.matmul %55, %1, %cst_33 {dimension_numbers = #tpu.dot_dimension_numbers<[1], [0], [0], [1], [0, 0, 1, 1], [], []>} : vector<4x4xf32>, vector<4x64xf32>, vector<4x64xf32> -> vector<4x64xf32>
    %c0_34 = arith.constant 0 : index
    %c2_35 = arith.constant 2 : index
    %c0_36 = arith.constant 0 : index
    %c0_37 = arith.constant 0 : index
    %57 = vector.load %arg2[%c0_34, %c2_35, %c0_36, %c0_37] : memref<3x3x4x4xf32, #tpu.memory_space<vmem>>, vector<1x1x4x4xf32>
    %58 = vector.shape_cast %57 : vector<1x1x4x4xf32> to vector<4x4xf32>
    %cst_38 = arith.constant dense<0.000000e+00> : vector<4x64xf32>
    %59 = tpu.matmul %58, %27, %cst_38 {dimension_numbers = #tpu.dot_dimension_numbers<[1], [0], [0], [1], [0, 0, 1, 1], [], []>} : vector<4x4xf32>, vector<4x64xf32>, vector<4x64xf32> -> vector<4x64xf32>
    %60 = arith.addf %56, %59 : vector<4x64xf32>
    %c2_39 = arith.constant 2 : index
    %c0_40 = arith.constant 0 : index
    %c0_41 = arith.constant 0 : index
    %c0_42 = arith.constant 0 : index
    %61 = vector.load %arg2[%c2_39, %c0_40, %c0_41, %c0_42] : memref<3x3x4x4xf32, #tpu.memory_space<vmem>>, vector<1x1x4x4xf32>
    %62 = vector.shape_cast %61 : vector<1x1x4x4xf32> to vector<4x4xf32>
    %cst_43 = arith.constant dense<0.000000e+00> : vector<4x64xf32>
    %63 = tpu.matmul %62, %31, %cst_43 {dimension_numbers = #tpu.dot_dimension_numbers<[1], [0], [0], [1], [0, 0, 1, 1], [], []>} : vector<4x4xf32>, vector<4x64xf32>, vector<4x64xf32> -> vector<4x64xf32>
    %64 = arith.addf %60, %63 : vector<4x64xf32>
    %c0_44 = arith.constant 0 : index
    %c0_45 = arith.constant 0 : index
    %c0_46 = arith.constant 0 : index
    %c0_47 = arith.constant 0 : index
    %65 = vector.load %arg2[%c0_44, %c0_45, %c0_46, %c0_47] : memref<3x3x4x4xf32, #tpu.memory_space<vmem>>, vector<1x1x4x4xf32>
    %66 = vector.shape_cast %65 : vector<1x1x4x4xf32> to vector<4x4xf32>
    %cst_48 = arith.constant dense<0.000000e+00> : vector<4x64xf32>
    %67 = tpu.matmul %66, %36, %cst_48 {dimension_numbers = #tpu.dot_dimension_numbers<[1], [0], [0], [1], [0, 0, 1, 1], [], []>} : vector<4x4xf32>, vector<4x64xf32>, vector<4x64xf32> -> vector<4x64xf32>
    %68 = arith.addf %64, %67 : vector<4x64xf32>
    %c0_49 = arith.constant 0 : index
    %c0_50 = arith.constant 0 : index
    %69 = vector.load %arg3[%c0_49, %c0_50] : memref<4x1xf32, #tpu.memory_space<vmem>>, vector<4x1xf32>
    %70 = vector.broadcast %69 : vector<4x1xf32> to vector<4x64xf32>
    %71 = arith.mulf %39, %70 : vector<4x64xf32>
    %c0_51 = arith.constant 0 : index
    %c0_52 = arith.constant 0 : index
    %72 = vector.load %arg4[%c0_51, %c0_52] : memref<4x1xf32, #tpu.memory_space<vmem>>, vector<4x1xf32>
    %73 = vector.broadcast %72 : vector<4x1xf32> to vector<4x64xf32>
    %74 = arith.addf %71, %73 : vector<4x64xf32>
    %cst_53 = arith.constant 0.000000e+00 : f32
    %75 = vector.broadcast %cst_53 : f32 to vector<4x64xf32>
    %76 = arith.maximumf %74, %75 : vector<4x64xf32>
    %c0_54 = arith.constant 0 : index
    %c0_55 = arith.constant 0 : index
    %77 = vector.load %arg5[%c0_54, %c0_55] : memref<8x4xf32, #tpu.memory_space<vmem>>, vector<8x4xf32>
    %cst_56 = arith.constant dense<0.000000e+00> : vector<8x64xf32>
    %78 = tpu.matmul %77, %76, %cst_56 {dimension_numbers = #tpu.dot_dimension_numbers<[1], [0], [0], [1], [0, 0, 1, 1], [], []>} : vector<8x4xf32>, vector<4x64xf32>, vector<8x64xf32> -> vector<8x64xf32>
    %c0_57 = arith.constant 0 : index
    %c0_58 = arith.constant 0 : index
    %79 = vector.load %arg6[%c0_57, %c0_58] : memref<8x1xf32, #tpu.memory_space<vmem>>, vector<8x1xf32>
    %80 = vector.broadcast %79 : vector<8x1xf32> to vector<8x64xf32>
    %81 = arith.mulf %78, %80 : vector<8x64xf32>
    %c0_59 = arith.constant 0 : index
    %c0_60 = arith.constant 0 : index
    %82 = vector.load %arg7[%c0_59, %c0_60] : memref<8x1xf32, #tpu.memory_space<vmem>>, vector<8x1xf32>
    %83 = vector.broadcast %82 : vector<8x1xf32> to vector<8x64xf32>
    %84 = arith.addf %81, %83 : vector<8x64xf32>
    %cst_61 = arith.constant 0.000000e+00 : f32
    %85 = vector.broadcast %cst_61 : f32 to vector<8x64xf32>
    %86 = arith.maximumf %84, %85 : vector<8x64xf32>
    %c0_62 = arith.constant 0 : index
    %c0_63 = arith.constant 0 : index
    %c0_64 = arith.constant 0 : index
    %c0_65 = arith.constant 0 : index
    %87 = vector.load %arg8[%c0_62, %c0_63, %c0_64, %c0_65] : memref<1x4x8x64xf32, #tpu.memory_space<vmem>>, vector<1x1x8x64xf32>
    %88 = vector.shape_cast %87 : vector<1x1x8x64xf32> to vector<8x64xf32>
    %89 = vector.shape_cast %86 : vector<8x64xf32> to vector<1x1x8x64xf32>
    tpu.vector_store %arg8[%c0_62, %c0_63, %c0_64, %c0_65], %89 {strides = array<i32>} : memref<1x4x8x64xf32, #tpu.memory_space<vmem>>, vector<1x1x8x64xf32>,
    %c0_66 = arith.constant 0 : index
    %c0_67 = arith.constant 0 : index
    %90 = vector.load %arg3[%c0_66, %c0_67] : memref<4x1xf32, #tpu.memory_space<vmem>>, vector<4x1xf32>
    %91 = vector.broadcast %90 : vector<4x1xf32> to vector<4x64xf32>
    %92 = arith.mulf %46, %91 : vector<4x64xf32>
    %c0_68 = arith.constant 0 : index
    %c0_69 = arith.constant 0 : index
    %93 = vector.load %arg4[%c0_68, %c0_69] : memref<4x1xf32, #tpu.memory_space<vmem>>, vector<4x1xf32>
    %94 = vector.broadcast %93 : vector<4x1xf32> to vector<4x64xf32>
    %95 = arith.addf %92, %94 : vector<4x64xf32>
    %cst_70 = arith.constant 0.000000e+00 : f32
    %96 = vector.broadcast %cst_70 : f32 to vector<4x64xf32>
    %97 = arith.maximumf %95, %96 : vector<4x64xf32>
    %c0_71 = arith.constant 0 : index
    %c0_72 = arith.constant 0 : index
    %98 = vector.load %arg5[%c0_71, %c0_72] : memref<8x4xf32, #tpu.memory_space<vmem>>, vector<8x4xf32>
    %cst_73 = arith.constant dense<0.000000e+00> : vector<8x64xf32>
    %99 = tpu.matmul %98, %97, %cst_73 {dimension_numbers = #tpu.dot_dimension_numbers<[1], [0], [0], [1], [0, 0, 1, 1], [], []>} : vector<8x4xf32>, vector<4x64xf32>, vector<8x64xf32> -> vector<8x64xf32>
    %c0_74 = arith.constant 0 : index
    %c0_75 = arith.constant 0 : index
    %100 = vector.load %arg6[%c0_74, %c0_75] : memref<8x1xf32, #tpu.memory_space<vmem>>, vector<8x1xf32>
    %101 = vector.broadcast %100 : vector<8x1xf32> to vector<8x64xf32>
    %102 = arith.mulf %99, %101 : vector<8x64xf32>
    %c0_76 = arith.constant 0 : index
    %c0_77 = arith.constant 0 : index
    %103 = vector.load %arg7[%c0_76, %c0_77] : memref<8x1xf32, #tpu.memory_space<vmem>>, vector<8x1xf32>
    %104 = vector.broadcast %103 : vector<8x1xf32> to vector<8x64xf32>
    %105 = arith.addf %102, %104 : vector<8x64xf32>
    %cst_78 = arith.constant 0.000000e+00 : f32
    %106 = vector.broadcast %cst_78 : f32 to vector<8x64xf32>
    %107 = arith.maximumf %105, %106 : vector<8x64xf32>
    %c0_79 = arith.constant 0 : index
    %c1_80 = arith.constant 1 : index
    %c0_81 = arith.constant 0 : index
    %c0_82 = arith.constant 0 : index
    %108 = vector.load %arg8[%c0_79, %c1_80, %c0_81, %c0_82] : memref<1x4x8x64xf32, #tpu.memory_space<vmem>>, vector<1x1x8x64xf32>
    %109 = vector.shape_cast %108 : vector<1x1x8x64xf32> to vector<8x64xf32>
    %110 = vector.shape_cast %107 : vector<8x64xf32> to vector<1x1x8x64xf32>
    tpu.vector_store %arg8[%c0_79, %c1_80, %c0_81, %c0_82], %110 {strides = array<i32>} : memref<1x4x8x64xf32, #tpu.memory_space<vmem>>, vector<1x1x8x64xf32>,
    %c0_83 = arith.constant 0 : index
    %c0_84 = arith.constant 0 : index
    %111 = vector.load %arg3[%c0_83, %c0_84] : memref<4x1xf32, #tpu.memory_space<vmem>>, vector<4x1xf32>
    %112 = vector.broadcast %111 : vector<4x1xf32> to vector<4x64xf32>
    %113 = arith.mulf %53, %112 : vector<4x64xf32>
    %c0_85 = arith.constant 0 : index
    %c0_86 = arith.constant 0 : index
    %114 = vector.load %arg4[%c0_85, %c0_86] : memref<4x1xf32, #tpu.memory_space<vmem>>, vector<4x1xf32>
    %115 = vector.broadcast %114 : vector<4x1xf32> to vector<4x64xf32>
    %116 = arith.addf %113, %115 : vector<4x64xf32>
    %cst_87 = arith.constant 0.000000e+00 : f32
    %117 = vector.broadcast %cst_87 : f32 to vector<4x64xf32>
    %118 = arith.maximumf %116, %117 : vector<4x64xf32>
    %c0_88 = arith.constant 0 : index
    %c0_89 = arith.constant 0 : index
    %119 = vector.load %arg5[%c0_88, %c0_89] : memref<8x4xf32, #tpu.memory_space<vmem>>, vector<8x4xf32>
    %cst_90 = arith.constant dense<0.000000e+00> : vector<8x64xf32>
    %120 = tpu.matmul %119, %118, %cst_90 {dimension_numbers = #tpu.dot_dimension_numbers<[1], [0], [0], [1], [0, 0, 1, 1], [], []>} : vector<8x4xf32>, vector<4x64xf32>, vector<8x64xf32> -> vector<8x64xf32>
    %c0_91 = arith.constant 0 : index
    %c0_92 = arith.constant 0 : index
    %121 = vector.load %arg6[%c0_91, %c0_92] : memref<8x1xf32, #tpu.memory_space<vmem>>, vector<8x1xf32>
    %122 = vector.broadcast %121 : vector<8x1xf32> to vector<8x64xf32>
    %123 = arith.mulf %120, %122 : vector<8x64xf32>
    %c0_93 = arith.constant 0 : index
    %c0_94 = arith.constant 0 : index
    %124 = vector.load %arg7[%c0_93, %c0_94] : memref<8x1xf32, #tpu.memory_space<vmem>>, vector<8x1xf32>
    %125 = vector.broadcast %124 : vector<8x1xf32> to vector<8x64xf32>
    %126 = arith.addf %123, %125 : vector<8x64xf32>
    %cst_95 = arith.constant 0.000000e+00 : f32
    %127 = vector.broadcast %cst_95 : f32 to vector<8x64xf32>
    %128 = arith.maximumf %126, %127 : vector<8x64xf32>
    %c0_96 = arith.constant 0 : index
    %c2_97 = arith.constant 2 : index
    %c0_98 = arith.constant 0 : index
    %c0_99 = arith.constant 0 : index
    %129 = vector.load %arg8[%c0_96, %c2_97, %c0_98, %c0_99] : memref<1x4x8x64xf32, #tpu.memory_space<vmem>>, vector<1x1x8x64xf32>
    %130 = vector.shape_cast %129 : vector<1x1x8x64xf32> to vector<8x64xf32>
    %131 = vector.shape_cast %128 : vector<8x64xf32> to vector<1x1x8x64xf32>
    tpu.vector_store %arg8[%c0_96, %c2_97, %c0_98, %c0_99], %131 {strides = array<i32>} : memref<1x4x8x64xf32, #tpu.memory_space<vmem>>, vector<1x1x8x64xf32>,
    %c0_100 = arith.constant 0 : index
    %c0_101 = arith.constant 0 : index
    %132 = vector.load %arg3[%c0_100, %c0_101] : memref<4x1xf32, #tpu.memory_space<vmem>>, vector<4x1xf32>
    %133 = vector.broadcast %132 : vector<4x1xf32> to vector<4x64xf32>
    %134 = arith.mulf %68, %133 : vector<4x64xf32>
    %c0_102 = arith.constant 0 : index
    %c0_103 = arith.constant 0 : index
    %135 = vector.load %arg4[%c0_102, %c0_103] : memref<4x1xf32, #tpu.memory_space<vmem>>, vector<4x1xf32>
    %136 = vector.broadcast %135 : vector<4x1xf32> to vector<4x64xf32>
    %137 = arith.addf %134, %136 : vector<4x64xf32>
    %cst_104 = arith.constant 0.000000e+00 : f32
    %138 = vector.broadcast %cst_104 : f32 to vector<4x64xf32>
    %139 = arith.maximumf %137, %138 : vector<4x64xf32>
    %c0_105 = arith.constant 0 : index
    %c0_106 = arith.constant 0 : index
    %140 = vector.load %arg5[%c0_105, %c0_106] : memref<8x4xf32, #tpu.memory_space<vmem>>, vector<8x4xf32>
    %cst_107 = arith.constant dense<0.000000e+00> : vector<8x64xf32>
    %141 = tpu.matmul %140, %139, %cst_107 {dimension_numbers = #tpu.dot_dimension_numbers<[1], [0], [0], [1], [0, 0, 1, 1], [], []>} : vector<8x4xf32>, vector<4x64xf32>, vector<8x64xf32> -> vector<8x64xf32>
    %c0_108 = arith.constant 0 : index
    %c0_109 = arith.constant 0 : index
    %142 = vector.load %arg6[%c0_108, %c0_109] : memref<8x1xf32, #tpu.memory_space<vmem>>, vector<8x1xf32>
    %143 = vector.broadcast %142 : vector<8x1xf32> to vector<8x64xf32>
    %144 = arith.mulf %141, %143 : vector<8x64xf32>
    %c0_110 = arith.constant 0 : index
    %c0_111 = arith.constant 0 : index
    %145 = vector.load %arg7[%c0_110, %c0_111] : memref<8x1xf32, #tpu.memory_space<vmem>>, vector<8x1xf32>
    %146 = vector.broadcast %145 : vector<8x1xf32> to vector<8x64xf32>
    %147 = arith.addf %144, %146 : vector<8x64xf32>
    %cst_112 = arith.constant 0.000000e+00 : f32
    %148 = vector.broadcast %cst_112 : f32 to vector<8x64xf32>
    %149 = arith.maximumf %147, %148 : vector<8x64xf32>
    %c0_113 = arith.constant 0 : index
    %c3 = arith.constant 3 : index
    %c0_114 = arith.constant 0 : index
    %c0_115 = arith.constant 0 : index
    %150 = vector.load %arg8[%c0_113, %c3, %c0_114, %c0_115] : memref<1x4x8x64xf32, #tpu.memory_space<vmem>>, vector<1x1x8x64xf32>
    %151 = vector.shape_cast %150 : vector<1x1x8x64xf32> to vector<8x64xf32>
    %152 = vector.shape_cast %149 : vector<8x64xf32> to vector<1x1x8x64xf32>
    tpu.vector_store %arg8[%c0_113, %c3, %c0_114, %c0_115], %152 {strides = array<i32>} : memref<1x4x8x64xf32, #tpu.memory_space<vmem>>, vector<1x1x8x64xf32>,
    return
  }
  func.func @transform_0(%arg0: i32) -> (i32, i32, i32) {
    %c0_i32 = arith.constant 0 : i32
    %c0_i32_0 = arith.constant 0 : i32
    %c0_i32_1 = arith.constant 0 : i32
    return %arg0, %c0_i32, %c0_i32_0 : i32, i32, i32
  }
  func.func @transform_1(%arg0: i32) -> (i32, i32, i32, i32) {
    %c0_i32 = arith.constant 0 : i32
    %c0_i32_0 = arith.constant 0 : i32
    %c0_i32_1 = arith.constant 0 : i32
    %c0_i32_2 = arith.constant 0 : i32
    %c0_i32_3 = arith.constant 0 : i32
    return %c0_i32, %c0_i32_0, %c0_i32_1, %c0_i32_2 : i32, i32, i32, i32
  }
  func.func @transform_2(%arg0: i32) -> (i32, i32) {
    %c0_i32 = arith.constant 0 : i32
    %c0_i32_0 = arith.constant 0 : i32
    %c0_i32_1 = arith.constant 0 : i32
    return %c0_i32, %c0_i32_0 : i32, i32
  }
  func.func @transform_3(%arg0: i32) -> (i32, i32) {
    %c0_i32 = arith.constant 0 : i32
    %c0_i32_0 = arith.constant 0 : i32
    %c0_i32_1 = arith.constant 0 : i32
    return %c0_i32, %c0_i32_0 : i32, i32
  }
  func.func @transform_4(%arg0: i32) -> (i32, i32) {
    %c0_i32 = arith.constant 0 : i32
    %c0_i32_0 = arith.constant 0 : i32
    %c0_i32_1 = arith.constant 0 : i32
    return %c0_i32, %c0_i32_0 : i32, i32
  }
  func.func @transform_5(%arg0: i32) -> (i32, i32) {
    %c0_i32 = arith.constant 0 : i32
    %c0_i32_0 = arith.constant 0 : i32
    %c0_i32_1 = arith.constant 0 : i32
    return %c0_i32, %c0_i32_0 : i32, i32
  }
  func.func @transform_6(%arg0: i32) -> (i32, i32) {
    %c0_i32 = arith.constant 0 : i32
    %c0_i32_0 = arith.constant 0 : i32
    %c0_i32_1 = arith.constant 0 : i32
    return %c0_i32, %c0_i32_0 : i32, i32
  }
  func.func @transform_7(%arg0: i32) -> (i32, i32, i32, i32) {
    %c0_i32 = arith.constant 0 : i32
    %c0_i32_0 = arith.constant 0 : i32
    %c0_i32_1 = arith.constant 0 : i32
    %c0_i32_2 = arith.constant 0 : i32
    return %arg0, %c0_i32, %c0_i32_0, %c0_i32_1 : i32, i32, i32, i32
  }
}

</mosaic_0001>

<bundles_post_ra>
// kernel: decoder_block.4
= control target key start
LH: loop header
LB: loop body
LE: loop exit
PB: predicated region body
PF: predicated region fallthrough
CT: control target
= control target key end

     0   :  { %7 = vsyncpa [#allocation3], 0  ;;  %s885_s0 = inlined_call_operand.hbm [shape: f32[2,16,64], index: 0, kind: input, shape index: {}]   ;;  %s886_s1 = inlined_call_operand.hbm [shape: f32[4,16], index: 1, kind: input, shape index: {}]   ;;  %s887_s2 = inlined_call_operand.hbm [shape: f32[2,1,4,2], index: 2, kind: output, shape index: {}]  }
   0x1   :  { %9 = vsyncpa [#allocation3 + $0x1], 0 }
   0x2   :  { %10 = vsyncpa [#allocation6], 0 }
   0x3   :  { %11 = vsyncpa [#allocation4], 0 }
   0x4   :  { %13 = vsyncpa [#allocation4 + $0x1], 0  ;;  %s665_s9 = smov 0   ;;  %s667_s10 = smov 0  }
   0x5   :  { %s669_s11 = smov 0   ;;  %s671_s12 = smov 0  }
   0x6   :  { %s673_s13 = smov 0   ;;  %s675_s14 = smov 0  }
   0x7 LB: > { %s387_s15 = sadd.s32 4294967295, %s640_s14   ;;  %s388_s16 = sadd.s32 4294967294, %s640_s14   ;;  %s640_s14 = sphi %s675_s14, %s19_s14   ;;  %s636_s13 = sphi %s673_s13, %s915_s13   ;;  %s632_s12 = sphi %s671_s12, %s914_s12   ;;  %s628_s11 = sphi %s669_s11, %s913_s11   ;;  %s624_s10 = sphi %s667_s10, %s912_s10   ;;  %s620_s9 = sphi %s665_s9, %s911_s9  }
   0x8   : > { %s40_s17 = sadd.s32 1, %s628_s11  ;;  %p47_p0 = scmp.ne.s32.totalorder %s628_s11, %s624_s10 }
   0x9   : > { %p48_p1 = scmp.eq.s32.totalorder %s640_s14, 0  ;;  %p53_p2 = scmp.ne.s32.totalorder %s624_s10, %s620_s9 }
   0xa   : > { %p703_p3 = scmp.eq.s32.totalorder %s387_s15, 0  ;;  %p100_p4 = scmp.eq.s32.totalorder %s387_s15, 1 }
   0xb   : > { %p707_p5 = por %p48_p1, %p47_p0  ;;  %p106_p6 = scmp.eq.s32.totalorder %s388_s16, 1 }
   0xc   : > { %s894_s18 = scalar_select %p703_p3, 1, 0 }
   0xd   : > { %p713_p7 = por %p703_p3, %p53_p2  ;;  %p717_p8 = por %p100_p4, %p47_p0 }
   0xe   : > { %p721_p9 = por %p106_p6, %p53_p2  ;;  %p389_p10 = scmp.ge.s32.totalorder %s640_s14, 1 }
   0xf   : > { %s896_s20 = scalar_select %p713_p7, 1, 0 }
  0x10   : > { %s897_s21 = scalar_select %p717_p8, 1, 0 }
  0x11   : > { %s898_s22 = scalar_select %p721_p9, 1, 0 }
  0x12   : > { %p113_p11 = scmp.lt.s32.totalorder %s640_s14, 3  ;;  %s642_s24 = smov [#allocation5]  }
  0x13   : > { %s126_s25 = sshll.u32 %s642_s24, 4  ;;  %p439_p1 = scmp.lt.s32.totalorder %s640_s14, 2  ;;  %s127_s25 = int_to_ptr.vmem [resolvable:$true] %s126_s25 }
  0x14   : > { %p728_p13 = pnand %p389_p10, %p113_p11  ;;  %s31_s28 = sadd.s32 1, %s636_s13 }
  0x15   : > { %p737_p4 = pnand %p439_p1, %p707_p5  ;;  %p748_p6 = scmp.ge.s32.totalorder %s31_s28, 2 }
  0x16   : > { %s899_s23 = scalar_select %p728_p13, 1, 0 }
  0x17   : > { %p426_p0 = pneg %p728_p13  ;;  %s137_s30 = sand.u32 1, %s628_s11  }
  0x18   : > { %s900_s26 = scalar_select %p737_p4, 1, 0 }
  0x19   : > { %p743_p2 = pnand %p426_p0, %p703_p3  ;;  %s496_s5 = scalar_lea.hbm %s886_s1, 64 }
  0x1a   : > { %s902_s29 = scalar_select %p748_p6, 1, 0 }
  0x1b   : > { %p497_p5 = scmp.ne.s32.totalorder %s886_s1, %s496_s5  ;;  %p498_p10 = pneg %p743_p2 }
  0x1c   : > { %p503_p0 = scmp.lt.u32.totalorder %s496_s5, %s886_s1 }
  0x1d   : > { %p499_p11 = pnand %p498_p10, %p497_p5 }
  0x1f   : > { %p500_p1 = pneg %p499_p11 }
  0x21   : > { %p505_p12 = pnand %p503_p0, %p500_p1 }
  0x23   : > { %508 = shalt.err (!%p505_p12)
}
  0x24   : > { %s509_s16 = scalar_lea.vmem %s127_s25, 64  ;;  %p517_p7 = scmp.lt.s32.totalorder %s127_s25, %s127_s25 }
  0x25   : > { %p510_p9 = scmp.ne.s32.totalorder %s127_s25, %s509_s16  ;;  %p518_p13 = scmp.lt.s32.totalorder %s509_s16, %s509_s16 }
  0x27   : > { %p512_p8 = pnand %p510_p9, %p498_p10  ;;  %p519_p4 = por %p518_p13, %p517_p7 }
  0x29   : > { %p513_p3 = pneg %p512_p8 }
  0x2b   : > { %p520_p6 = pnand %p519_p4, %p513_p3 }
  0x2d   : > { %523 = shalt.err (!%p520_p6)
}
  0x2e   : > { %429 = dma.hbm_to_vmem [thread:$0]  (!%p743_p2), %s886_s1, 64, %s127_s25, [#allocation6]  }
  0x2f   : > { %p903_p9 = scmp.ne.s32.totalorder %s902_s29, 0  ;;  %s392_s3 = sshll.u32 %s137_s30, 4 }
  0x30   : > { %s404_s5 = sshll.u32 %s636_s13, 8  ;;  %s141_s8 = scalar_lea.vmem [#allocation2], %s392_s3 }
  0x31   : > { %s917_s28 = smov (%p903_p9, %s31_s28), 0  ;;  %s779_s7 = scalar_lea.hbm %s885_s0, %s404_s5 }
  0x32   : > { %s35_s4 = ssub.s32 %s636_s13, %s917_s28  ;;  %s149_s15 = sshll.u32 %s141_s8, 4  ;;  %s786_s15 = int_to_ptr.vmem [resolvable:$true] %s149_s15 }
  0x33   : > { %p38_p3 = scmp.eq.s32.totalorder %s35_s4, 0  ;;  %s788_s29 = scalar_lea.sflag [#allocation3], %s137_s30 }
  0x34   : > { %s524_s16 = scalar_lea.hbm %s779_s7, 256  ;;  %p904_p8 = scmp.ne.s32.totalorder %s900_s26, 0 }
  0x35   : > { %s784_s25 = scalar_select %p38_p3, %s628_s11, %s40_s17  }
  0x36   : > { %p525_p7 = scmp.ne.s32.totalorder %s779_s7, %s524_s16  ;;  %p526_p12 = pneg %p904_p8 }
  0x37   : > { %s529_s3 = scalar_lea.hbm %s885_s0, 512  ;;  %p530_p2 = scmp.lt.u32.totalorder %s779_s7, %s885_s0 }
  0x38   : > { %p527_p13 = pnand %p526_p12, %p525_p7  ;;  %p531_p6 = scmp.lt.u32.totalorder %s529_s3, %s524_s16 }
  0x39   : > { %p533_p10 = scmp.lt.u32.totalorder %s524_s16, %s779_s7 }
  0x3a   : > { %p528_p4 = pneg %p527_p13  ;;  %p532_p5 = por %p531_p6, %p530_p2 }
  0x3c   : > { %p534_p11 = por %p533_p10, %p532_p5 }
  0x3e   : > { %p535_p1 = pnand %p534_p11, %p528_p4 }
  0x40   : > { %538 = shalt.err (!%p535_p1)
}
  0x41   : > { %s539_s17 = scalar_lea.vmem %s786_s15, 256  ;;  %s643_s30 = smov [#allocation2]  }
  0x42   : > { %p540_p0 = scmp.ne.s32.totalorder %s786_s15, %s539_s17  ;;  %s544_s27 = sshll.u32 %s643_s30, 4  ;;  %s545_s27 = int_to_ptr.vmem [resolvable:$false] %s544_s27 }
  0x43   : > { %s546_s6 = scalar_lea.vmem %s545_s27, 512  ;;  %p547_p7 = scmp.lt.s32.totalorder %s786_s15, %s545_s27 }
  0x44   : > { %p542_p9 = pnand %p540_p0, %p526_p12  ;;  %p548_p13 = scmp.lt.s32.totalorder %s546_s6, %s539_s17 }
  0x46   : > { %p543_p3 = pneg %p542_p9  ;;  %p549_p2 = por %p548_p13, %p547_p7 }
  0x48   : > { %p550_p6 = pnand %p549_p2, %p543_p3 }
  0x4a   : > { %553 = shalt.err (!%p550_p6)
}
  0x4b   : > { %s644_s8 = smov 128   ;;  %s645_s16 = smov 8  }
  0x4c   : > { %433 = dma.hbm_to_vmem [thread:$0]  (!%p904_p8), %s779_s7, 256, %s786_s15, %s788_s29, %s644_s8, %s644_s8, %s645_s16  }
  0x4d   : > { %p905_p12 = scmp.ne.s32.totalorder %s899_s23, 0 }
  0x4e   : > { %s819_s19 = sand.u32 (!%p905_p12), 1, %s624_s10   ;;  %p906_p4 = scmp.ne.s32.totalorder (!%p905_p12), %s896_s20, 0 }
  0x4f   : > { %161 = sbr.rel (%p905_p12) target bundleno = 471 (0x1d7), region = 28  ;;  %s396_s24 = sshll.u32 (!%p905_p12), %s819_s19, 4 }
  0x50   : > { %s164_s3 = scalar_lea.sflag (!%p905_p12), [#allocation3], %s819_s19  ;;  %s167_s4 = scalar_lea.vmem (!%p905_p12), [#allocation2], %s396_s24 }
  0x56   : > { %607 = dma.done.wait (%p906_p4), %s164_s3, 256  }
  0x57   : > { %609 = vsyncadd (%p906_p4), %s164_s3, 4294967040  ;;  %p907_p5 = scmp.ne.s32.totalorder %s894_s18, 0 }
  0x59   : > { %611 = dma.done.wait (%p907_p5), [#allocation6], 64  }
  0x5a   : > { %613 = vsyncadd (%p907_p5), [#allocation6], 4294967232  ;;  %v646_v0 = vmov 0.0|0.0   ;;  %vm647_vm0 = vmmov 0   ;;  %v648_v1 = vmov 0.0   ;;  %v193_v2 = vld [vmem:[%s167_s4] sm:$0xff] }
  0x5b   : > { %415 = vmatprep.subr.bf16.mxu0 %v646_v0  ;;  %412 = vmatprep.mubr.msk.f32.mxu0 %vm647_vm0, %v648_v1  ;;  %v194_v3 = vld [vmem:[%s167_s4 + $0x8] sm:$0xff]  ;;  %v192_v5 = vld [vmem:[#allocation5] sm:$0xf]  ;;  %vm195_vm1 = vcmask 130048   ;;  %vm269_vm2 = vcmask 519168   ;;  %s398_s18 = sshll.u32 %s819_s19, 2 }
  0x5c   : > { %v416_v4 = vpack.c.bf16 %v194_v3, %v193_v2  ;;  %s401_s20 = sshll.u32 %s632_s12, 6  ;;  %s191_s23 = scalar_lea.vmem [#allocation7], %s398_s18  ;;  %vm277_vm3 = vcmask 7168   ;;  %vm279_vm4 = vcmask 11264  }
  0x5d   : > { %s296_s26 = sshll.u32 %s191_s23, 4  ;;  %s836_s29 = scalar_lea.hbm %s887_s2, %s401_s20  ;;  %s838_s26 = int_to_ptr.vmem [resolvable:$true] %s296_s26 }
  0x5e   : > { %417 = vmatpush3.bf16.msra.mxu0 %v416_v4  ;;  %s282_s5 = scalar_lea.sflag [#allocation4], %s819_s19  ;;  %s554_s17 = scalar_lea.vmem %s838_s26, 64 }
  0x5f   : > { %p555_p8 = scmp.ne.s32.totalorder %s838_s26, %s554_s17  ;;  %p908_p10 = scmp.ne.s32.totalorder %s897_s21, 0 }
  0x60   : > { %s649_s12 = smov [#allocation7]  }
  0x61   : > { %413 = vmatmul.mubr.msk.f32.vlgmr.msra.gmra.mrb[0].mxu0 %vm195_vm1, %v192_v5  ;;  %p556_p11 = pnand %p555_p8, %p908_p10  ;;  %s558_s30 = sshll.u32 %s649_s12, 4  ;;  %s559_s30 = int_to_ptr.vmem [resolvable:$false] %s558_s30 }
  0x62   : > { %s560_s27 = scalar_lea.vmem %s559_s30, 128  ;;  %p561_p0 = scmp.lt.s32.totalorder %s838_s26, %s559_s30 }
  0x63   : > { %p557_p1 = pneg %p556_p11  ;;  %p562_p9 = scmp.lt.s32.totalorder %s560_s27, %s554_s17 }
  0x65   : > { %p563_p3 = por %p562_p9, %p561_p0 }
  0x67   : > { %p564_p7 = pnand %p563_p3, %p557_p1 }
 0x134   : > { %v265_v6 = vpop.f32.mrb[0].mxu0 }
 0x135   : > { %v273_v7 = vmul.f32 %v265_v6, %v265_v6  ;;  %v414_v8 = vpop.f32.mrb[1].mxu0  ;;  %v270_v9 = vsel %vm269_vm2, %v265_v6, 0.0 }
 0x136   : > { %271 = vadd.xlane.f32.xlu0 %v270_v9 }
 0x137   : > { %v274_v10 = vsel %vm269_vm2, %v273_v7, 0.0 }
 0x13a   : > { %275 = vadd.xlane.f32.xlu0 %v274_v10 }
 0x1c3   : > { %v272_v11 = vpop.xlane.xlu0 %271 }
 0x1c7   : > { %v276_v12 = vpop.xlane.xlu0 %275 }
 0x1c8   : > { %v278_v13 = vsel %vm277_vm3, %v272_v11, %v276_v12 }
 0x1c9   : > { %280 = vst.msk [vmem:[%s191_s23] sm:$0xf] %vm279_vm4, %v278_v13 }
 0x1ca   : > { %567 = shalt.err (!%p564_p7)
}
 0x1cb   : > { %s568_s6 = scalar_lea.hbm %s836_s29, 64  ;;  %s572_s19 = scalar_lea.hbm %s887_s2, 128 }
 0x1cc   : > { %p569_p13 = scmp.ne.s32.totalorder %s836_s29, %s568_s6  ;;  %p573_p12 = scmp.lt.u32.totalorder %s836_s29, %s887_s2 }
 0x1cd   : > { %p574_p4 = scmp.lt.u32.totalorder %s572_s19, %s568_s6  ;;  %p576_p8 = scmp.lt.u32.totalorder %s568_s6, %s836_s29 }
 0x1ce   : > { %p570_p2 = pnand %p569_p13, %p908_p10 }
 0x1cf   : > { %p575_p5 = por %p574_p4, %p573_p12 }
 0x1d0   : > { %p571_p6 = pneg %p570_p2 }
 0x1d1   : > { %p577_p11 = por %p576_p8, %p575_p5 }
 0x1d3   : > { %p578_p1 = pnand %p577_p11, %p571_p6 }
 0x1d5   : > { %581 = shalt.err (!%p578_p1)
}
 0x1d6   : > { %424 = dma.vmem_to_hbm [thread:$0]  (%p908_p10), %s838_s26, 64, %s836_s29, %s282_s5  }
 0x1d7 PF: > { %s308_s4 = sand.u32 1, %s620_s9   ;;  %p909_p0 = scmp.ne.s32.totalorder %s898_s22, 0 }
 0x1d8   : > { %p910_p9 = scmp.ge.s32.totalorder %s640_s14, 2  ;;  %s309_s18 = scalar_lea.sflag [#allocation4], %s308_s4 }
 0x1da   : > { %p435_p3 = pnand %p910_p9, %p909_p0 }
 0x1dc   : > { %615 = dma.done.wait (!%p435_p3), %s309_s18, 64  }
 0x1dd   : > { %617 = vsyncadd (!%p435_p3), %s309_s18, 4294967232  ;;  %s19_s14 = sadd.s32 1, %s640_s14   ;;  %s911_s9 = smov %s624_s10 }
 0x1de   : > { %p16_p7 = scmp.ge.s32.totalorder %s19_s14, 4   ;;  %s912_s10 = smov %s628_s11 }
 0x1df   : > { %s913_s11 = smov %s784_s25  ;;  %s914_s12 = smov %s636_s13 }
 0x1e0   : > { %s915_s13 = smov %s917_s28  ;;  %18 = sbr.rel (!%p16_p7) target bundleno = 7 (0x7), region = 77 }
 0x1e7   :  { %314 = vsyncpa [#allocation3], 1 }
 0x1e8   :  { %316 = vsyncpa [#allocation3 + $0x1], 1 }
 0x1e9   :  { %317 = vsyncpa [#allocation6], 1 }
 0x1ea   :  { %318 = vsyncpa [#allocation4], 1 }
 0x1eb   :  { %320 = vsyncpa [#allocation4 + $0x1], 1 }

// kernel: decoder_block.5
= control target key start
LH: loop header
LB: loop body
LE: loop exit
PB: predicated region body
PF: predicated region fallthrough
CT: control target
= control target key end

     0   :  { %12 = vsyncpa [#allocation3], 0  ;;  %s2283_s0 = inlined_call_operand.hbm [shape: f32[2,16,64], index: 0, kind: input, shape index: {}]   ;;  %s2284_s1 = inlined_call_operand.hbm [shape: f32[4,16], index: 1, kind: input, shape index: {}]   ;;  %s2285_s2 = inlined_call_operand.hbm [shape: f32[4,1], index: 2, kind: input, shape index: {}]   ;;  %s2286_s3 = inlined_call_operand.hbm [shape: f32[4,1], index: 3, kind: input, shape index: {}]   ;;  %s2287_s4 = inlined_call_operand.hbm [shape: f32[3,3,4,4], index: 4, kind: input, shape index: {}]   ;;  %s2288_s5 = inlined_call_operand.hbm [shape: f32[2,4,64], index: 5, kind: output, shape index: {0}]   ;;  %s2289_s6 = inlined_call_operand.hbm [shape: f32[2,4,2], index: 6, kind: output, shape index: {1}]  }
   0x1   :  { %14 = vsyncpa [#allocation3 + $0x1], 0 }
   0x2   :  { %15 = vsyncpa [#allocation6], 0 }
   0x3   :  { %16 = vsyncpa [#allocation9], 0 }
   0x4   :  { %17 = vsyncpa [#allocation4], 0 }
   0x5   :  { %19 = vsyncpa [#allocation4 + $0x1], 0 }
   0x6   :  { %20 = vsyncpa [#allocation13], 0 }
   0x7   :  { %22 = vsyncpa [#allocation13 + $0x1], 0  ;;  %s1909_s21 = smov 0   ;;  %s1911_s22 = smov 0  }
   0x8   :  { %s1913_s23 = smov 0   ;;  %s1915_s24 = smov 0  }
   0x9 LB: > { %s1930_s25 = sadd.s32 4294967295, %s1853_s24   ;;  %s1371_s26 = sadd.s32 4294967294, %s1853_s24   ;;  %s1853_s24 = sphi %s1915_s24, %s2314_s24   ;;  %s1849_s23 = sphi %s1913_s23, %s2313_s23   ;;  %s1845_s22 = sphi %s1911_s22, %s2312_s22   ;;  %s1841_s21 = sphi %s1909_s21, %s2311_s21  }
   0xa   : > { %p48_p0 = scmp.ne.s32.totalorder %s1845_s22, %s1841_s21  ;;  %p2290_p1 = scmp.eq.s32.totalorder %s1930_s25, 0 }
   0xb   : > { %p162_p3 = scmp.eq.s32.totalorder %s1371_s26, 1  ;;  %p1372_p5 = scmp.ge.s32.totalorder %s1853_s24, 1 }
   0xc   : > { %p1939_p4 = por %p2290_p1, %p48_p0  ;;  %p195_p7 = scmp.lt.s32.totalorder %s1853_s24, 3 }
   0xd   : > { %p1944_p6 = por %p162_p3, %p48_p0  ;;  %s1855_s30 = smov [#allocation5]  }
   0xe   : > { %s2293_s27 = scalar_select %p1939_p4, 1, 0 }
   0xf   : > { %s2294_s28 = scalar_select %p1944_p6, 1, 0 }
  0x10   : > { %p1949_p8 = pnand %p1372_p5, %p195_p7  ;;  %s208_s7 = sshll.u32 %s1855_s30, 4  ;;  %s209_s7 = int_to_ptr.vmem [resolvable:$true] %s208_s7 }
  0x11   : > { %s1856_s8 = smov [#allocation8]   ;;  %s1857_s11 = smov [#allocation7]  }
  0x12   : > { %s2295_s29 = scalar_select %p1949_p8, 1, 0 }
  0x13   : > { %p1522_p10 = pneg %p1949_p8  ;;  %s230_s9 = sshll.u32 %s1856_s8, 4  ;;  %s1962_s9 = int_to_ptr.vmem [resolvable:$true] %s230_s9 }
  0x14   : > { %s219_s12 = sshll.u32 %s1857_s11, 4  ;;  %s1605_s15 = scalar_lea.hbm %s2284_s1, 64  ;;  %s1964_s12 = int_to_ptr.vmem [resolvable:$true] %s219_s12 }
  0x15   : > { %p1958_p11 = pnand %p1522_p10, %p2290_p1  ;;  %p1606_p12 = scmp.ne.s32.totalorder %s2284_s1, %s1605_s15 }
  0x16   : > { %p1612_p5 = scmp.lt.u32.totalorder %s1605_s15, %s2284_s1 }
  0x17   : > { %p1974_p13 = pneg %p1958_p11 }
  0x19   : > { %p1608_p0 = pnand %p1974_p13, %p1606_p12 }
  0x1b   : > { %p1609_p3 = pneg %p1608_p0 }
  0x1d   : > { %p1614_p7 = pnand %p1612_p5, %p1609_p3 }
  0x1f   : > { %1617 = shalt.err (!%p1614_p7)
}
  0x20   : > { %s1618_s26 = scalar_lea.vmem %s209_s7, 64  ;;  %p1626_p2 = scmp.lt.s32.totalorder %s209_s7, %s209_s7 }
  0x21   : > { %p1619_p10 = scmp.ne.s32.totalorder %s209_s7, %s1618_s26  ;;  %p1627_p6 = scmp.lt.s32.totalorder %s1618_s26, %s1618_s26 }
  0x23   : > { %p1621_p9 = pnand %p1619_p10, %p1974_p13  ;;  %p1628_p4 = por %p1627_p6, %p1626_p2 }
  0x25   : > { %p1622_p1 = pneg %p1621_p9 }
  0x27   : > { %p1629_p8 = pnand %p1628_p4, %p1622_p1 }
  0x29   : > { %1632 = shalt.err (!%p1629_p8)
}
  0x2a   : > { %1525 = dma.hbm_to_vmem [thread:$0]  (!%p1958_p11), %s2284_s1, 64, %s209_s7, [#allocation6]  }
  0x2b   : > { %s1633_s14 = scalar_lea.hbm %s2286_s3, 64 }
  0x2c   : > { %p1634_p9 = scmp.ne.s32.totalorder %s2286_s3, %s1633_s14  ;;  %p1640_p1 = scmp.lt.u32.totalorder %s1633_s14, %s2286_s3 }
  0x2e   : > { %p1636_p12 = pnand %p1634_p9, %p1974_p13 }
  0x30   : > { %p1637_p2 = pneg %p1636_p12 }
  0x32   : > { %p1642_p4 = pnand %p1640_p1, %p1637_p2 }
  0x34   : > { %1645 = shalt.err (!%p1642_p4)
}
  0x35   : > { %s1646_s7 = scalar_lea.vmem %s1962_s9, 64  ;;  %p1654_p3 = scmp.lt.s32.totalorder %s1962_s9, %s1962_s9 }
  0x36   : > { %p1647_p6 = scmp.ne.s32.totalorder %s1962_s9, %s1646_s7  ;;  %p1655_p5 = scmp.lt.s32.totalorder %s1646_s7, %s1646_s7 }
  0x38   : > { %p1649_p8 = pnand %p1647_p6, %p1974_p13  ;;  %p1656_p7 = por %p1655_p5, %p1654_p3 }
  0x3a   : > { %p1650_p0 = pneg %p1649_p8 }
  0x3c   : > { %p1657_p10 = pnand %p1656_p7, %p1650_p0 }
  0x3e   : > { %1660 = shalt.err (!%p1657_p10)
}
  0x3f   : > { %1531 = dma.hbm_to_vmem [thread:$0]  (!%p1958_p11), %s2286_s3, 64, %s1962_s9, [#allocation9]  }
  0x40   : > { %s1661_s11 = scalar_lea.hbm %s2285_s2, 64 }
  0x41   : > { %p1662_p9 = scmp.ne.s32.totalorder %s2285_s2, %s1661_s11  ;;  %p1668_p1 = scmp.lt.u32.totalorder %s1661_s11, %s2285_s2 }
  0x43   : > { %p1664_p12 = pnand %p1662_p9, %p1974_p13 }
  0x45   : > { %p1665_p2 = pneg %p1664_p12 }
  0x47   : > { %p1670_p4 = pnand %p1668_p1, %p1665_p2 }
  0x49   : > { %1673 = shalt.err (!%p1670_p4)
}
  0x4a   : > { %s1674_s9 = scalar_lea.vmem %s1964_s12, 64  ;;  %p1682_p3 = scmp.lt.s32.totalorder %s1964_s12, %s1964_s12 }
  0x4b   : > { %p1675_p6 = scmp.ne.s32.totalorder %s1964_s12, %s1674_s9  ;;  %p1683_p5 = scmp.lt.s32.totalorder %s1674_s9, %s1674_s9 }
  0x4d   : > { %p1677_p8 = pnand %p1675_p6, %p1974_p13  ;;  %p1684_p7 = por %p1683_p5, %p1682_p3 }
  0x4f   : > { %p1678_p0 = pneg %p1677_p8 }
  0x51   : > { %p1685_p10 = pnand %p1684_p7, %p1678_p0 }
  0x53   : > { %1688 = shalt.err (!%p1685_p10)
}
  0x54   : > { %1528 = dma.hbm_to_vmem [thread:$0]  (!%p1958_p11), %s2285_s2, 64, %s1964_s12, [#allocation6]  }
  0x55   : > { %s1858_s7 = smov [#allocation10]   ;;  %s1689_s8 = scalar_lea.hbm %s2287_s4, 576 }
  0x56   : > { %s240_s20 = sshll.u32 %s1858_s7, 4  ;;  %p1690_p9 = scmp.ne.s32.totalorder %s2287_s4, %s1689_s8  ;;  %s241_s20 = int_to_ptr.vmem [resolvable:$true] %s240_s20 }
  0x57   : > { %p1696_p1 = scmp.lt.u32.totalorder %s1689_s8, %s2287_s4 }
  0x58   : > { %p1692_p12 = pnand %p1690_p9, %p1974_p13 }
  0x5a   : > { %p1693_p2 = pneg %p1692_p12 }
  0x5c   : > { %p1698_p4 = pnand %p1696_p1, %p1693_p2 }
  0x5e   : > { %1701 = shalt.err (!%p1698_p4)
}
  0x5f   : > { %s1702_s12 = scalar_lea.vmem %s241_s20, 576  ;;  %p1710_p3 = scmp.lt.s32.totalorder %s241_s20, %s241_s20 }
  0x60   : > { %p1703_p6 = scmp.ne.s32.totalorder %s241_s20, %s1702_s12  ;;  %p1711_p5 = scmp.lt.s32.totalorder %s1702_s12, %s1702_s12 }
  0x62   : > { %p1705_p8 = pnand %p1703_p6, %p1974_p13  ;;  %p1712_p7 = por %p1711_p5, %p1710_p3 }
  0x64   : > { %p1706_p0 = pneg %p1705_p8 }
  0x66   : > { %p1713_p10 = pnand %p1712_p7, %p1706_p0 }
  0x68   : > { %1716 = shalt.err (!%p1713_p10)
}
  0x69   : > { %s1859_s16 = smov 64   ;;  %s1860_s18 = smov 4  }
  0x6a   : > { %1534 = dma.hbm_to_vmem [thread:$0]  (!%p1958_p11), %s2287_s4, 576, %s241_s20, [#allocation9], %s1859_s16, %s1859_s16, %s1860_s18  }
  0x6b   : > { %s2055_s19 = sadd.s32 1, %s1853_s24   ;;  %s35_s26 = sadd.s32 1, %s1849_s23 }
  0x6c   : > { %s32_s7 = ssub.s32 %s1853_s24, %s2055_s19  ;;  %p42_p9 = scmp.ne.s32.totalorder %s1849_s23, %s1845_s22 }
  0x6d   : > { %p33_p13 = scmp.eq.s32.totalorder %s32_s7, 0  ;;  %p43_p12 = scmp.eq.s32.totalorder %s1853_s24, 0 }
  0x6e   : > { %p2298_p1 = scmp.eq.s32.totalorder %s1930_s25, 1  ;;  %p1550_p6 = scmp.lt.s32.totalorder %s1853_s24, 2 }
  0x6f   : > { %s2064_s30 = scalar_select %p33_p13, %s1849_s23, %s35_s26  }
  0x70   : > { %p44_p2 = por %p43_p12, %p42_p9  ;;  %p2068_p4 = por %p2298_p1, %p42_p9 }
  0x71   : > { %s254_s10 = sand.u32 1, %s1849_s23   ;;  %s1414_s20 = sshll.u32 %s1853_s24, 8 }
  0x72   : > { %s1378_s11 = sshll.u32 %s254_s10, 4  ;;  %s2078_s15 = scalar_lea.hbm %s2283_s0, %s1414_s20 }
  0x73   : > { %s258_s12 = scalar_lea.vmem [#allocation2], %s1378_s11  ;;  %p2082_p11 = pnand %p1550_p6, %p44_p2 }
  0x74   : > { %s265_s16 = sshll.u32 %s258_s12, 4  ;;  %s2086_s9 = scalar_lea.sflag [#allocation3], %s254_s10  ;;  %s2080_s16 = int_to_ptr.vmem [resolvable:$true] %s265_s16 }
  0x75   : > { %s1717_s17 = scalar_lea.hbm %s2078_s15, 256  ;;  %p1719_p0 = pneg %p2082_p11 }
  0x76   : > { %p1718_p8 = scmp.ne.s32.totalorder %s2078_s15, %s1717_s17  ;;  %s1722_s11 = scalar_lea.hbm %s2283_s0, 512 }
  0x77   : > { %p1723_p7 = scmp.lt.u32.totalorder %s2078_s15, %s2283_s0  ;;  %p1724_p10 = scmp.lt.u32.totalorder %s1722_s11, %s1717_s17 }
  0x78   : > { %p1720_p3 = pnand %p1719_p0, %p1718_p8  ;;  %p1726_p9 = scmp.lt.u32.totalorder %s1717_s17, %s2078_s15 }
  0x79   : > { %p1725_p13 = por %p1724_p10, %p1723_p7 }
  0x7a   : > { %p1721_p5 = pneg %p1720_p3 }
  0x7b   : > { %p1727_p12 = por %p1726_p9, %p1725_p13 }
  0x7d   : > { %p1728_p2 = pnand %p1727_p12, %p1721_p5 }
  0x7f   : > { %1731 = shalt.err (!%p1728_p2)
}
  0x80   : > { %s1732_s10 = scalar_lea.vmem %s2080_s16, 256  ;;  %s1861_s14 = smov [#allocation2]  }
  0x81   : > { %p1733_p1 = scmp.ne.s32.totalorder %s2080_s16, %s1732_s10  ;;  %s1737_s12 = sshll.u32 %s1861_s14, 4  ;;  %s1738_s12 = int_to_ptr.vmem [resolvable:$false] %s1737_s12 }
  0x82   : > { %s1739_s7 = scalar_lea.vmem %s1738_s12, 512  ;;  %p1740_p3 = scmp.lt.s32.totalorder %s2080_s16, %s1738_s12 }
  0x83   : > { %p1735_p6 = pnand %p1733_p1, %p1719_p0  ;;  %p1741_p7 = scmp.lt.s32.totalorder %s1739_s7, %s1732_s10 }
  0x85   : > { %p1736_p8 = pneg %p1735_p6  ;;  %p1742_p10 = por %p1741_p7, %p1740_p3 }
  0x87   : > { %p1743_p13 = pnand %p1742_p10, %p1736_p8 }
  0x89   : > { %1746 = shalt.err (!%p1743_p13)
}
  0x8a   : > { %s1862_s17 = smov 128   ;;  %s1863_s26 = smov 8  }
  0x8b   : > { %1538 = dma.hbm_to_vmem [thread:$0]  (!%p2082_p11), %s2078_s15, 256, %s2080_s16, %s2086_s9, %s1862_s17, %s1862_s17, %s1863_s26  }
  0x8c   : > { %p2301_p0 = scmp.ne.s32.totalorder %s2295_s29, 0 }
  0x8d   : > { %s2117_s11 = sand.u32 (!%p2301_p0), 1, %s1845_s22   ;;  %p2302_p5 = scmp.ne.s32.totalorder (!%p2301_p0), %s2293_s27, 0 }
  0x8e   : > { %277 = sbr.rel (%p2301_p0) target bundleno = 1129 (0x469), region = 40  ;;  %s1382_s20 = sshll.u32 (!%p2301_p0), %s2117_s11, 4 }
  0x8f   : > { %s280_s13 = scalar_lea.sflag (!%p2301_p0), [#allocation3], %s2117_s11  ;;  %s283_s10 = scalar_lea.vmem (!%p2301_p0), [#allocation2], %s1382_s20 }
  0x95   : > { %1820 = dma.done.wait (%p2302_p5), %s280_s13, 256  }
  0x96   : > { %1822 = vsyncadd (%p2302_p5), %s280_s13, 4294967040  ;;  %p2303_p9 = scmp.eq.s32.totalorder %s1930_s25, 0 }
  0x98   : > { %1824 = dma.done.wait (%p2303_p9), [#allocation6], 128   ;;  %p2304_p11 = pmov %p2303_p9 }
  0x99   : > { %p2305_p12 = pmov %p2303_p9 }
  0x9a   : > { %1826 = vsyncadd (%p2304_p11), [#allocation6], 4294967168 }
  0x9b   : > { %1828 = dma.done.wait (%p2305_p12), [#allocation9], 640   ;;  %p2306_p2 = pmov %p2303_p9 }
  0x9c   : > { %v1864_v0 = vmov 0.0|0.0   ;;  %vm1865_vm0 = vmmov 0   ;;  %v1866_v1 = vmov 0.0   ;;  %v1867_v2 = vmov 0   ;;  %v334_v3 = vld [vmem:[%s283_s10] sm:$0xff]  ;;  %v335_v4 = vld [vmem:[%s283_s10 + $0x8] sm:$0xff] }
  0x9d   : > { %1830 = vsyncadd (%p2306_p2), [#allocation9], 4294966656  ;;  %1488 = vmatprep.subr.bf16.mxu0 %v1864_v0  ;;  %1440 = vmatprep.mubr.msk.f32.mxu0 %vm1865_vm0, %v1866_v1  ;;  %v1489_v5 = vpack.c.bf16 %v335_v4, %v334_v3  ;;  %v410_v6 = vld [vmem:[#allocation7] sm:$0xf]  ;;  %v333_v7 = vld [vmem:[#allocation5] sm:$0xf]  ;;  %v427_v28 = vlaneseq }
  0x9e   : > { %1604 = vset.pattern.permute.xlu0 %v1867_v2  ;;  %1453 = vmatprep.subr.mxu1 %v1866_v1  ;;  %vm336_vm1 = vcmask 130048   ;;  %v417_v8 = vld [vmem:[#allocation8] sm:$0xf]  ;;  %s1387_s27 = sshll.u32 %s2117_s11, 2  ;;  %vm476_vm2 = vcmask 1043456   ;;  %vm425_vm3 = vcmask 519168  }
  0x9f   : > { %1455 = vmatprep.mubr.msk.f32.mxu1 %vm1865_vm0, %v1866_v1  ;;  %413 = vperm.xlu0 %1604, %v410_v6   ;;  %s1868_s29 = smov 64   ;;  %s2145_s15 = scalar_lea.vmem [#allocation11], %s1387_s27  ;;  %v471_v16 = vld [vmem:[#allocation10 + $0x10] sm:$0xf]  ;;  %vm472_vm4 = vcmask 31744   ;;  %vm443_vm5 = vcmask 1048064  }
  0xa0   : > { %1490 = vmatpush3.bf16.msra.mxu0 %v1489_v5  ;;  %v551_v17 = vld [vmem:[#allocation10 + $0x14] sm:$0xf]  ;;  %s1869_s16 = smov 127   ;;  %s1870_s18 = smov 120   ;;  %v428_v29 = vand.u32 127, %v427_v28 }
  0xa1   : > { %1443 = vmatprep.subr.mxu0 %v1866_v1  ;;  %s1871_s9 = smov 119   ;;  %v553_v34 = vld [vmem:[#allocation10 + $0xc] sm:$0xf]  ;;  %v859_v37 = vld [vmem:[#allocation10 + $0x8] sm:$0xf]  ;;  %s1410_s14 = sshll.u32 %s1930_s25, 6 }
  0xa2   : > { %v434_v30 = vand.u32 7, %v428_v29  ;;  %vm429_vm7 = vcmp.lt.s32.totalorder %v428_v29, 56  ;;  %v706_v38 = vld [vmem:[#allocation10 + $0x4] sm:$0xf]  ;;  %v857_v39 = vld [vmem:[#allocation10 + $0x20] sm:$0xf]  ;;  %s2211_s17 = scalar_lea.hbm %s2288_s5, %s1410_s14 }
  0xa3   : > { %1441 = vmatmul.mubr.msk.f32.vlgmr.msra.gmra.mrb[0].mxu0 %vm336_vm1, %v333_v7  ;;  %420 = vperm.xlu0 %1604, %v417_v8   ;;  %v704_v40 = vld [vmem:[#allocation10 + $0x1c] sm:$0xf]  ;;  %v1007_v42 = vld [vmem:[#allocation10 + $0x18] sm:$0xf]  ;;  %v1082_v44 = vld [vmem:[#allocation10] sm:$0xf] }
  0xa4   : > { %1445 = vmatprep.mubr.msk.f32.mxu0 %vm1865_vm0, %v1866_v1  ;;  %vm2159_vm6 = vcmp.lt.s32.totalorder %v434_v30, 7  ;;  %s1218_s26 = sshll.u32 %s2145_s15, 4  ;;  %s1200_s20 = scalar_lea.sflag [#allocation4], %s2117_s11  ;;  %s1219_s26 = int_to_ptr.vmem [resolvable:$true] %s1218_s26 }
  0xa5   : > { %vm463_vm8 = vmand %vm429_vm7, %vm2159_vm6  ;;  %s1747_s13 = scalar_lea.vmem %s1219_s26, 64  ;;  %s1872_s10 = smov [#allocation11]  }
  0xa6   : > { %p1748_p1 = scmp.ne.s32.totalorder %s1219_s26, %s1747_s13 }
  0xa8   : > { %p1749_p6 = pnand %p1748_p1, %p2068_p4 }
  0xaa   : > { %p1750_p8 = pneg %p1749_p6 }
 0x11e   : > { %v414_v9 = vpop.permute.xlu0 %413 }
 0x122   : > { %v421_v13 = vpop.permute.xlu0 %420 }
 0x176   : > { %v406_v10 = vpop.f32.mrb[0].mxu0 }
 0x177   : > { %v416_v11 = vmul.f32 %v414_v9, %v406_v10  ;;  %v1442_v12 = vpop.f32.mrb[1].mxu0 }
 0x179   : > { %v423_v14 = vadd.f32 %v421_v13, %v416_v11 }
 0x17b   : > { %v424_v15 = vmax.f32 %v423_v14, 0.0 }
 0x17d   : > { %444 = vrot.lane.b32.xlu1 %v424_v15, %s1868_s29  ;;  %1444 = vmatpush3.msk.msra.mxu0 %vm476_vm2, %v424_v15  ;;  %426 = vst.msk [vmem:[%s2145_s15] sm:$0xf] %vm425_vm3, %v424_v15 }
 0x17e   : > { %1454 = vmatpush3.msk.msra.mxu1 %vm476_vm2, %v424_v15  ;;  %1448 = vmatprep.subr.mxu0 %v1866_v1 }
 0x17f   : > { %1468 = vmatprep.subr.mxu1 %v1866_v1  ;;  %1446 = vmatmul.mubr.msk.f32.vlgmr.msra.gmra.mrb[2].mxu0 %vm472_vm4, %v471_v16 }
 0x180   : > { %1456 = vmatmul.mubr.msk.f32.vlgmr.msra.gmra.mrb[0].mxu1 %vm472_vm4, %v551_v17  ;;  %1450 = vmatprep.mubr.msk.f32.mxu0 %vm1865_vm0, %v1866_v1 }
 0x181   : > { %1470 = vmatprep.mubr.msk.f32.mxu1 %vm1865_vm0, %v1866_v1 }
 0x1ef   : > { %v445_v18 = vpop.permute.xlu1 %444 }
 0x1f0   : > { %v446_v19 = vsel %vm443_vm5, %v445_v18, %v424_v15 }
 0x1f1   : > { %447 = vrot.lane.b32.xlu1 %v446_v19, %s1868_s29  ;;  %s1751_s29 = sshll.u32 %s1872_s10, 4  ;;  %s1752_s29 = int_to_ptr.vmem [resolvable:$false] %s1751_s29 }
 0x1f2   : > { %p1754_p3 = scmp.lt.s32.totalorder %s1219_s26, %s1752_s29 }
 0x252   : > { %v546_v22 = vpop.f32.mrb[2].mxu0 }
 0x253   : > { %v699_v23 = vpop.f32.mrb[0].mxu1  ;;  %v1163_v24 = vmul.f32 %v546_v22, %v546_v22  ;;  %v1447_v25 = vpop.f32.mrb[3].mxu0  ;;  %v1160_v45 = vsel %vm425_vm3, %v546_v22, 0.0 }
 0x254   : > { %v1457_v26 = vpop.f32.mrb[1].mxu1 }
 0x255   : > { %v1164_v27 = vsel %vm425_vm3, %v1163_v24, 0.0 }
 0x263   : > { %v448_v20 = vpop.permute.xlu1 %447 }
 0x264   : > { %v449_v21 = vsel %vm443_vm5, %v448_v20, %v424_v15 }
 0x265   : > { %459 = vrot.lane.b32.xlu1 %v449_v21, %s1869_s16  ;;  %453 = vrot.lane.b32.xlu0 %v449_v21, %s1870_s18  ;;  %s1753_s16 = scalar_lea.vmem %s1752_s29, 128 }
 0x266   : > { %p1755_p7 = scmp.lt.s32.totalorder %s1753_s16, %s1747_s13 }
 0x268   : > { %p1756_p10 = por %p1755_p7, %p1754_p3 }
 0x269   : > { %466 = vrot.lane.b32.xlu0 %v449_v21, %s1871_s9 }
 0x26a   : > { %p1757_p13 = pnand %p1756_p10, %p1750_p8 }
 0x288   : > { %1165 = vadd.xlane.f32.xlu0 %v1164_v27 }
 0x289   : > { %1161 = vadd.xlane.f32.xlu1 %v1160_v45 }
 0x2d7   : > { %v460_v32 = vpop.permute.xlu1 %459  ;;  %v454_v33 = vpop.permute.xlu0 %453 }
 0x2d8   : > { %v462_v35 = vsel %vm2159_vm6, %v460_v32, 0.0  ;;  %v456_v36 = vsel %vm429_vm7, %v454_v33, 0.0 }
 0x2d9   : > { %1449 = vmatpush3.msk.msra.mxu0 %vm476_vm2, %v462_v35  ;;  %1469 = vmatpush3.msk.msra.mxu1 %vm476_vm2, %v456_v36 }
 0x2da   : > { %1451 = vmatmul.mubr.msk.f32.vlgmr.msra.gmra.mrb[4].mxu0 %vm472_vm4, %v553_v34  ;;  %1458 = vmatprep.subr.mxu0 %v1866_v1 }
 0x2db   : > { %1471 = vmatmul.mubr.msk.f32.vlgmr.msra.gmra.mrb[2].mxu1 %vm472_vm4, %v859_v37  ;;  %1473 = vmatprep.subr.mxu1 %v1866_v1  ;;  %v467_v41 = vpop.permute.xlu0 %466 }
 0x2dc   : > { %1459 = vmatpush3.msk.msra.mxu0 %vm476_vm2, %v456_v36  ;;  %1474 = vmatpush3.msk.msra.mxu1 %vm476_vm2, %v424_v15  ;;  %v469_v43 = vsel %vm463_vm8, %v467_v41, 0.0 }
 0x2dd   : > { %1460 = vmatprep.mubr.msk.f32.mxu0 %vm1865_vm0, %v1866_v1  ;;  %1463 = vmatprep.subr.mxu0 %v1866_v1 }
 0x2de   : > { %1461 = vmatmul.mubr.msk.f32.vlgmr.msra.gmra.mrb[6].mxu0 %vm472_vm4, %v706_v38  ;;  %1475 = vmatprep.mubr.msk.f32.mxu1 %vm1865_vm0, %v1866_v1 }
 0x2df   : > { %1464 = vmatpush3.msk.msra.mxu0 %vm476_vm2, %v424_v15  ;;  %1478 = vmatprep.subr.mxu1 %v1866_v1 }
 0x2e0   : > { %1465 = vmatprep.mubr.msk.f32.mxu0 %vm1865_vm0, %v1866_v1 }
 0x2e3   : > { %1476 = vmatmul.mubr.msk.f32.vlgmr.msra.gmra.mrb[2].mxu1 %vm472_vm4, %v857_v39 }
 0x2e4   : > { %1479 = vmatpush3.msk.msra.mxu1 %vm476_vm2, %v462_v35  ;;  %1480 = vmatprep.mubr.msk.f32.mxu1 %vm1865_vm0, %v1866_v1 }
 0x2e5   : > { %1483 = vmatprep.subr.mxu1 %v1866_v1 }
 0x2e6   : > { %1466 = vmatmul.mubr.msk.f32.vlgmr.msra.gmra.mrb[6].mxu0 %vm472_vm4, %v704_v40 }
 0x2eb   : > { %1481 = vmatmul.mubr.msk.f32.vlgmr.msra.gmra.mrb[2].mxu1 %vm472_vm4, %v1007_v42 }
 0x2ec   : > { %1484 = vmatpush3.msk.msra.mxu1 %vm476_vm2, %v469_v43  ;;  %1485 = vmatprep.mubr.msk.f32.mxu1 %vm1865_vm0, %v1866_v1 }
 0x2f3   : > { %1486 = vmatmul.mubr.msk.f32.vlgmr.msra.gmra.mrb[2].mxu1 %vm472_vm4, %v1082_v44 }
 0x3ad   : > { %v626_v46 = vpop.f32.mrb[4].mxu0 }
 0x3ae   : > { %v700_v47 = vadd.f32 %v699_v23, %v626_v46  ;;  %v1452_v48 = vpop.f32.mrb[5].mxu0 }
 0x3b0   : > { %v1170_v49 = vsel %vm425_vm3, %v700_v47, 0.0  ;;  %v1173_v50 = vmul.f32 %v700_v47, %v700_v47 }
 0x3b1   : > { %1171 = vadd.xlane.f32.xlu0 %v1170_v49 }
 0x3b2   : > { %v1174_v51 = vsel %vm425_vm3, %v1173_v50, 0.0 }
 0x3b3   : > { %1175 = vadd.xlane.f32.xlu1 %v1174_v51 }
 0x3b9   : > { %v852_v52 = vpop.f32.mrb[6].mxu0 }
 0x3ba   : > { %v1182_v53 = vmul.f32 %v852_v52, %v852_v52  ;;  %v1467_v54 = vpop.f32.mrb[7].mxu0  ;;  %v1179_v55 = vsel %vm425_vm3, %v852_v52, 0.0 }
 0x3bb   : > { %1180 = vadd.xlane.f32.xlu0 %v1179_v55 }
 0x3bc   : > { %v1183_v56 = vsel %vm425_vm3, %v1182_v53, 0.0 }
 0x3bd   : > { %1184 = vadd.xlane.f32.xlu1 %v1183_v56 }
 0x3c6   : > { %v1155_v57 = vpop.f32.mrb[2].mxu1 }
 0x3c7   : > { %v1191_v58 = vmul.f32 %v1155_v57, %v1155_v57  ;;  %v1487_v59 = vpop.f32.mrb[3].mxu1  ;;  %v1188_v60 = vsel %vm425_vm3, %v1155_v57, 0.0 }
 0x3c8   : > { %1189 = vadd.xlane.f32.xlu0 %v1188_v60 }
 0x3c9   : > { %v1192_v61 = vsel %vm425_vm3, %v1191_v58, 0.0 }
 0x3ca   : > { %1193 = vadd.xlane.f32.xlu1 %v1192_v61 }
 0x3cb   : > { %1760 = shalt.err (!%p1757_p13)
}
 0x3cc   : > { %s1761_s15 = scalar_lea.hbm %s2211_s17, 64  ;;  %s1765_s12 = scalar_lea.hbm %s2288_s5, 128 }
 0x3cd   : > { %p1762_p0 = scmp.ne.s32.totalorder %s2211_s17, %s1761_s15  ;;  %p1766_p11 = scmp.lt.u32.totalorder %s2211_s17, %s2288_s5 }
 0x3ce   : > { %p1767_p12 = scmp.lt.u32.totalorder %s1765_s12, %s1761_s15  ;;  %p1769_p1 = scmp.lt.u32.totalorder %s1761_s15, %s2211_s17 }
 0x3cf   : > { %p1763_p5 = pnand %p1762_p0, %p2068_p4 }
 0x3d0   : > { %p1768_p2 = por %p1767_p12, %p1766_p11 }
 0x3d1   : > { %p1764_p9 = pneg %p1763_p5 }
 0x3d2   : > { %p1770_p6 = por %p1769_p1, %p1768_p2 }
 0x3d4   : > { %p1771_p8 = pnand %p1770_p6, %p1764_p9 }
 0x3d6   : > { %1774 = shalt.err (!%p1771_p8)
}
 0x3d7   : > { %1518 = dma.vmem_to_hbm [thread:$0]  (%p2068_p4), %s1219_s26, 64, %s2211_s17, %s1200_s20   ;;  %v1162_v62 = vpop.xlane.xlu1 %1161  ;;  %v1166_v63 = vpop.xlane.xlu0 %1165  ;;  %vm1167_vm9 = vcmask 7168   ;;  %vm1197_vm10 = vcmask 11264  }
 0x3d8   : > { %v1168_v3 = vsel %vm1167_vm9, %v1162_v62, %v1166_v63  ;;  %s332_s13 = scalar_lea.vmem [#allocation12], %s1387_s27  ;;  %s2239_s20 = scalar_lea.hbm %s2289_s6, %s1410_s14 }
 0x3d9   : > { %s1231_s29 = sshll.u32 %s332_s13, 4  ;;  %s1205_s27 = scalar_lea.sflag [#allocation13], %s2117_s11  ;;  %s2241_s29 = int_to_ptr.vmem [resolvable:$true] %s1231_s29 }
 0x3da   : > { %s1775_s16 = scalar_lea.vmem %s2241_s29, 64  ;;  %s1873_s15 = smov [#allocation12]  }
 0x3db   : > { %p1776_p3 = scmp.ne.s32.totalorder %s2241_s29, %s1775_s16  ;;  %s1779_s18 = sshll.u32 %s1873_s15, 4  ;;  %s1780_s18 = int_to_ptr.vmem [resolvable:$false] %s1779_s18 }
 0x3dc   : > { %s1781_s25 = scalar_lea.vmem %s1780_s18, 128  ;;  %p1782_p13 = scmp.lt.s32.totalorder %s2241_s29, %s1780_s18 }
 0x3dd   : > { %p1777_p7 = pnand %p1776_p3, %p2068_p4  ;;  %p1783_p0 = scmp.lt.s32.totalorder %s1781_s25, %s1775_s16 }
 0x3df   : > { %p1778_p10 = pneg %p1777_p7  ;;  %p1784_p5 = por %p1783_p0, %p1782_p13 }
 0x3e1   : > { %p1785_p9 = pnand %p1784_p5, %p1778_p10 }
 0x43e   : > { %v1172_v1 = vpop.xlane.xlu0 %1171 }
 0x440   : > { %v1176_v0 = vpop.xlane.xlu1 %1175 }
 0x441   : > { %v1177_v4 = vsel %vm1167_vm9, %v1172_v1, %v1176_v0 }
 0x442   : > { %v1178_v7 = vadd.f32 %v1177_v4, %v1168_v3 }
 0x448   : > { %v1181_v5 = vpop.xlane.xlu0 %1180 }
 0x44a   : > { %v1185_v2 = vpop.xlane.xlu1 %1184 }
 0x44b   : > { %v1186_v6 = vsel %vm1167_vm9, %v1181_v5, %v1185_v2 }
 0x44c   : > { %v1187_v8 = vadd.f32 %v1186_v6, %v1178_v7 }
 0x455   : > { %v1190_v9 = vpop.xlane.xlu0 %1189 }
 0x457   : > { %v1194_v10 = vpop.xlane.xlu1 %1193 }
 0x458   : > { %v1195_v11 = vsel %vm1167_vm9, %v1190_v9, %v1194_v10 }
 0x459   : > { %v1196_v12 = vadd.f32 %v1195_v11, %v1187_v8 }
 0x45b   : > { %1198 = vst.msk [vmem:[%s332_s13] sm:$0xf] %vm1197_vm10, %v1196_v12 }
 0x45c   : > { %1788 = shalt.err (!%p1785_p9)
}
 0x45d   : > { %s1789_s11 = scalar_lea.hbm %s2239_s20, 64  ;;  %s1793_s12 = scalar_lea.hbm %s2289_s6, 128 }
 0x45e   : > { %p1790_p11 = scmp.ne.s32.totalorder %s2239_s20, %s1789_s11  ;;  %p1794_p1 = scmp.lt.u32.totalorder %s2239_s20, %s2289_s6 }
 0x45f   : > { %p1795_p6 = scmp.lt.u32.totalorder %s1793_s12, %s1789_s11  ;;  %p1797_p3 = scmp.lt.u32.totalorder %s1789_s11, %s2239_s20 }
 0x460   : > { %p1791_p12 = pnand %p1790_p11, %p2068_p4 }
 0x461   : > { %p1796_p8 = por %p1795_p6, %p1794_p1 }
 0x462   : > { %p1792_p2 = pneg %p1791_p12 }
 0x463   : > { %p1798_p7 = por %p1797_p3, %p1796_p8 }
 0x465   : > { %p1799_p10 = pnand %p1798_p7, %p1792_p2 }
 0x467   : > { %1802 = shalt.err (!%p1799_p10)
}
 0x468   : > { %1519 = dma.vmem_to_hbm [thread:$0]  (%p2068_p4), %s2241_s29, 64, %s2239_s20, %s1205_s27  }
 0x469 PF: > { %s1243_s13 = sand.u32 1, %s1841_s21   ;;  %p2309_p13 = scmp.ne.s32.totalorder %s2294_s28, 0 }
 0x46a   : > { %p2310_p0 = scmp.ge.s32.totalorder %s1853_s24, 2  ;;  %s1244_s17 = scalar_lea.sflag [#allocation4], %s1243_s13 }
 0x46c   : > { %p1540_p5 = pnand %p2310_p0, %p2309_p13 }
 0x46e   : > { %1832 = dma.done.wait (!%p1540_p5), %s1244_s17, 64  }
 0x46f   : > { %1834 = vsyncadd (!%p1540_p5), %s1244_s17, 4294967232  ;;  %s1253_s26 = scalar_lea.sflag [#allocation13], %s1243_s13 }
 0x470   : > { %1836 = dma.done.wait (!%p1540_p5), %s1253_s26, 64  }
 0x471   : > { %1838 = vsyncadd (!%p1540_p5), %s1253_s26, 4294967232  ;;  %p25_p4 = scmp.ge.s32.totalorder %s2055_s19, 4   ;;  %s2311_s21 = smov %s1845_s22 }
 0x472   : > { %s2312_s22 = smov %s1849_s23  ;;  %s2313_s23 = smov %s2064_s30 }
 0x473   : > { %s2314_s24 = smov %s2055_s19  ;;  %27 = sbr.rel (!%p25_p4) target bundleno = 9 (0x9), region = 126 }
 0x47a   :  { %1258 = vsyncpa [#allocation3], 1 }
 0x47b   :  { %1260 = vsyncpa [#allocation3 + $0x1], 1 }
 0x47c   :  { %1261 = vsyncpa [#allocation6], 1 }
 0x47d   :  { %1262 = vsyncpa [#allocation9], 1 }
 0x47e   :  { %1263 = vsyncpa [#allocation4], 1 }
 0x47f   :  { %1265 = vsyncpa [#allocation4 + $0x1], 1 }
 0x480   :  { %1266 = vsyncpa [#allocation13], 1 }
 0x481   :  { %1268 = vsyncpa [#allocation13 + $0x1], 1 }

// kernel: decoder_block.6
= control target key start
LH: loop header
LB: loop body
LE: loop exit
PB: predicated region body
PF: predicated region fallthrough
CT: control target
= control target key end

     0   :  { %10 = vsyncpa [#allocation3], 0  ;;  %s2391_s0 = inlined_call_operand.hbm [shape: f32[2,4,64], index: 0, kind: input, shape index: {}]   ;;  %s2392_s1 = inlined_call_operand.hbm [shape: f32[3,3,4,4], index: 1, kind: input, shape index: {}]   ;;  %s2393_s2 = inlined_call_operand.hbm [shape: f32[4,1], index: 2, kind: input, shape index: {}]   ;;  %s2394_s3 = inlined_call_operand.hbm [shape: f32[4,1], index: 3, kind: input, shape index: {}]   ;;  %s2395_s4 = inlined_call_operand.hbm [shape: f32[8,4], index: 4, kind: input, shape index: {}]   ;;  %s2396_s5 = inlined_call_operand.hbm [shape: f32[2,8,2], index: 5, kind: output, shape index: {}]  }
   0x1   :  { %12 = vsyncpa [#allocation3 + $0x1], 0 }
   0x2   :  { %13 = vsyncpa [#allocation6], 0 }
   0x3   :  { %14 = vsyncpa [#allocation9], 0 }
   0x4   :  { %15 = vsyncpa [#allocation4], 0 }
   0x5   :  { %17 = vsyncpa [#allocation4 + $0x1], 0  ;;  %s2016_s18 = smov 0   ;;  %s2018_s19 = smov 0  }
   0x6   :  { %s2020_s20 = smov 0   ;;  %s2022_s21 = smov 0  }
   0x7 LB: > { %s1971_s22 = smov [#allocation5]   ;;  %s2037_s24 = sadd.s32 4294967295, %s1969_s21   ;;  %s1969_s21 = sphi %s2022_s21, %s2422_s21   ;;  %s1965_s20 = sphi %s2020_s20, %s2421_s20   ;;  %s1961_s19 = sphi %s2018_s19, %s2420_s19   ;;  %s1957_s18 = sphi %s2016_s18, %s2419_s18  }
   0x8   : > { %s176_s23 = sshll.u32 %s1971_s22, 4  ;;  %p1509_p0 = scmp.ge.s32.totalorder %s1969_s21, 1  ;;  %s2042_s23 = int_to_ptr.vmem [resolvable:$true] %s176_s23 }
   0x9   : > { %p2397_p1 = scmp.eq.s32.totalorder %s2037_s24, 0  ;;  %p164_p2 = scmp.lt.s32.totalorder %s1969_s21, 3 }
   0xa   : > { %s1972_s26 = smov [#allocation8]   ;;  %s1973_s29 = smov [#allocation7]  }
   0xb   : > { %p2044_p3 = pnand %p1509_p0, %p164_p2  ;;  %s201_s27 = sshll.u32 %s1972_s26, 4  ;;  %s2057_s27 = int_to_ptr.vmem [resolvable:$true] %s201_s27 }
   0xc   : > { %s190_s30 = sshll.u32 %s1973_s29, 4  ;;  %s1753_s8 = scalar_lea.hbm %s2392_s1, 576  ;;  %s2059_s30 = int_to_ptr.vmem [resolvable:$true] %s190_s30 }
   0xd   : > { %s2400_s25 = scalar_select %p2044_p3, 1, 0 }
   0xe   : > { %p1675_p5 = pneg %p2044_p3  ;;  %p1754_p7 = scmp.ne.s32.totalorder %s2392_s1, %s1753_s8 }
   0xf   : > { %p1760_p11 = scmp.lt.u32.totalorder %s1753_s8, %s2392_s1 }
  0x10   : > { %p2053_p6 = pnand %p1675_p5, %p2397_p1 }
  0x12   : > { %p2069_p8 = pneg %p2053_p6 }
  0x14   : > { %p1756_p9 = pnand %p2069_p8, %p1754_p7 }
  0x16   : > { %p1757_p10 = pneg %p1756_p9 }
  0x18   : > { %p1762_p12 = pnand %p1760_p11, %p1757_p10 }
  0x1a   : > { %1765 = shalt.err (!%p1762_p12)
}
  0x1b   : > { %s1766_s14 = scalar_lea.vmem %s2042_s23, 576  ;;  %p1774_p5 = scmp.lt.s32.totalorder %s2042_s23, %s2042_s23 }
  0x1c   : > { %p1767_p13 = scmp.ne.s32.totalorder %s2042_s23, %s1766_s14  ;;  %p1775_p4 = scmp.lt.s32.totalorder %s1766_s14, %s1766_s14 }
  0x1e   : > { %p1769_p0 = pnand %p1767_p13, %p2069_p8  ;;  %p1776_p7 = por %p1775_p4, %p1774_p5 }
  0x20   : > { %p1770_p2 = pneg %p1769_p0 }
  0x22   : > { %p1777_p9 = pnand %p1776_p7, %p1770_p2 }
  0x24   : > { %1780 = shalt.err (!%p1777_p9)
}
  0x25   : > { %s1974_s15 = smov 64   ;;  %s1975_s16 = smov 4  }
  0x26   : > { %1678 = dma.hbm_to_vmem [thread:$0]  (!%p2053_p6), %s2392_s1, 576, %s2042_s23, [#allocation6], %s1974_s15, %s1974_s15, %s1975_s16  }
  0x27   : > { %s1781_s6 = scalar_lea.hbm %s2394_s3, 64 }
  0x28   : > { %p1782_p4 = scmp.ne.s32.totalorder %s2394_s3, %s1781_s6  ;;  %p1788_p12 = scmp.lt.u32.totalorder %s1781_s6, %s2394_s3 }
  0x2a   : > { %p1784_p10 = pnand %p1782_p4, %p2069_p8 }
  0x2c   : > { %p1785_p11 = pneg %p1784_p10 }
  0x2e   : > { %p1790_p13 = pnand %p1788_p12, %p1785_p11 }
  0x30   : > { %1793 = shalt.err (!%p1790_p13)
}
  0x31   : > { %s1794_s23 = scalar_lea.vmem %s2057_s27, 64  ;;  %p1802_p7 = scmp.lt.s32.totalorder %s2057_s27, %s2057_s27 }
  0x32   : > { %p1795_p0 = scmp.ne.s32.totalorder %s2057_s27, %s1794_s23  ;;  %p1803_p9 = scmp.lt.s32.totalorder %s1794_s23, %s1794_s23 }
  0x34   : > { %p1797_p2 = pnand %p1795_p0, %p2069_p8  ;;  %p1804_p4 = por %p1803_p9, %p1802_p7 }
  0x36   : > { %p1798_p5 = pneg %p1797_p2 }
  0x38   : > { %p1805_p10 = pnand %p1804_p4, %p1798_p5 }
  0x3a   : > { %1808 = shalt.err (!%p1805_p10)
}
  0x3b   : > { %1684 = dma.hbm_to_vmem [thread:$0]  (!%p2053_p6), %s2394_s3, 64, %s2057_s27, [#allocation9]  }
  0x3c   : > { %s1809_s16 = scalar_lea.hbm %s2393_s2, 64 }
  0x3d   : > { %p1810_p11 = scmp.ne.s32.totalorder %s2393_s2, %s1809_s16  ;;  %p1816_p0 = scmp.lt.u32.totalorder %s1809_s16, %s2393_s2 }
  0x3f   : > { %p1812_p12 = pnand %p1810_p11, %p2069_p8 }
  0x41   : > { %p1813_p13 = pneg %p1812_p12 }
  0x43   : > { %p1818_p2 = pnand %p1816_p0, %p1813_p13 }
  0x45   : > { %1821 = shalt.err (!%p1818_p2)
}
  0x46   : > { %s1822_s27 = scalar_lea.vmem %s2059_s30, 64  ;;  %p1830_p4 = scmp.lt.s32.totalorder %s2059_s30, %s2059_s30 }
  0x47   : > { %p1823_p5 = scmp.ne.s32.totalorder %s2059_s30, %s1822_s27  ;;  %p1831_p10 = scmp.lt.s32.totalorder %s1822_s27, %s1822_s27 }
  0x49   : > { %p1825_p7 = pnand %p1823_p5, %p2069_p8  ;;  %p1832_p11 = por %p1831_p10, %p1830_p4 }
  0x4b   : > { %p1826_p9 = pneg %p1825_p7 }
  0x4d   : > { %p1833_p12 = pnand %p1832_p11, %p1826_p9 }
  0x4f   : > { %1836 = shalt.err (!%p1833_p12)
}
  0x50   : > { %1681 = dma.hbm_to_vmem [thread:$0]  (!%p2053_p6), %s2393_s2, 64, %s2059_s30, [#allocation6]  }
  0x51   : > { %s1976_s8 = smov [#allocation10]   ;;  %s1837_s12 = scalar_lea.hbm %s2395_s4, 128 }
  0x52   : > { %s212_s9 = sshll.u32 %s1976_s8, 4  ;;  %p1838_p13 = scmp.ne.s32.totalorder %s2395_s4, %s1837_s12  ;;  %s213_s9 = int_to_ptr.vmem [resolvable:$true] %s212_s9 }
  0x53   : > { %p1844_p5 = scmp.lt.u32.totalorder %s1837_s12, %s2395_s4 }
  0x54   : > { %p1840_p0 = pnand %p1838_p13, %p2069_p8 }
  0x56   : > { %p1841_p2 = pneg %p1840_p0 }
  0x58   : > { %p1846_p7 = pnand %p1844_p5, %p1841_p2 }
  0x5a   : > { %1849 = shalt.err (!%p1846_p7)
}
  0x5b   : > { %s1850_s30 = scalar_lea.vmem %s213_s9, 128  ;;  %p1858_p11 = scmp.lt.s32.totalorder %s213_s9, %s213_s9 }
  0x5c   : > { %p1851_p9 = scmp.ne.s32.totalorder %s213_s9, %s1850_s30  ;;  %p1859_p12 = scmp.lt.s32.totalorder %s1850_s30, %s1850_s30 }
  0x5e   : > { %p1853_p4 = pnand %p1851_p9, %p2069_p8  ;;  %p1860_p1 = por %p1859_p12, %p1858_p11 }
  0x60   : > { %p1854_p10 = pneg %p1853_p4 }
  0x62   : > { %p1861_p3 = pnand %p1860_p1, %p1854_p10 }
  0x64   : > { %1864 = shalt.err (!%p1861_p3)
}
  0x65   : > { %1687 = dma.hbm_to_vmem [thread:$0]  (!%p2053_p6), %s2395_s4, 128, %s213_s9, [#allocation9]  }
  0x66   : > { %s1508_s11 = sadd.s32 4294967294, %s1969_s21   ;;  %s2156_s28 = sadd.s32 1, %s1969_s21  }
  0x67   : > { %s27_s26 = ssub.s32 %s1969_s21, %s2156_s28  ;;  %s30_s29 = sadd.s32 1, %s1965_s20 }
  0x68   : > { %p28_p1 = scmp.eq.s32.totalorder %s27_s26, 0  ;;  %p37_p3 = scmp.ne.s32.totalorder %s1965_s20, %s1961_s19 }
  0x69   : > { %p38_p8 = scmp.eq.s32.totalorder %s1969_s21, 0  ;;  %p43_p13 = scmp.ne.s32.totalorder %s1961_s19, %s1957_s18 }
  0x6a   : > { %s2167_s27 = scalar_select %p28_p1, %s1965_s20, %s30_s29  }
  0x6b   : > { %p2169_p0 = por %p38_p8, %p37_p3  ;;  %p2404_p2 = scmp.eq.s32.totalorder %s2037_s24, 0 }
  0x6c   : > { %p151_p5 = scmp.eq.s32.totalorder %s2037_s24, 1  ;;  %p157_p7 = scmp.eq.s32.totalorder %s1508_s11, 1 }
  0x6d   : > { %p2175_p6 = por %p2404_p2, %p43_p13  ;;  %p1700_p9 = scmp.lt.s32.totalorder %s1969_s21, 2 }
  0x6e   : > { %s223_s8 = sand.u32 1, %s1965_s20   ;;  %p2182_p4 = por %p151_p5, %p37_p3 }
  0x6f   : > { %p2186_p10 = por %p157_p7, %p43_p13  ;;  %s1515_s23 = sshll.u32 %s223_s8, 2 }
  0x70   : > { %s2406_s9 = scalar_select %p2182_p4, 1, 0 }
  0x71   : > { %s2407_s10 = scalar_select %p2186_p10, 1, 0 }
  0x72   : > { %s1516_s12 = sshll.u32 %s1969_s21, 6  ;;  %s227_s16 = scalar_lea.vmem [#allocation2], %s1515_s23 }
  0x73   : > { %s2194_s15 = scalar_lea.hbm %s2391_s0, %s1516_s12  ;;  %s234_s30 = sshll.u32 %s227_s16, 4  ;;  %s2196_s30 = int_to_ptr.vmem [resolvable:$true] %s234_s30 }
  0x74   : > { %p2200_p11 = pnand %p1700_p9, %p2169_p0  ;;  %s224_s22 = scalar_lea.sflag [#allocation3], %s223_s8 }
  0x75   : > { %s1865_s11 = scalar_lea.hbm %s2194_s15, 64  ;;  %s1870_s23 = scalar_lea.hbm %s2391_s0, 128 }
  0x76   : > { %p1866_p12 = scmp.ne.s32.totalorder %s2194_s15, %s1865_s11  ;;  %p1867_p1 = pneg %p2200_p11 }
  0x77   : > { %p1871_p13 = scmp.lt.u32.totalorder %s2194_s15, %s2391_s0  ;;  %p1872_p0 = scmp.lt.u32.totalorder %s1870_s23, %s1865_s11 }
  0x78   : > { %p1868_p3 = pnand %p1867_p1, %p1866_p12  ;;  %p1874_p5 = scmp.lt.u32.totalorder %s1865_s11, %s2194_s15 }
  0x79   : > { %p1873_p2 = por %p1872_p0, %p1871_p13 }
  0x7a   : > { %p1869_p8 = pneg %p1868_p3 }
  0x7b   : > { %p1875_p7 = por %p1874_p5, %p1873_p2 }
  0x7d   : > { %p1876_p9 = pnand %p1875_p7, %p1869_p8 }
  0x7f   : > { %1879 = shalt.err (!%p1876_p9)
}
  0x80   : > { %s1880_s8 = scalar_lea.vmem %s2196_s30, 64  ;;  %s1977_s13 = smov [#allocation2]  }
  0x81   : > { %p1881_p12 = scmp.ne.s32.totalorder %s2196_s30, %s1880_s8  ;;  %s1885_s14 = sshll.u32 %s1977_s13, 4  ;;  %s1886_s14 = int_to_ptr.vmem [resolvable:$false] %s1885_s14 }
  0x82   : > { %s1887_s16 = scalar_lea.vmem %s1886_s14, 128  ;;  %p1888_p4 = scmp.lt.s32.totalorder %s2196_s30, %s1886_s14 }
  0x83   : > { %p1883_p3 = pnand %p1881_p12, %p1867_p1  ;;  %p1889_p13 = scmp.lt.s32.totalorder %s1887_s16, %s1880_s8 }
  0x85   : > { %p1884_p10 = pneg %p1883_p3  ;;  %p1890_p0 = por %p1889_p13, %p1888_p4 }
  0x87   : > { %p1891_p2 = pnand %p1890_p0, %p1884_p10 }
  0x89   : > { %1894 = shalt.err (!%p1891_p2)
}
  0x8a   : > { %1691 = dma.hbm_to_vmem [thread:$0]  (!%p2200_p11), %s2194_s15, 64, %s2196_s30, %s224_s22  }
  0x8b   : > { %p2409_p8 = scmp.ne.s32.totalorder %s2400_s25, 0 }
  0x8c   : > { %s2232_s11 = sand.u32 (!%p2409_p8), 1, %s1961_s19  }
  0x8d   : > { %243 = sbr.rel (%p2409_p8) target bundleno = 1134 (0x46e), region = 40  ;;  %s1518_s26 = sshll.u32 (!%p2409_p8), %s2232_s11, 2 }
  0x8e   : > { %s246_s29 = scalar_lea.sflag (!%p2409_p8), [#allocation3], %s2232_s11  ;;  %s249_s23 = scalar_lea.vmem (!%p2409_p8), [#allocation2], %s1518_s26 }
  0x94   : > { %1940 = dma.done.wait (%p2175_p6), %s246_s29, 64  }
  0x95   : > { %1942 = vsyncadd (%p2175_p6), %s246_s29, 4294967232  ;;  %p2410_p4 = scmp.eq.s32.totalorder %s2037_s24, 0 }
  0x97   : > { %1944 = dma.done.wait (%p2410_p4), [#allocation6], 640   ;;  %p2411_p10 = pmov %p2410_p4 }
  0x98   : > { %p2412_p11 = pmov %p2410_p4 }
  0x99   : > { %1946 = vsyncadd (%p2411_p10), [#allocation6], 4294966656 }
  0x9a   : > { %1948 = dma.done.wait (%p2412_p11), [#allocation9], 192   ;;  %p2413_p1 = pmov %p2410_p4 }
  0x9b   : > { %v2248_v0 = vld [vmem:[%s249_s23] sm:$0xf]  ;;  %s1978_s25 = smov 64   ;;  %vm309_vm0 = vcmask 1048064   ;;  %v1979_v3 = vmov 0.0   ;;  %vm342_vm1 = vcmask 1043456   ;;  %v293_v10 = vlaneseq }
  0x9c   : > { %1950 = vsyncadd (%p2413_p1), [#allocation9], 4294967104  ;;  %310 = vrot.lane.b32.xlu0 %v2248_v0, %s1978_s25  ;;  %1585 = vmatprep.subr.mxu1 %v1979_v3  ;;  %vm1980_vm2 = vmmov 0   ;;  %vm338_vm3 = vcmask 31744   ;;  %v337_v4 = vld [vmem:[#allocation5 + $0x10] sm:$0xf] }
  0x9d   : > { %1580 = vmatprep.subr.mxu0 %v1979_v3  ;;  %1587 = vmatprep.mubr.msk.f32.mxu1 %vm1980_vm2, %v1979_v3  ;;  %s1981_s7 = smov 119   ;;  %s1982_s15 = smov 127   ;;  %v1026_v7 = vld [vmem:[#allocation7] sm:$0xf]  ;;  %v1033_v8 = vld [vmem:[#allocation8] sm:$0xf] }
  0x9e   : > { %1581 = vmatpush3.msk.msra.mxu0 %vm342_vm1, %v2248_v0  ;;  %1582 = vmatprep.mubr.msk.f32.mxu0 %vm1980_vm2, %v1979_v3  ;;  %s1983_s30 = smov 120   ;;  %v1984_v9 = vmov 0   ;;  %v294_v11 = vand.u32 127, %v293_v10  ;;  %v419_v15 = vld [vmem:[#allocation5 + $0xc] sm:$0xf]  ;;  %vm1118_vm7 = vcmask 523264  }
  0x9f   : > { %1595 = vmatprep.subr.mxu0 %v1979_v3  ;;  %1583 = vmatmul.mubr.msk.f32.vlgmr.msra.gmra.mrb[0].mxu0 %vm338_vm3, %v337_v4  ;;  %v572_v18 = vld [vmem:[#allocation5 + $0x4] sm:$0xf]  ;;  %v417_v20 = vld [vmem:[#allocation5 + $0x14] sm:$0xf]  ;;  %v725_v21 = vld [vmem:[#allocation5 + $0x8] sm:$0xf] }
  0xa0   : > { %1597 = vmatprep.mubr.msk.f32.mxu0 %vm1980_vm2, %v1979_v3  ;;  %1751 = vset.pattern.permute.xlu1 %v1984_v9  ;;  %v300_v12 = vand.u32 7, %v294_v11  ;;  %vm295_vm5 = vcmp.lt.s32.totalorder %v294_v11, 56  ;;  %v570_v22 = vld [vmem:[#allocation5 + $0x1c] sm:$0xf]  ;;  %v723_v23 = vld [vmem:[#allocation5 + $0x20] sm:$0xf] }
  0xa1   : > { %1752 = vset.pattern.permute.xlu0 %v1984_v9  ;;  %v873_v25 = vld [vmem:[#allocation5 + $0x18] sm:$0xf]  ;;  %v948_v27 = vld [vmem:[#allocation5] sm:$0xf]  ;;  %v1041_v35 = vld [vmem:[#allocation10] sm:$0xff]  ;;  %vm1126_vm8 = vcmask 7168  }
  0xa2   : > { %vm2267_vm4 = vcmp.lt.s32.totalorder %v300_v12, 7  ;;  %s1523_s17 = sshll.u32 %s2232_s11, 3  ;;  %s1551_s22 = sshll.u32 %s2037_s24, 7  ;;  %vm1384_vm9 = vcmask 15360  }
  0xa3   : > { %vm329_vm6 = vmand %vm295_vm5, %vm2267_vm4  ;;  %s291_s6 = scalar_lea.vmem [#allocation11], %s1523_s17  ;;  %s2347_s14 = scalar_lea.hbm %s2396_s5, %s1551_s22 }
  0xa4   : > { %s1400_s12 = sshll.u32 %s291_s6, 4  ;;  %s1387_s24 = scalar_lea.sflag [#allocation4], %s2232_s11  ;;  %s2349_s12 = int_to_ptr.vmem [resolvable:$true] %s1400_s12 }
  0xa5   : > { %s1895_s16 = scalar_lea.vmem %s2349_s12, 128  ;;  %p2416_p5 = scmp.ne.s32.totalorder %s2406_s9, 0 }
  0xa6   : > { %p1896_p6 = scmp.ne.s32.totalorder %s2349_s12, %s1895_s16  ;;  %s1985_s26 = smov [#allocation11]  }
  0xa7   : > { %s1899_s29 = sshll.u32 %s1985_s26, 4  ;;  %s1900_s29 = int_to_ptr.vmem [resolvable:$false] %s1899_s29 }
  0xa8   : > { %p1897_p7 = pnand %p1896_p6, %p2416_p5  ;;  %s1901_s23 = scalar_lea.vmem %s1900_s29, 256 }
  0xa9   : > { %p1902_p12 = scmp.lt.s32.totalorder %s2349_s12, %s1900_s29  ;;  %p1903_p3 = scmp.lt.s32.totalorder %s1901_s23, %s1895_s16 }
  0xaa   : > { %p1898_p9 = pneg %p1897_p7 }
  0xab   : > { %p1904_p13 = por %p1903_p3, %p1902_p12 }
  0xad   : > { %p1905_p0 = pnand %p1904_p13, %p1898_p9 }
 0x10e   : > { %v311_v1 = vpop.permute.xlu0 %310 }
 0x10f   : > { %v312_v2 = vsel %vm309_vm0, %v311_v1, %v2248_v0 }
 0x110   : > { %313 = vrot.lane.b32.xlu0 %v312_v2, %s1978_s25 }
 0x172   : > { %v412_v29 = vpop.f32.mrb[0].mxu0 }
 0x173   : > { %v1584_v32 = vpop.f32.mrb[1].mxu0 }
 0x182   : > { %v314_v5 = vpop.permute.xlu0 %313 }
 0x183   : > { %v315_v6 = vsel %vm309_vm0, %v314_v5, %v2248_v0 }
 0x184   : > { %332 = vrot.lane.b32.xlu0 %v315_v6, %s1981_s7  ;;  %325 = vrot.lane.b32.xlu1 %v315_v6, %s1982_s15 }
 0x188   : > { %319 = vrot.lane.b32.xlu1 %v315_v6, %s1983_s30  ;;  %1036 = vperm.xlu0 %1752, %v1033_v8  }
 0x18c   : > { %1029 = vperm.xlu1 %1751, %v1026_v7  }
 0x1f6   : > { %v326_v14 = vpop.permute.xlu1 %325  ;;  %v333_v24 = vpop.permute.xlu0 %332 }
 0x1f7   : > { %v328_v16 = vsel %vm2267_vm4, %v326_v14, 0.0  ;;  %v335_v26 = vsel %vm329_vm6, %v333_v24, 0.0 }
 0x1f8   : > { %1586 = vmatpush3.msk.msra.mxu1 %vm342_vm1, %v328_v16 }
 0x1f9   : > { %1588 = vmatmul.mubr.msk.f32.vlgmr.msra.gmra.mrb[0].mxu1 %vm338_vm3, %v419_v15  ;;  %1590 = vmatprep.subr.mxu1 %v1979_v3 }
 0x1fa   : > { %v320_v17 = vpop.permute.xlu1 %319  ;;  %1591 = vmatpush3.msk.msra.mxu1 %vm342_vm1, %v2248_v0  ;;  %1592 = vmatprep.mubr.msk.f32.mxu1 %vm1980_vm2, %v1979_v3 }
 0x1fb   : > { %v322_v19 = vsel %vm295_vm5, %v320_v17, 0.0  ;;  %1605 = vmatprep.subr.mxu1 %v1979_v3 }
 0x1fc   : > { %1596 = vmatpush3.msk.msra.mxu0 %vm342_vm1, %v322_v19 }
 0x1fd   : > { %1598 = vmatmul.mubr.msk.f32.vlgmr.msra.gmra.mrb[2].mxu0 %vm338_vm3, %v572_v18  ;;  %1600 = vmatprep.subr.mxu0 %v1979_v3 }
 0x1fe   : > { %1601 = vmatpush3.msk.msra.mxu0 %vm342_vm1, %v2248_v0  ;;  %1602 = vmatprep.mubr.msk.f32.mxu0 %vm1980_vm2, %v1979_v3 }
 0x1ff   : > { %1625 = vmatprep.subr.mxu0 %v1979_v3 }
 0x201   : > { %1593 = vmatmul.mubr.msk.f32.vlgmr.msra.gmra.mrb[0].mxu1 %vm338_vm3, %v417_v20 }
 0x202   : > { %1606 = vmatpush3.msk.msra.mxu1 %vm342_vm1, %v322_v19  ;;  %1607 = vmatprep.mubr.msk.f32.mxu1 %vm1980_vm2, %v1979_v3 }
 0x203   : > { %1610 = vmatprep.subr.mxu1 %v1979_v3 }
 0x205   : > { %1608 = vmatmul.mubr.msk.f32.vlgmr.msra.gmra.mrb[2].mxu1 %vm338_vm3, %v725_v21  ;;  %1603 = vmatmul.mubr.msk.f32.vlgmr.msra.gmra.mrb[2].mxu0 %vm338_vm3, %v570_v22 }
 0x206   : > { %1611 = vmatpush3.msk.msra.mxu1 %vm342_vm1, %v2248_v0  ;;  %1612 = vmatprep.mubr.msk.f32.mxu1 %vm1980_vm2, %v1979_v3 }
 0x207   : > { %1615 = vmatprep.subr.mxu1 %v1979_v3  ;;  %1627 = vmatprep.mubr.msk.f32.mxu0 %vm1980_vm2, %v1979_v3  ;;  %v1037_v30 = vpop.permute.xlu0 %1036 }
 0x20b   : > { %v1030_v28 = vpop.permute.xlu1 %1029 }
 0x20c   : > { %v1032_v31 = vmul.f32 %v1030_v28, %v412_v29 }
 0x20d   : > { %1613 = vmatmul.mubr.msk.f32.vlgmr.msra.gmra.mrb[2].mxu1 %vm338_vm3, %v723_v23 }
 0x20e   : > { %1616 = vmatpush3.msk.msra.mxu1 %vm342_vm1, %v328_v16  ;;  %1617 = vmatprep.mubr.msk.f32.mxu1 %vm1980_vm2, %v1979_v3  ;;  %v1039_v33 = vadd.f32 %v1037_v30, %v1032_v31 }
 0x20f   : > { %1620 = vmatprep.subr.mxu1 %v1979_v3 }
 0x210   : > { %v1040_v34 = vmax.f32 %v1039_v33, 0.0 }
 0x212   : > { %1626 = vmatpush3.msk.msra.mxu0 %vm342_vm1, %v1040_v34 }
 0x213   : > { %1630 = vmatprep.subr.mxu0 %v1979_v3  ;;  %1628 = vmatmul.mubr.msk.f32.vlgmr.msra.gmra.mrb[4].mxu0 %vm338_vm3, %v1041_v35 }
 0x214   : > { %1632 = vmatprep.mubr.msk.f32.mxu0 %vm1980_vm2, %v1979_v3 }
 0x215   : > { %1618 = vmatmul.mubr.msk.f32.vlgmr.msra.gmra.mrb[2].mxu1 %vm338_vm3, %v873_v25 }
 0x216   : > { %1621 = vmatpush3.msk.msra.mxu1 %vm342_vm1, %v335_v26  ;;  %1622 = vmatprep.mubr.msk.f32.mxu1 %vm1980_vm2, %v1979_v3 }
 0x21d   : > { %1623 = vmatmul.mubr.msk.f32.vlgmr.msra.gmra.mrb[2].mxu1 %vm338_vm3, %v948_v27 }
 0x2d4   : > { %v565_v36 = vpop.f32.mrb[0].mxu1 }
 0x2d5   : > { %v1129_v37 = vmul.f32 %v1030_v28, %v565_v36  ;;  %v1594_v38 = vpop.f32.mrb[1].mxu1 }
 0x2d7   : > { %v1130_v39 = vadd.f32 %v1129_v37, %v1037_v30 }
 0x2d8   : > { %v718_v40 = vpop.f32.mrb[2].mxu0 }
 0x2d9   : > { %v1131_v41 = vmax.f32 %v1130_v39, 0.0  ;;  %v1214_v42 = vmul.f32 %v1030_v28, %v718_v40  ;;  %v1604_v43 = vpop.f32.mrb[3].mxu0 }
 0x2db   : > { %1631 = vmatpush3.msk.msra.mxu0 %vm342_vm1, %v1131_v41  ;;  %v1215_v44 = vadd.f32 %v1214_v42, %v1037_v30 }
 0x2dc   : > { %1635 = vmatprep.subr.mxu0 %v1979_v3  ;;  %1633 = vmatmul.mubr.msk.f32.vlgmr.msra.gmra.mrb[6].mxu0 %vm338_vm3, %v1041_v35 }
 0x2dd   : > { %v1216_v45 = vmax.f32 %v1215_v44, 0.0  ;;  %1637 = vmatprep.mubr.msk.f32.mxu0 %vm1980_vm2, %v1979_v3 }
 0x2df   : > { %1636 = vmatpush3.msk.msra.mxu0 %vm342_vm1, %v1216_v45 }
 0x2e0   : > { %1638 = vmatmul.mubr.msk.f32.vlgmr.msra.gmra.mrb[8].mxu0 %vm338_vm3, %v1041_v35  ;;  %1640 = vmatprep.subr.mxu0 %v1979_v3 }
 0x2e1   : > { %1642 = vmatprep.mubr.msk.f32.mxu0 %vm1980_vm2, %v1979_v3 }
 0x2e6   : > { %v1114_v51 = vpop.f32.mrb[4].mxu0 }
 0x2e7   : > { %v1122_v52 = vmul.f32 %v1114_v51, %v1114_v51  ;;  %v1629_v53 = vpop.f32.mrb[5].mxu0  ;;  %v1119_v54 = vsel %vm1118_vm7, %v1114_v51, 0.0 }
 0x2e8   : > { %1120 = vadd.xlane.f32.xlu1 %v1119_v54 }
 0x2e9   : > { %v1123_v55 = vsel %vm1118_vm7, %v1122_v52, 0.0 }
 0x2ea   : > { %1124 = vadd.xlane.f32.xlu0 %v1123_v55 }
 0x2f0   : > { %v1021_v46 = vpop.f32.mrb[2].mxu1 }
 0x2f1   : > { %v1299_v47 = vmul.f32 %v1030_v28, %v1021_v46  ;;  %v1624_v48 = vpop.f32.mrb[3].mxu1 }
 0x2f3   : > { %v1300_v49 = vadd.f32 %v1299_v47, %v1037_v30 }
 0x2f5   : > { %v1301_v50 = vmax.f32 %v1300_v49, 0.0 }
 0x2f7   : > { %1641 = vmatpush3.msk.msra.mxu0 %vm342_vm1, %v1301_v50 }
 0x2f8   : > { %1643 = vmatmul.mubr.msk.f32.vlgmr.msra.gmra.mrb[10].mxu0 %vm338_vm3, %v1041_v35 }
 0x375   : > { %v1121_v8 = vpop.xlane.xlu1 %1120 }
 0x377   : > { %v1125_v7 = vpop.xlane.xlu0 %1124 }
 0x378   : > { %v1127_v11 = vsel %vm1126_vm8, %v1121_v8, %v1125_v7 }
 0x3af   : > { %v1201_v56 = vpop.f32.mrb[6].mxu0 }
 0x3b0   : > { %v1208_v57 = vmul.f32 %v1201_v56, %v1201_v56  ;;  %v1634_v58 = vpop.f32.mrb[7].mxu0  ;;  %v1205_v59 = vsel %vm1118_vm7, %v1201_v56, 0.0 }
 0x3b1   : > { %1206 = vadd.xlane.f32.xlu1 %v1205_v59 }
 0x3b2   : > { %v1209_v60 = vsel %vm1118_vm7, %v1208_v57, 0.0 }
 0x3b3   : > { %1210 = vadd.xlane.f32.xlu0 %v1209_v60  ;;  %v1286_v61 = vpop.f32.mrb[8].mxu0 }
 0x3b4   : > { %v1293_v62 = vmul.f32 %v1286_v61, %v1286_v61  ;;  %v1290_v63 = vsel %vm1118_vm7, %v1286_v61, 0.0  ;;  %v1639_v0 = vpop.f32.mrb[9].mxu0 }
 0x3b5   : > { %1291 = vadd.xlane.f32.xlu1 %v1290_v63 }
 0x3b6   : > { %v1294_v1 = vsel %vm1118_vm7, %v1293_v62, 0.0 }
 0x3b7   : > { %1295 = vadd.xlane.f32.xlu0 %v1294_v1 }
 0x3cb   : > { %v1371_v2 = vpop.f32.mrb[10].mxu0 }
 0x3cc   : > { %v1378_v3 = vmul.f32 %v1371_v2, %v1371_v2  ;;  %v1644_v4 = vpop.f32.mrb[11].mxu0  ;;  %v1375_v5 = vsel %vm1118_vm7, %v1371_v2, 0.0 }
 0x3cd   : > { %1376 = vadd.xlane.f32.xlu1 %v1375_v5 }
 0x3ce   : > { %v1379_v6 = vsel %vm1118_vm7, %v1378_v3, 0.0 }
 0x3cf   : > { %1380 = vadd.xlane.f32.xlu0 %v1379_v6 }
 0x43e   : > { %v1207_v10 = vpop.xlane.xlu1 %1206 }
 0x440   : > { %v1211_v9 = vpop.xlane.xlu0 %1210 }
 0x441   : > { %v1212_v12 = vsel %vm1126_vm8, %v1207_v10, %v1211_v9 }
 0x442   : > { %v1292_v14 = vpop.xlane.xlu1 %1291  ;;  %v1213_v15 = vadd.f32 %v1212_v12, %v1127_v11 }
 0x444   : > { %v1296_v13 = vpop.xlane.xlu0 %1295 }
 0x445   : > { %v1297_v16 = vsel %vm1126_vm8, %v1292_v14, %v1296_v13 }
 0x446   : > { %v1298_v17 = vadd.f32 %v1297_v16, %v1213_v15 }
 0x45a   : > { %v1377_v19 = vpop.xlane.xlu1 %1376 }
 0x45c   : > { %v1381_v18 = vpop.xlane.xlu0 %1380 }
 0x45d   : > { %v1382_v20 = vsel %vm1126_vm8, %v1377_v19, %v1381_v18 }
 0x45e   : > { %v1383_v21 = vadd.f32 %v1382_v20, %v1298_v17 }
 0x460   : > { %1385 = vst.msk [vmem:[%s291_s6] sm:$0xff] %vm1384_vm9, %v1383_v21 }
 0x461   : > { %1908 = shalt.err (!%p1905_p0)
}
 0x462   : > { %s1909_s11 = scalar_lea.hbm %s2347_s14, 128  ;;  %s1913_s15 = scalar_lea.hbm %s2396_s5, 256 }
 0x463   : > { %p1910_p2 = scmp.ne.s32.totalorder %s2347_s14, %s1909_s11  ;;  %p1914_p10 = scmp.lt.u32.totalorder %s2347_s14, %s2396_s5 }
 0x464   : > { %p1915_p11 = scmp.lt.u32.totalorder %s1913_s15, %s1909_s11  ;;  %p1917_p6 = scmp.lt.u32.totalorder %s1909_s11, %s2347_s14 }
 0x465   : > { %p1911_p8 = pnand %p1910_p2, %p2416_p5 }
 0x466   : > { %p1916_p1 = por %p1915_p11, %p1914_p10 }
 0x467   : > { %p1912_p4 = pneg %p1911_p8 }
 0x468   : > { %p1918_p7 = por %p1917_p6, %p1916_p1 }
 0x46a   : > { %p1919_p9 = pnand %p1918_p7, %p1912_p4 }
 0x46c   : > { %1922 = shalt.err (!%p1919_p9)
}
 0x46d   : > { %1673 = dma.vmem_to_hbm [thread:$0]  (%p2416_p5), %s2349_s12, 128, %s2347_s14, %s1387_s24  }
 0x46e PF: > { %s1412_s22 = sand.u32 1, %s1957_s18   ;;  %p2417_p12 = scmp.ne.s32.totalorder %s2407_s10, 0 }
 0x46f   : > { %p2418_p3 = scmp.ge.s32.totalorder %s1969_s21, 2  ;;  %s1413_s6 = scalar_lea.sflag [#allocation4], %s1412_s22 }
 0x471   : > { %p1693_p13 = pnand %p2418_p3, %p2417_p12 }
 0x473   : > { %1952 = dma.done.wait (!%p1693_p13), %s1413_s6, 128  }
 0x474   : > { %1954 = vsyncadd (!%p1693_p13), %s1413_s6, 4294967168  ;;  %p20_p0 = scmp.ge.s32.totalorder %s2156_s28, 4   ;;  %s2419_s18 = smov %s1961_s19 }
 0x475   : > { %s2420_s19 = smov %s1965_s20  ;;  %s2421_s20 = smov %s2167_s27 }
 0x476   : > { %s2422_s21 = smov %s2156_s28  ;;  %22 = sbr.rel (!%p20_p0) target bundleno = 7 (0x7), region = 109 }
 0x47d   :  { %1418 = vsyncpa [#allocation3], 1 }
 0x47e   :  { %1420 = vsyncpa [#allocation3 + $0x1], 1 }
 0x47f   :  { %1421 = vsyncpa [#allocation6], 1 }
 0x480   :  { %1422 = vsyncpa [#allocation9], 1 }
 0x481   :  { %1423 = vsyncpa [#allocation4], 1 }
 0x482   :  { %1425 = vsyncpa [#allocation4 + $0x1], 1 }

// kernel: decoder_block.7
= control target key start
LH: loop header
LB: loop body
LE: loop exit
PB: predicated region body
PF: predicated region fallthrough
CT: control target
= control target key end

     0   :  { %12 = vsyncpa [#allocation3], 0  ;;  %s2719_s0 = inlined_call_operand.hbm [shape: f32[2,4,64], index: 0, kind: input, shape index: {}]   ;;  %s2720_s1 = inlined_call_operand.hbm [shape: f32[3,3,4,4], index: 1, kind: input, shape index: {}]   ;;  %s2721_s2 = inlined_call_operand.hbm [shape: f32[4,1], index: 2, kind: input, shape index: {}]   ;;  %s2722_s3 = inlined_call_operand.hbm [shape: f32[4,1], index: 3, kind: input, shape index: {}]   ;;  %s2723_s4 = inlined_call_operand.hbm [shape: f32[8,4], index: 4, kind: input, shape index: {}]   ;;  %s2724_s5 = inlined_call_operand.hbm [shape: f32[8,1], index: 5, kind: input, shape index: {}]   ;;  %s2725_s6 = inlined_call_operand.hbm [shape: f32[8,1], index: 6, kind: input, shape index: {}]   ;;  %s2726_s7 = inlined_call_operand.hbm [shape: f32[2,4,8,64], index: 7, kind: output, shape index: {}]  }
   0x1   :  { %14 = vsyncpa [#allocation3 + $0x1], 0 }
   0x2   :  { %15 = vsyncpa [#allocation6], 0 }
   0x3   :  { %16 = vsyncpa [#allocation9], 0 }
   0x4   :  { %17 = vsyncpa [#allocation12], 0 }
   0x5   :  { %18 = vsyncpa [#allocation4], 0 }
   0x6   :  { %20 = vsyncpa [#allocation4 + $0x1], 0  ;;  %s2298_s24 = smov 0   ;;  %s2300_s25 = smov 0  }
   0x7   :  { %s2302_s26 = smov 0   ;;  %s2304_s27 = smov 0  }
   0x8 LB: > { %s2239_s28 = smov [#allocation5]   ;;  %s2319_s30 = sadd.s32 4294967295, %s2237_s27   ;;  %s2237_s27 = sphi %s2304_s27, %s2754_s27   ;;  %s2233_s26 = sphi %s2302_s26, %s2753_s26   ;;  %s2229_s25 = sphi %s2300_s25, %s2752_s25   ;;  %s2225_s24 = sphi %s2298_s24, %s2751_s24  }
   0x9   : > { %s221_s29 = sshll.u32 %s2239_s28, 4  ;;  %p1686_p0 = scmp.ge.s32.totalorder %s2237_s27, 1  ;;  %s2324_s29 = int_to_ptr.vmem [resolvable:$true] %s221_s29 }
   0xa   : > { %p2727_p1 = scmp.eq.s32.totalorder %s2319_s30, 0  ;;  %p209_p2 = scmp.lt.s32.totalorder %s2237_s27, 3 }
   0xb   : > { %s2240_s9 = smov [#allocation8]   ;;  %s2241_s12 = smov [#allocation11]  }
   0xc   : > { %p2326_p3 = pnand %p1686_p0, %p209_p2  ;;  %s246_s10 = sshll.u32 %s2240_s9, 4  ;;  %s2339_s10 = int_to_ptr.vmem [resolvable:$true] %s246_s10 }
   0xd   : > { %s268_s13 = sshll.u32 %s2241_s12, 4  ;;  %s1961_s16 = scalar_lea.hbm %s2720_s1, 576  ;;  %s2341_s13 = int_to_ptr.vmem [resolvable:$true] %s268_s13 }
   0xe   : > { %s2730_s8 = scalar_select %p2326_p3, 1, 0 }
   0xf   : > { %p1869_p5 = pneg %p2326_p3  ;;  %p1962_p7 = scmp.ne.s32.totalorder %s2720_s1, %s1961_s16 }
  0x10   : > { %p1968_p11 = scmp.lt.u32.totalorder %s1961_s16, %s2720_s1 }
  0x11   : > { %p2335_p6 = pnand %p1869_p5, %p2727_p1 }
  0x13   : > { %p2351_p8 = pneg %p2335_p6 }
  0x15   : > { %p1964_p9 = pnand %p2351_p8, %p1962_p7 }
  0x17   : > { %p1965_p10 = pneg %p1964_p9 }
  0x19   : > { %p1970_p12 = pnand %p1968_p11, %p1965_p10 }
  0x1b   : > { %1973 = shalt.err (!%p1970_p12)
}
  0x1c   : > { %s1974_s22 = scalar_lea.vmem %s2324_s29, 576  ;;  %p1982_p5 = scmp.lt.s32.totalorder %s2324_s29, %s2324_s29 }
  0x1d   : > { %p1975_p13 = scmp.ne.s32.totalorder %s2324_s29, %s1974_s22  ;;  %p1983_p4 = scmp.lt.s32.totalorder %s1974_s22, %s1974_s22 }
  0x1f   : > { %p1977_p0 = pnand %p1975_p13, %p2351_p8  ;;  %p1984_p7 = por %p1983_p4, %p1982_p5 }
  0x21   : > { %p1978_p2 = pneg %p1977_p0 }
  0x23   : > { %p1985_p9 = pnand %p1984_p7, %p1978_p2 }
  0x25   : > { %1988 = shalt.err (!%p1985_p9)
}
  0x26   : > { %s2242_s23 = smov 64   ;;  %s2243_s28 = smov 4  }
  0x27   : > { %1872 = dma.hbm_to_vmem [thread:$0]  (!%p2335_p6), %s2720_s1, 576, %s2324_s29, [#allocation6], %s2242_s23, %s2242_s23, %s2243_s28  }
  0x28   : > { %s1989_s16 = scalar_lea.hbm %s2722_s3, 64 }
  0x29   : > { %p1990_p4 = scmp.ne.s32.totalorder %s2722_s3, %s1989_s16  ;;  %p1996_p12 = scmp.lt.u32.totalorder %s1989_s16, %s2722_s3 }
  0x2b   : > { %p1992_p10 = pnand %p1990_p4, %p2351_p8 }
  0x2d   : > { %p1993_p11 = pneg %p1992_p10 }
  0x2f   : > { %p1998_p13 = pnand %p1996_p12, %p1993_p11 }
  0x31   : > { %2001 = shalt.err (!%p1998_p13)
}
  0x32   : > { %s2002_s29 = scalar_lea.vmem %s2339_s10, 64  ;;  %p2010_p7 = scmp.lt.s32.totalorder %s2339_s10, %s2339_s10 }
  0x33   : > { %p2003_p0 = scmp.ne.s32.totalorder %s2339_s10, %s2002_s29  ;;  %p2011_p9 = scmp.lt.s32.totalorder %s2002_s29, %s2002_s29 }
  0x35   : > { %p2005_p2 = pnand %p2003_p0, %p2351_p8  ;;  %p2012_p4 = por %p2011_p9, %p2010_p7 }
  0x37   : > { %p2006_p5 = pneg %p2005_p2 }
  0x39   : > { %p2013_p10 = pnand %p2012_p4, %p2006_p5 }
  0x3b   : > { %2016 = shalt.err (!%p2013_p10)
}
  0x3c   : > { %1878 = dma.hbm_to_vmem [thread:$0]  (!%p2335_p6), %s2722_s3, 64, %s2339_s10, [#allocation9]  }
  0x3d   : > { %s2017_s12 = scalar_lea.hbm %s2724_s5, 128 }
  0x3e   : > { %p2018_p11 = scmp.ne.s32.totalorder %s2724_s5, %s2017_s12  ;;  %p2024_p0 = scmp.lt.u32.totalorder %s2017_s12, %s2724_s5 }
  0x40   : > { %p2020_p12 = pnand %p2018_p11, %p2351_p8 }
  0x42   : > { %p2021_p13 = pneg %p2020_p12 }
  0x44   : > { %p2026_p2 = pnand %p2024_p0, %p2021_p13 }
  0x46   : > { %2029 = shalt.err (!%p2026_p2)
}
  0x47   : > { %s2030_s10 = scalar_lea.vmem %s2341_s13, 128  ;;  %p2038_p4 = scmp.lt.s32.totalorder %s2341_s13, %s2341_s13 }
  0x48   : > { %p2031_p5 = scmp.ne.s32.totalorder %s2341_s13, %s2030_s10  ;;  %p2039_p10 = scmp.lt.s32.totalorder %s2030_s10, %s2030_s10 }
  0x4a   : > { %p2033_p7 = pnand %p2031_p5, %p2351_p8  ;;  %p2040_p11 = por %p2039_p10, %p2038_p4 }
  0x4c   : > { %p2034_p9 = pneg %p2033_p7 }
  0x4e   : > { %p2041_p12 = pnand %p2040_p11, %p2034_p9 }
  0x50   : > { %2044 = shalt.err (!%p2041_p12)
}
  0x51   : > { %1884 = dma.hbm_to_vmem [thread:$0]  (!%p2335_p6), %s2724_s5, 128, %s2341_s13, [#allocation12]  }
  0x52   : > { %s2244_s21 = smov [#allocation7]   ;;  %s2245_s22 = smov [#allocation10]  }
  0x53   : > { %s235_s29 = sshll.u32 %s2244_s21, 4  ;;  %s257_s23 = sshll.u32 %s2245_s22, 4  ;;  %s236_s29 = int_to_ptr.vmem [resolvable:$true] %s235_s29  ;;  %s258_s23 = int_to_ptr.vmem [resolvable:$true] %s257_s23 }
  0x54   : > { %s2045_s12 = scalar_lea.hbm %s2721_s2, 64 }
  0x55   : > { %p2046_p13 = scmp.ne.s32.totalorder %s2721_s2, %s2045_s12  ;;  %p2052_p5 = scmp.lt.u32.totalorder %s2045_s12, %s2721_s2 }
  0x57   : > { %p2048_p0 = pnand %p2046_p13, %p2351_p8 }
  0x59   : > { %p2049_p2 = pneg %p2048_p0 }
  0x5b   : > { %p2054_p7 = pnand %p2052_p5, %p2049_p2 }
  0x5d   : > { %2057 = shalt.err (!%p2054_p7)
}
  0x5e   : > { %s2058_s13 = scalar_lea.vmem %s236_s29, 64  ;;  %p2066_p11 = scmp.lt.s32.totalorder %s236_s29, %s236_s29 }
  0x5f   : > { %p2059_p9 = scmp.ne.s32.totalorder %s236_s29, %s2058_s13  ;;  %p2067_p12 = scmp.lt.s32.totalorder %s2058_s13, %s2058_s13 }
  0x61   : > { %p2061_p4 = pnand %p2059_p9, %p2351_p8  ;;  %p2068_p1 = por %p2067_p12, %p2066_p11 }
  0x63   : > { %p2062_p10 = pneg %p2061_p4 }
  0x65   : > { %p2069_p3 = pnand %p2068_p1, %p2062_p10 }
  0x67   : > { %2072 = shalt.err (!%p2069_p3)
}
  0x68   : > { %1875 = dma.hbm_to_vmem [thread:$0]  (!%p2335_p6), %s2721_s2, 64, %s236_s29, [#allocation6]  }
  0x69   : > { %s2073_s22 = scalar_lea.hbm %s2723_s4, 128 }
  0x6a   : > { %p2074_p13 = scmp.ne.s32.totalorder %s2723_s4, %s2073_s22  ;;  %p2080_p3 = scmp.lt.u32.totalorder %s2073_s22, %s2723_s4 }
  0x6c   : > { %p2076_p0 = pnand %p2074_p13, %p2351_p8 }
  0x6e   : > { %p2077_p1 = pneg %p2076_p0 }
  0x70   : > { %p2082_p2 = pnand %p2080_p3, %p2077_p1 }
  0x72   : > { %2085 = shalt.err (!%p2082_p2)
}
  0x73   : > { %s2086_s15 = scalar_lea.vmem %s258_s23, 128  ;;  %p2094_p4 = scmp.lt.s32.totalorder %s258_s23, %s258_s23 }
  0x74   : > { %p2087_p5 = scmp.ne.s32.totalorder %s258_s23, %s2086_s15  ;;  %p2095_p10 = scmp.lt.s32.totalorder %s2086_s15, %s2086_s15 }
  0x76   : > { %p2089_p7 = pnand %p2087_p5, %p2351_p8  ;;  %p2096_p11 = por %p2095_p10, %p2094_p4 }
  0x78   : > { %p2090_p9 = pneg %p2089_p7 }
  0x7a   : > { %p2097_p12 = pnand %p2096_p11, %p2090_p9 }
  0x7c   : > { %2100 = shalt.err (!%p2097_p12)
}
  0x7d   : > { %1881 = dma.hbm_to_vmem [thread:$0]  (!%p2335_p6), %s2723_s4, 128, %s258_s23, [#allocation9]  }
  0x7e   : > { %s2246_s17 = smov [#allocation13]   ;;  %s2101_s20 = scalar_lea.hbm %s2725_s6, 128 }
  0x7f   : > { %s279_s13 = sshll.u32 %s2246_s17, 4  ;;  %p2102_p13 = scmp.ne.s32.totalorder %s2725_s6, %s2101_s20  ;;  %s280_s13 = int_to_ptr.vmem [resolvable:$true] %s279_s13 }
  0x80   : > { %p2108_p3 = scmp.lt.u32.totalorder %s2101_s20, %s2725_s6 }
  0x81   : > { %p2104_p0 = pnand %p2102_p13, %p2351_p8 }
  0x83   : > { %p2105_p1 = pneg %p2104_p0 }
  0x85   : > { %p2110_p2 = pnand %p2108_p3, %p2105_p1 }
  0x87   : > { %2113 = shalt.err (!%p2110_p2)
}
  0x88   : > { %s2114_s23 = scalar_lea.vmem %s280_s13, 128  ;;  %p2122_p4 = scmp.lt.s32.totalorder %s280_s13, %s280_s13 }
  0x89   : > { %p2115_p5 = scmp.ne.s32.totalorder %s280_s13, %s2114_s23  ;;  %p2123_p10 = scmp.lt.s32.totalorder %s2114_s23, %s2114_s23 }
  0x8b   : > { %p2117_p7 = pnand %p2115_p5, %p2351_p8  ;;  %p2124_p11 = por %p2123_p10, %p2122_p4 }
  0x8d   : > { %p2118_p9 = pneg %p2117_p7 }
  0x8f   : > { %p2125_p12 = pnand %p2124_p11, %p2118_p9 }
  0x91   : > { %2128 = shalt.err (!%p2125_p12)
}
  0x92   : > { %1887 = dma.hbm_to_vmem [thread:$0]  (!%p2335_p6), %s2725_s6, 128, %s280_s13, [#allocation12]  }
  0x93   : > { %s1685_s19 = sadd.s32 4294967294, %s2237_s27   ;;  %s2474_s11 = sadd.s32 1, %s2237_s27  }
  0x94   : > { %s30_s15 = ssub.s32 %s2237_s27, %s2474_s11  ;;  %s33_s29 = sadd.s32 1, %s2233_s26 }
  0x95   : > { %p31_p8 = scmp.eq.s32.totalorder %s30_s15, 0  ;;  %p40_p13 = scmp.ne.s32.totalorder %s2233_s26, %s2229_s25 }
  0x96   : > { %p41_p0 = scmp.eq.s32.totalorder %s2237_s27, 0  ;;  %p46_p1 = scmp.ne.s32.totalorder %s2229_s25, %s2225_s24 }
  0x97   : > { %s2485_s16 = scalar_select %p31_p8, %s2233_s26, %s33_s29  }
  0x98   : > { %p2487_p3 = por %p41_p0, %p40_p13  ;;  %p2734_p2 = scmp.eq.s32.totalorder %s2319_s30, 0 }
  0x99   : > { %p196_p5 = scmp.eq.s32.totalorder %s2319_s30, 1  ;;  %p202_p7 = scmp.eq.s32.totalorder %s1685_s19, 1 }
  0x9a   : > { %p2493_p6 = por %p2734_p2, %p46_p1  ;;  %p1902_p9 = scmp.lt.s32.totalorder %s2237_s27, 2 }
  0x9b   : > { %s290_s10 = sand.u32 1, %s2233_s26   ;;  %p2500_p4 = por %p196_p5, %p40_p13 }
  0x9c   : > { %p2504_p10 = por %p202_p7, %p46_p1  ;;  %s1694_s21 = sshll.u32 %s290_s10, 2 }
  0x9d   : > { %s2736_s18 = scalar_select %p2500_p4, 1, 0 }
  0x9e   : > { %s2737_s20 = scalar_select %p2504_p10, 1, 0 }
  0x9f   : > { %s1695_s22 = sshll.u32 %s2237_s27, 6  ;;  %s294_s12 = scalar_lea.vmem [#allocation2], %s1694_s21 }
  0xa0   : > { %s2512_s23 = scalar_lea.hbm %s2719_s0, %s1695_s22  ;;  %s301_s14 = sshll.u32 %s294_s12, 4  ;;  %s2514_s14 = int_to_ptr.vmem [resolvable:$true] %s301_s14 }
  0xa1   : > { %p2518_p11 = pnand %p1902_p9, %p2487_p3  ;;  %s291_s15 = scalar_lea.sflag [#allocation3], %s290_s10 }
  0xa2   : > { %s2129_s29 = scalar_lea.hbm %s2512_s23, 64  ;;  %s2134_s28 = scalar_lea.hbm %s2719_s0, 128 }
  0xa3   : > { %p2130_p12 = scmp.ne.s32.totalorder %s2512_s23, %s2129_s29  ;;  %p2131_p8 = pneg %p2518_p11 }
  0xa4   : > { %p2135_p1 = scmp.lt.u32.totalorder %s2512_s23, %s2719_s0  ;;  %p2136_p3 = scmp.lt.u32.totalorder %s2134_s28, %s2129_s29 }
  0xa5   : > { %p2132_p13 = pnand %p2131_p8, %p2130_p12  ;;  %p2138_p5 = scmp.lt.u32.totalorder %s2129_s29, %s2512_s23 }
  0xa6   : > { %p2137_p2 = por %p2136_p3, %p2135_p1 }
  0xa7   : > { %p2133_p0 = pneg %p2132_p13 }
  0xa8   : > { %p2139_p7 = por %p2138_p5, %p2137_p2 }
  0xaa   : > { %p2140_p9 = pnand %p2139_p7, %p2133_p0 }
  0xac   : > { %2143 = shalt.err (!%p2140_p9)
}
  0xad   : > { %s2144_s10 = scalar_lea.vmem %s2514_s14, 64  ;;  %s2247_s12 = smov [#allocation2]  }
  0xae   : > { %p2145_p12 = scmp.ne.s32.totalorder %s2514_s14, %s2144_s10  ;;  %s2149_s21 = sshll.u32 %s2247_s12, 4  ;;  %s2150_s21 = int_to_ptr.vmem [resolvable:$false] %s2149_s21 }
  0xaf   : > { %s2151_s22 = scalar_lea.vmem %s2150_s21, 128  ;;  %p2152_p4 = scmp.lt.s32.totalorder %s2514_s14, %s2150_s21 }
  0xb0   : > { %p2147_p13 = pnand %p2145_p12, %p2131_p8  ;;  %p2153_p1 = scmp.lt.s32.totalorder %s2151_s22, %s2144_s10 }
  0xb2   : > { %p2148_p10 = pneg %p2147_p13  ;;  %p2154_p3 = por %p2153_p1, %p2152_p4 }
  0xb4   : > { %p2155_p2 = pnand %p2154_p3, %p2148_p10 }
  0xb6   : > { %2158 = shalt.err (!%p2155_p2)
}
  0xb7   : > { %1891 = dma.hbm_to_vmem [thread:$0]  (!%p2518_p11), %s2512_s23, 64, %s2514_s14, %s291_s15  }
  0xb8   : > { %p2739_p0 = scmp.ne.s32.totalorder %s2730_s8, 0 }
  0xb9   : > { %s2550_s29 = sand.u32 (!%p2739_p0), 1, %s2229_s25  }
  0xba   : > { %310 = sbr.rel (%p2739_p0) target bundleno = 1043 (0x413), region = 48  ;;  %s1697_s28 = sshll.u32 (!%p2739_p0), %s2550_s29, 2 }
  0xbb   : > { %s313_s17 = scalar_lea.sflag (!%p2739_p0), [#allocation3], %s2550_s29  ;;  %s316_s9 = scalar_lea.vmem (!%p2739_p0), [#allocation2], %s1697_s28 }
  0xc1   : > { %2204 = dma.done.wait (%p2493_p6), %s313_s17, 64  }
  0xc2   : > { %2206 = vsyncadd (%p2493_p6), %s313_s17, 4294967232  ;;  %p2740_p4 = scmp.eq.s32.totalorder %s2319_s30, 0 }
  0xc4   : > { %2208 = dma.done.wait (%p2740_p4), [#allocation6], 640   ;;  %p2741_p10 = pmov %p2740_p4 }
  0xc5   : > { %p2742_p11 = pmov %p2740_p4 }
  0xc6   : > { %2210 = vsyncadd (%p2741_p10), [#allocation6], 4294966656 }
  0xc7   : > { %2212 = dma.done.wait (%p2742_p11), [#allocation9], 192   ;;  %p2743_p8 = pmov %p2740_p4 }
  0xc8   : > { %p2744_p5 = pmov %p2740_p4 }
  0xc9   : > { %2214 = vsyncadd (%p2743_p8), [#allocation9], 4294967104 }
  0xca   : > { %2216 = dma.done.wait (%p2744_p5), [#allocation12], 256   ;;  %p2745_p7 = pmov %p2740_p4 }
  0xcb   : > { %v2248_v0 = vmov 0.0   ;;  %vm2249_vm0 = vmmov 0   ;;  %vm421_vm1 = vcmask 1043456   ;;  %vm417_vm2 = vcmask 31744   ;;  %v2576_v1 = vld [vmem:[%s316_s9] sm:$0xf] }
  0xcc   : > { %2218 = vsyncadd (%p2745_p7), [#allocation12], 4294967040  ;;  %1766 = vmatprep.subr.mxu0 %v2248_v0  ;;  %1771 = vmatprep.subr.mxu1 %v2248_v0  ;;  %v416_v2 = vld [vmem:[#allocation5 + $0x10] sm:$0xf]  ;;  %s2250_s8 = smov 64   ;;  %v2251_v3 = vmov 0   ;;  %v372_v20 = vlaneseq }
  0xcd   : > { %1768 = vmatprep.mubr.msk.f32.mxu0 %vm2249_vm0, %v2248_v0  ;;  %1773 = vmatprep.mubr.msk.f32.mxu1 %vm2249_vm0, %v2248_v0  ;;  %vm388_vm3 = vcmask 1048064   ;;  %s2252_s13 = smov 119   ;;  %s2253_s23 = smov 127   ;;  %v1112_v8 = vld [vmem:[#allocation8] sm:$0xf]  ;;  %v1306_v17 = vld [vmem:[#allocation11] sm:$0xff] }
  0xce   : > { %389 = vrot.lane.b32.xlu0 %v2576_v1, %s2250_s8  ;;  %1767 = vmatpush3.msk.msra.mxu0 %vm421_vm1, %v2576_v1  ;;  %s2254_s14 = smov 120   ;;  %v1105_v9 = vld [vmem:[#allocation7] sm:$0xf]  ;;  %v1221_v14 = vld [vmem:[#allocation8] sm:$0xf]  ;;  %v1313_v19 = vld [vmem:[#allocation13] sm:$0xff] }
  0xcf   : > { %1769 = vmatmul.mubr.msk.f32.vlgmr.msra.gmra.mrb[0].mxu0 %vm417_vm2, %v416_v2  ;;  %1781 = vmatprep.subr.mxu0 %v2248_v0  ;;  %v1214_v12 = vld [vmem:[#allocation7] sm:$0xf]  ;;  %v1330_v16 = vld [vmem:[#allocation8] sm:$0xf]  ;;  %v373_v21 = vand.u32 127, %v372_v20  ;;  %v1120_v40 = vld [vmem:[#allocation10] sm:$0xff] }
  0xd0   : > { %1783 = vmatprep.mubr.msk.f32.mxu0 %vm2249_vm0, %v2248_v0  ;;  %1959 = vset.pattern.permute.xlu1 %v2251_v3  ;;  %v1323_v13 = vld [vmem:[#allocation7] sm:$0xf]  ;;  %v1439_v18 = vld [vmem:[#allocation8] sm:$0xf]  ;;  %v498_v25 = vld [vmem:[#allocation5 + $0xc] sm:$0xf] }
  0xd1   : > { %1960 = vset.pattern.permute.xlu0 %v2251_v3  ;;  %v1432_v15 = vld [vmem:[#allocation7] sm:$0xf]  ;;  %v379_v22 = vand.u32 7, %v373_v21  ;;  %vm374_vm5 = vcmp.lt.s32.totalorder %v373_v21, 56  ;;  %v496_v30 = vld [vmem:[#allocation5 + $0x14] sm:$0xf] }
  0xd2   : > { %v651_v28 = vld [vmem:[#allocation5 + $0x4] sm:$0xf]  ;;  %v649_v31 = vld [vmem:[#allocation5 + $0x1c] sm:$0xf]  ;;  %v804_v32 = vld [vmem:[#allocation5 + $0x8] sm:$0xf] }
  0xd3   : > { %vm2589_vm4 = vcmp.lt.s32.totalorder %v379_v22, 7  ;;  %v802_v34 = vld [vmem:[#allocation5 + $0x20] sm:$0xf]  ;;  %v952_v41 = vld [vmem:[#allocation5 + $0x18] sm:$0xf]  ;;  %s1704_s19 = sshll.u32 %s2550_s29, 5 }
  0xd4   : > { %vm408_vm6 = vmand %vm374_vm5, %vm2589_vm4  ;;  %v1027_v43 = vld [vmem:[#allocation5] sm:$0xf]  ;;  %vm1212_vm7 = vcmask 523264   ;;  %s2656_s15 = scalar_lea.vmem [#allocation14], %s1704_s19  ;;  %s1739_s12 = sshll.u32 %s2319_s30, 9 }
  0xd5   : > { %s1555_s10 = sshll.u32 %s2656_s15, 4  ;;  %s2673_s28 = scalar_lea.hbm %s2726_s7, %s1739_s12  ;;  %s2668_s10 = int_to_ptr.vmem [resolvable:$true] %s1555_s10 }
  0xd6   : > { %s1542_s17 = scalar_lea.sflag [#allocation4], %s2550_s29  ;;  %s2159_s9 = scalar_lea.vmem %s2668_s10, 512 }
  0xd7   : > { %p2160_p6 = scmp.ne.s32.totalorder %s2668_s10, %s2159_s9  ;;  %p2748_p9 = scmp.ne.s32.totalorder %s2736_s18, 0 }
  0xd8   : > { %s2255_s30 = smov [#allocation14]  }
  0xd9   : > { %p2161_p12 = pnand %p2160_p6, %p2748_p9 }
  0xdb   : > { %p2162_p13 = pneg %p2161_p12 }
 0x140   : > { %v390_v4 = vpop.permute.xlu0 %389 }
 0x141   : > { %v391_v5 = vsel %vm388_vm3, %v390_v4, %v2576_v1 }
 0x142   : > { %392 = vrot.lane.b32.xlu0 %v391_v5, %s2250_s8  ;;  %s2163_s8 = sshll.u32 %s2255_s30, 4  ;;  %s2164_s8 = int_to_ptr.vmem [resolvable:$false] %s2163_s8 }
 0x143   : > { %p2166_p1 = scmp.lt.s32.totalorder %s2668_s10, %s2164_s8 }
 0x1a2   : > { %v2587_v10 = vpop.f32.mrb[0].mxu0 }
 0x1a3   : > { %v1770_v11 = vpop.f32.mrb[1].mxu0 }
 0x1b4   : > { %v393_v6 = vpop.permute.xlu0 %392 }
 0x1b5   : > { %v394_v7 = vsel %vm388_vm3, %v393_v6, %v2576_v1 }
 0x1b6   : > { %411 = vrot.lane.b32.xlu0 %v394_v7, %s2252_s13  ;;  %404 = vrot.lane.b32.xlu1 %v394_v7, %s2253_s23  ;;  %s2165_s13 = scalar_lea.vmem %s2164_s8, 1024 }
 0x1b7   : > { %p2167_p3 = scmp.lt.s32.totalorder %s2165_s13, %s2159_s9 }
 0x1b9   : > { %p2168_p2 = por %p2167_p3, %p2166_p1 }
 0x1ba   : > { %398 = vrot.lane.b32.xlu1 %v394_v7, %s2254_s14  ;;  %1115 = vperm.xlu0 %1960, %v1112_v8  }
 0x1bb   : > { %p2169_p0 = pnand %p2168_p2, %p2162_p13 }
 0x1be   : > { %1108 = vperm.xlu1 %1959, %v1105_v9   ;;  %1326 = vperm.xlu0 %1960, %v1323_v13  }
 0x1c2   : > { %1217 = vperm.xlu1 %1959, %v1214_v12   ;;  %1435 = vperm.xlu0 %1960, %v1432_v15  }
 0x1c6   : > { %1224 = vperm.xlu1 %1959, %v1221_v14   ;;  %1200 = vperm.xlu0 %1960, %v1306_v17  }
 0x1ca   : > { %1333 = vperm.xlu1 %1959, %v1330_v16   ;;  %1418 = vperm.xlu0 %1960, %v1306_v17  }
 0x1ce   : > { %1442 = vperm.xlu1 %1959, %v1439_v18   ;;  %1207 = vperm.xlu0 %1960, %v1313_v19  }
 0x1d2   : > { %1309 = vperm.xlu1 %1959, %v1306_v17   ;;  %1425 = vperm.xlu0 %1960, %v1313_v19  }
 0x1d6   : > { %1527 = vperm.xlu1 %1959, %v1306_v17  }
 0x1da   : > { %1316 = vperm.xlu1 %1959, %v1313_v19  }
 0x1de   : > { %1534 = vperm.xlu1 %1959, %v1313_v19  }
 0x228   : > { %v405_v24 = vpop.permute.xlu1 %404  ;;  %v412_v33 = vpop.permute.xlu0 %411 }
 0x229   : > { %v407_v26 = vsel %vm2589_vm4, %v405_v24, 0.0  ;;  %v414_v42 = vsel %vm408_vm6, %v412_v33, 0.0 }
 0x22a   : > { %1772 = vmatpush3.msk.msra.mxu1 %vm421_vm1, %v407_v26 }
 0x22b   : > { %1774 = vmatmul.mubr.msk.f32.vlgmr.msra.gmra.mrb[0].mxu1 %vm417_vm2, %v498_v25  ;;  %1776 = vmatprep.subr.mxu1 %v2248_v0 }
 0x22c   : > { %v399_v27 = vpop.permute.xlu1 %398  ;;  %1777 = vmatpush3.msk.msra.mxu1 %vm421_vm1, %v2576_v1  ;;  %1778 = vmatprep.mubr.msk.f32.mxu1 %vm2249_vm0, %v2248_v0 }
 0x22d   : > { %v401_v29 = vsel %vm374_vm5, %v399_v27, 0.0  ;;  %1791 = vmatprep.subr.mxu1 %v2248_v0 }
 0x22e   : > { %1782 = vmatpush3.msk.msra.mxu0 %vm421_vm1, %v401_v29 }
 0x22f   : > { %1784 = vmatmul.mubr.msk.f32.vlgmr.msra.gmra.mrb[2].mxu0 %vm417_vm2, %v651_v28  ;;  %1786 = vmatprep.subr.mxu0 %v2248_v0 }
 0x230   : > { %1787 = vmatpush3.msk.msra.mxu0 %vm421_vm1, %v2576_v1  ;;  %1788 = vmatprep.mubr.msk.f32.mxu0 %vm2249_vm0, %v2248_v0 }
 0x231   : > { %1811 = vmatprep.subr.mxu0 %v2248_v0 }
 0x233   : > { %1779 = vmatmul.mubr.msk.f32.vlgmr.msra.gmra.mrb[0].mxu1 %vm417_vm2, %v496_v30 }
 0x234   : > { %1792 = vmatpush3.msk.msra.mxu1 %vm421_vm1, %v401_v29  ;;  %1793 = vmatprep.mubr.msk.f32.mxu1 %vm2249_vm0, %v2248_v0 }
 0x235   : > { %1796 = vmatprep.subr.mxu1 %v2248_v0 }
 0x237   : > { %1789 = vmatmul.mubr.msk.f32.vlgmr.msra.gmra.mrb[2].mxu0 %vm417_vm2, %v649_v31  ;;  %1794 = vmatmul.mubr.msk.f32.vlgmr.msra.gmra.mrb[2].mxu1 %vm417_vm2, %v804_v32 }
 0x238   : > { %1797 = vmatpush3.msk.msra.mxu1 %vm421_vm1, %v2576_v1  ;;  %1798 = vmatprep.mubr.msk.f32.mxu1 %vm2249_vm0, %v2248_v0 }
 0x239   : > { %1801 = vmatprep.subr.mxu1 %v2248_v0  ;;  %1813 = vmatprep.mubr.msk.f32.mxu0 %vm2249_vm0, %v2248_v0  ;;  %v1116_v36 = vpop.permute.xlu0 %1115 }
 0x23d   : > { %v1109_v35 = vpop.permute.xlu1 %1108  ;;  %v1327_v45 = vpop.permute.xlu0 %1326 }
 0x23e   : > { %v1111_v37 = vmul.f32 %v1109_v35, %v2587_v10 }
 0x23f   : > { %1799 = vmatmul.mubr.msk.f32.vlgmr.msra.gmra.mrb[2].mxu1 %vm417_vm2, %v802_v34 }
 0x240   : > { %v1118_v38 = vadd.f32 %v1116_v36, %v1111_v37  ;;  %1802 = vmatpush3.msk.msra.mxu1 %vm421_vm1, %v407_v26  ;;  %1803 = vmatprep.mubr.msk.f32.mxu1 %vm2249_vm0, %v2248_v0 }
 0x241   : > { %1806 = vmatprep.subr.mxu1 %v2248_v0  ;;  %v1218_v44 = vpop.permute.xlu1 %1217  ;;  %v1436_v50 = vpop.permute.xlu0 %1435 }
 0x242   : > { %v1119_v39 = vmax.f32 %v1118_v38, 0.0 }
 0x244   : > { %1812 = vmatpush3.msk.msra.mxu0 %vm421_vm1, %v1119_v39 }
 0x245   : > { %1814 = vmatmul.mubr.msk.f32.vlgmr.msra.gmra.mrb[4].mxu0 %vm417_vm2, %v1120_v40  ;;  %1816 = vmatprep.subr.mxu0 %v2248_v0  ;;  %v1225_v46 = vpop.permute.xlu1 %1224  ;;  %v1201_v58 = vpop.permute.xlu0 %1200 }
 0x246   : > { %1818 = vmatprep.mubr.msk.f32.mxu0 %vm2249_vm0, %v2248_v0 }
 0x247   : > { %1804 = vmatmul.mubr.msk.f32.vlgmr.msra.gmra.mrb[2].mxu1 %vm417_vm2, %v952_v41 }
 0x248   : > { %1807 = vmatpush3.msk.msra.mxu1 %vm421_vm1, %v414_v42  ;;  %1808 = vmatprep.mubr.msk.f32.mxu1 %vm2249_vm0, %v2248_v0 }
 0x249   : > { %v1334_v56 = vpop.permute.xlu1 %1333  ;;  %v1419_v60 = vpop.permute.xlu0 %1418 }
 0x24d   : > { %v1208_v1 = vpop.permute.xlu0 %1207  ;;  %v1443_v7 = vpop.permute.xlu1 %1442 }
 0x24f   : > { %1809 = vmatmul.mubr.msk.f32.vlgmr.msra.gmra.mrb[2].mxu1 %vm417_vm2, %v1027_v43 }
 0x251   : > { %v1310_v9 = vpop.permute.xlu1 %1309  ;;  %v1426_v20 = vpop.permute.xlu0 %1425 }
 0x255   : > { %v1528_v10 = vpop.permute.xlu1 %1527 }
 0x259   : > { %v1317_v14 = vpop.permute.xlu1 %1316 }
 0x25d   : > { %v1535_v26 = vpop.permute.xlu1 %1534 }
 0x306   : > { %v644_v47 = vpop.f32.mrb[0].mxu1 }
 0x307   : > { %v1220_v48 = vmul.f32 %v1218_v44, %v644_v47  ;;  %v1780_v49 = vpop.f32.mrb[1].mxu1 }
 0x309   : > { %v1227_v51 = vadd.f32 %v1225_v46, %v1220_v48 }
 0x30a   : > { %v797_v52 = vpop.f32.mrb[2].mxu0 }
 0x30b   : > { %v1228_v53 = vmax.f32 %v1227_v51, 0.0  ;;  %v1329_v54 = vmul.f32 %v1327_v45, %v797_v52  ;;  %v1790_v55 = vpop.f32.mrb[3].mxu0 }
 0x30d   : > { %v1336_v57 = vadd.f32 %v1334_v56, %v1329_v54  ;;  %1817 = vmatpush3.msk.msra.mxu0 %vm421_vm1, %v1228_v53 }
 0x30e   : > { %1819 = vmatmul.mubr.msk.f32.vlgmr.msra.gmra.mrb[6].mxu0 %vm417_vm2, %v1120_v40  ;;  %1821 = vmatprep.subr.mxu0 %v2248_v0 }
 0x30f   : > { %v1337_v59 = vmax.f32 %v1336_v57, 0.0  ;;  %1823 = vmatprep.mubr.msk.f32.mxu0 %vm2249_vm0, %v2248_v0 }
 0x311   : > { %1822 = vmatpush3.msk.msra.mxu0 %vm421_vm1, %v1337_v59 }
 0x312   : > { %1824 = vmatmul.mubr.msk.f32.vlgmr.msra.gmra.mrb[8].mxu0 %vm417_vm2, %v1120_v40  ;;  %1826 = vmatprep.subr.mxu0 %v2248_v0 }
 0x313   : > { %1828 = vmatprep.mubr.msk.f32.mxu0 %vm2249_vm0, %v2248_v0 }
 0x318   : > { %v1193_v61 = vpop.f32.mrb[4].mxu0 }
 0x319   : > { %v1203_v62 = vmul.f32 %v1201_v58, %v1193_v61  ;;  %v1815_v63 = vpop.f32.mrb[5].mxu0 }
 0x31b   : > { %v1210_v2 = vadd.f32 %v1208_v1, %v1203_v62 }
 0x31d   : > { %v1211_v3 = vmax.f32 %v1210_v2, 0.0 }
 0x31f   : > { %1213 = vst.msk [vmem:[%s2656_s15] sm:$0xff] %vm1212_vm7, %v1211_v3 }
 0x322   : > { %v1100_v4 = vpop.f32.mrb[2].mxu1 }
 0x323   : > { %v1438_v5 = vmul.f32 %v1436_v50, %v1100_v4  ;;  %v1810_v6 = vpop.f32.mrb[3].mxu1 }
 0x325   : > { %v1445_v8 = vadd.f32 %v1443_v7, %v1438_v5 }
 0x327   : > { %v1446_v0 = vmax.f32 %v1445_v8, 0.0 }
 0x329   : > { %1827 = vmatpush3.msk.msra.mxu0 %vm421_vm1, %v1446_v0 }
 0x32a   : > { %1829 = vmatmul.mubr.msk.f32.vlgmr.msra.gmra.mrb[10].mxu0 %vm417_vm2, %v1120_v40 }
 0x3e1   : > { %v1302_v11 = vpop.f32.mrb[6].mxu0 }
 0x3e2   : > { %v1312_v12 = vmul.f32 %v1310_v9, %v1302_v11  ;;  %v1820_v13 = vpop.f32.mrb[7].mxu0 }
 0x3e4   : > { %v1319_v15 = vadd.f32 %v1317_v14, %v1312_v12 }
 0x3e5   : > { %v1411_v16 = vpop.f32.mrb[8].mxu0 }
 0x3e6   : > { %v1320_v17 = vmax.f32 %v1319_v15, 0.0  ;;  %v1421_v18 = vmul.f32 %v1419_v60, %v1411_v16  ;;  %v1825_v19 = vpop.f32.mrb[9].mxu0 }
 0x3e8   : > { %1727 = vst.msk [vmem:[%s2656_s15 + $0x8] sm:$0xff] %vm1212_vm7, %v1320_v17  ;;  %v1428_v21 = vadd.f32 %v1426_v20, %v1421_v18 }
 0x3ea   : > { %v1429_v22 = vmax.f32 %v1428_v21, 0.0 }
 0x3ec   : > { %1730 = vst.msk [vmem:[%s2656_s15 + $0x10] sm:$0xff] %vm1212_vm7, %v1429_v22 }
 0x3fd   : > { %v1520_v23 = vpop.f32.mrb[10].mxu0 }
 0x3fe   : > { %v1530_v24 = vmul.f32 %v1528_v10, %v1520_v23  ;;  %v1830_v25 = vpop.f32.mrb[11].mxu0 }
 0x400   : > { %v1537_v27 = vadd.f32 %v1535_v26, %v1530_v24 }
 0x402   : > { %v1538_v28 = vmax.f32 %v1537_v27, 0.0 }
 0x404   : > { %1733 = vst.msk [vmem:[%s2656_s15 + $0x18] sm:$0xff] %vm1212_vm7, %v1538_v28 }
 0x405   : > { %2172 = shalt.err (!%p2169_p0)
}
 0x406   : > { %s2173_s23 = scalar_lea.hbm %s2673_s28, 512  ;;  %s2177_s15 = scalar_lea.hbm %s2726_s7, 1024 }
 0x407   : > { %p2174_p4 = scmp.ne.s32.totalorder %s2673_s28, %s2173_s23  ;;  %p2178_p8 = scmp.lt.u32.totalorder %s2673_s28, %s2726_s7 }
 0x408   : > { %p2179_p5 = scmp.lt.u32.totalorder %s2177_s15, %s2173_s23  ;;  %p2181_p6 = scmp.lt.u32.totalorder %s2173_s23, %s2673_s28 }
 0x409   : > { %p2175_p10 = pnand %p2174_p4, %p2748_p9 }
 0x40a   : > { %p2180_p7 = por %p2179_p5, %p2178_p8 }
 0x40b   : > { %p2176_p11 = pneg %p2175_p10 }
 0x40c   : > { %p2182_p12 = por %p2181_p6, %p2180_p7 }
 0x40e   : > { %p2183_p13 = pnand %p2182_p12, %p2176_p11 }
 0x410   : > { %2186 = shalt.err (!%p2183_p13)
}
 0x411   : > { %s2256_s22 = smov 128   ;;  %s2257_s9 = smov 8  }
 0x412   : > { %1867 = dma.vmem_to_hbm [thread:$0]  (%p2748_p9), %s2668_s10, 512, %s2673_s28, %s1542_s17, %s2256_s22, %s2256_s22, %s2257_s9  }
 0x413 PF: > { %s1570_s30 = sand.u32 1, %s2225_s24   ;;  %p2749_p1 = scmp.ne.s32.totalorder %s2737_s20, 0 }
 0x414   : > { %p2750_p3 = scmp.ge.s32.totalorder %s2237_s27, 2  ;;  %s1571_s8 = scalar_lea.sflag [#allocation4], %s1570_s30 }
 0x416   : > { %p1893_p2 = pnand %p2750_p3, %p2749_p1 }
 0x418   : > { %2220 = dma.done.wait (!%p1893_p2), %s1571_s8, 512  }
 0x419   : > { %2222 = vsyncadd (!%p1893_p2), %s1571_s8, 4294966784  ;;  %p23_p0 = scmp.ge.s32.totalorder %s2474_s11, 4   ;;  %s2751_s24 = smov %s2229_s25 }
 0x41a   : > { %s2752_s25 = smov %s2233_s26  ;;  %s2753_s26 = smov %s2485_s16 }
 0x41b   : > { %s2754_s27 = smov %s2474_s11  ;;  %25 = sbr.rel (!%p23_p0) target bundleno = 8 (0x8), region = 128 }
 0x422   :  { %1576 = vsyncpa [#allocation3], 1 }
 0x423   :  { %1578 = vsyncpa [#allocation3 + $0x1], 1 }
 0x424   :  { %1579 = vsyncpa [#allocation6], 1 }
 0x425   :  { %1580 = vsyncpa [#allocation9], 1 }
 0x426   :  { %1581 = vsyncpa [#allocation12], 1 }
 0x427   :  { %1582 = vsyncpa [#allocation4], 1 }
 0x428   :  { %1584 = vsyncpa [#allocation4 + $0x1], 1 }

</bundles_post_ra>
